<compile_context>
chip_gen: v7x
topology: tpu7x:2x2x1
jax: 0.10.0
libtpu: 0.0.40
codegen_flags: <defaults>
</compile_context>

<pallas_src>
import functools

import jax
import jax.numpy as jnp
from jax import lax
from jax.experimental import pallas as pl
from jax.experimental.pallas import tpu as pltpu

GROUPS = 2      # GroupNorm(num_groups=2)
EPS = 1e-5      # PyTorch GroupNorm default eps


def _conv_gn_prelu(x, w_ref, masks_ref, shifts, b, gn_w, gn_b, a, nb, c):
    """One conv_bn_relu stage on a (NB*C, DHW) slab.

    x         : (NB*C, DHW) f32   activations ((sample,channel) on sublanes)
    w_ref     : (27, NB*C, NB*C)  block-diagonal conv weights, tap-major (kd, kh, kw)
    masks_ref : (27, 1, DHW) f32  {0,1} boundary mask per tap (broadcast over rows)
    shifts    : 27 static lane-roll amounts (Python ints)
    b, gn_w, gn_b : (NB*C, 1)     conv bias / GroupNorm affine, tiled per sample
    a         : scalar PReLU slope (from SMEM)
    """
    SB, DHW = x.shape

    # --- Conv3d(3x3x3, stride 1, pad 1): masked lane-rolls -> MXU matmuls ---
    acc = jnp.zeros((SB, DHW), jnp.float32)
    for t, shift in enumerate(shifts):
        if shift == 0:                        # centre tap: no roll, mask is all-ones
            patch = x
        else:
            patch = pltpu.roll(x, shift, axis=1) * masks_ref[t]
        acc = acc + jnp.dot(w_ref[t], patch, preferred_element_type=jnp.float32)
    acc = acc + b                             # conv bias, (SB, 1) broadcast over lanes

    # --- GroupNorm: one-pass sum / sum-of-squares per (sample, group), folded affine ---
    cpg = c // GROUPS
    inv_n = 1.0 / (cpg * DHW)
    s = jnp.sum(acc, axis=1, keepdims=True)           # (SB, 1) per-row sums
    ss = jnp.sum(acc * acc, axis=1, keepdims=True)    # (SB, 1) per-row sum-sq
    scale_rows, shift_rows = [], []
    for smp in range(nb):
        for g in range(GROUPS):
            lo = smp * c + g * cpg
            hi = lo + cpg
            gs = jnp.sum(s[lo:hi])
            gss = jnp.sum(ss[lo:hi])
            m = gs * inv_n
            var = jnp.maximum(gss * inv_n - m * m, 0.0)   # biased variance (PyTorch)
            inv_std = lax.rsqrt(var + EPS)
            scale_rows.append(jnp.full((cpg, 1), inv_std, jnp.float32))
            shift_rows.append(jnp.full((cpg, 1), -m * inv_std, jnp.float32))
    scale = jnp.concatenate(scale_rows, axis=0) * gn_w              # (SB, 1)
    offset = jnp.concatenate(shift_rows, axis=0) * gn_w + gn_b      # (SB, 1)
    y = acc * scale + offset

    # --- PReLU (single shared slope) ---
    return jnp.where(y > 0, y, a * y)


def _resblock_kernel(x_ref, masks_ref,
                     w1_ref, b1_ref, g1w_ref, g1b_ref,
                     w2_ref, b2_ref, g2w_ref, g2b_ref,
                     prelu_ref, out_ref, *, D, H, W, NB, C):
    HW = H * W
    DHW = D * HW
    # Static lane-roll amount per tap; tap order (kd, kh, kw), each in (-1, 0, +1),
    # matching the weight / mask packing done in the wrapper.
    shifts = [(-(dd * HW + dh * W + dw)) % DHW
              for dd in (-1, 0, 1) for dh in (-1, 0, 1) for dw in (-1, 0, 1)]

    x = x_ref[0]                                    # (NB*C, DHW)
    a1 = prelu_ref[0]                               # PReLU slopes from SMEM
    a2 = prelu_ref[1]

    y = _conv_gn_prelu(x, w1_ref, masks_ref, shifts,
                       b1_ref[...], g1w_ref[...], g1b_ref[...], a1, NB, C)
    y = _conv_gn_prelu(y, w2_ref, masks_ref, shifts,
                       b2_ref[...], g2w_ref[...], g2b_ref[...], a2, NB, C)
    out_ref[0] = y + x                              # fused residual add


def _make_tap_masks(D, H, W):
    """Per-tap {0,1} validity masks for the 27 conv taps, flattened to (27,1,DHW)."""
    d = jnp.arange(D).reshape(D, 1, 1)
    h = jnp.arange(H).reshape(1, H, 1)
    w = jnp.arange(W).reshape(1, 1, W)
    masks = []
    for dd in (-1, 0, 1):
        for dh in (-1, 0, 1):
            for dw in (-1, 0, 1):
                valid = ((d + dd >= 0) & (d + dd < D) &
                         (h + dh >= 0) & (h + dh < H) &
                         (w + dw >= 0) & (w + dw < W))
                masks.append(valid.reshape(1, D * H * W))
    return jnp.stack(masks).astype(jnp.float32)     # (27, 1, DHW)


def resblock_forward(x, params_1, params_2):
    """ResBlock.forward.  x: (N, C, D, H, W) float32 (PyTorch NCDHW layout)."""
    N, C, D, H, W = x.shape
    assert C % GROUPS == 0
    DHW = D * H * W

    # Pack NB samples per grid step so the slab uses >= one full sublane tile (8 rows)
    # when C is small; fall back to NB=1 when C >= 8 or N is not divisible.
    nb = 1
    for cand in range(min(N, max(1, 8 // C)), 0, -1):
        if N % cand == 0:
            nb = cand
            break
    SB = nb * C

    x_r = x.reshape(N // nb, SB, DHW)               # no transpose, no pad
    masks = _make_tap_masks(D, H, W)
    eye = jnp.eye(nb, dtype=jnp.float32)

    def prep(p):
        w, b, gn_w, gn_b, a = p                     # w: (Co, Ci, 3, 3, 3) PyTorch layout
        wt = jnp.transpose(w, (2, 3, 4, 0, 1)).reshape(27, C, C)        # (tap, Co, Ci)
        # block-diagonal over the NB packed samples: same (C,C) block per sample
        w_blk = jnp.einsum('sp,tij->tsipj', eye, wt).reshape(27, SB, SB)
        tile = lambda v: jnp.tile(v.reshape(C), (nb,)).reshape(SB, 1)
        return w_blk, tile(b), tile(gn_w), tile(gn_b), a.reshape(-1)

    w1, b1, g1w, g1b, a1 = prep(params_1)
    w2, b2, g2w, g2b, a2 = prep(params_2)
    prelu = jnp.concatenate([a1, a2])               # (2,) -> SMEM scalars

    kernel = functools.partial(_resblock_kernel, D=D, H=H, W=W, NB=nb, C=C)

    x_spec = pl.BlockSpec((1, SB, DHW), lambda n: (n, 0, 0))
    m_spec = pl.BlockSpec((27, 1, DHW), lambda n: (0, 0, 0))
    w_spec = pl.BlockSpec((27, SB, SB), lambda n: (0, 0, 0))
    v_spec = pl.BlockSpec((SB, 1), lambda n: (0, 0))
    s_spec = pl.BlockSpec(memory_space=pltpu.MemorySpace.SMEM)

    out = pl.pallas_call(
        kernel,
        out_shape=jax.ShapeDtypeStruct((N // nb, SB, DHW), jnp.float32),
        grid_spec=pltpu.PrefetchScalarGridSpec(
            num_scalar_prefetch=0,
            grid=(N // nb,),
            in_specs=[x_spec, m_spec,
                      w_spec, v_spec, v_spec, v_spec,
                      w_spec, v_spec, v_spec, v_spec,
                      s_spec],
            out_specs=pl.BlockSpec((1, SB, DHW), lambda n: (n, 0, 0)),
        ),
        compiler_params=pltpu.CompilerParams(dimension_semantics=("parallel",)),
    )(x_r, masks, w1, b1, g1w, g1b, w2, b2, g2w, g2b, prelu)
    return out.reshape(N, C, D, H, W)


# ---------------- pure-JAX reference (for correctness check only) ----------------
def _ref_block(x, w, b, gn_w, gn_b, a):
    y = lax.conv_general_dilated(x, w, window_strides=(1, 1, 1),
                                 padding=[(1, 1)] * 3,
                                 dimension_numbers=('NCDHW', 'OIDHW', 'NCDHW'))
    y = y + b.reshape(1, -1, 1, 1, 1)
    N, C, D, H, W = y.shape
    yr = y.reshape(N, GROUPS, C // GROUPS, D * H * W)
    m = jnp.mean(yr, axis=(2, 3), keepdims=True)
    v = jnp.mean((yr - m) ** 2, axis=(2, 3), keepdims=True)
    yn = ((yr - m) * lax.rsqrt(v + EPS)).reshape(N, C, D, H, W)
    yn = yn * gn_w.reshape(1, -1, 1, 1, 1) + gn_b.reshape(1, -1, 1, 1, 1)
    return jnp.where(yn > 0, yn, a[0] * yn)


if __name__ == "__main__":
    key = jax.random.PRNGKey(0)
    N, C, D, H, W = 2, 4, 8, 8, 8
    k_x, k_w1, k_b1, k_w2, k_b2 = jax.random.split(key, 5)

    x = jax.random.normal(k_x, (N, C, D, H, W), jnp.float32)

    def init_block(kw_key, kb_key):
        # Conv3d weight/bias in PyTorch (Co, Ci, kd, kh, kw) layout;
        # GroupNorm weight=1, bias=0; PReLU single parameter a=0.25.
        w = jax.random.normal(kw_key, (C, C, 3, 3, 3), jnp.float32) * 0.1
        b = jax.random.normal(kb_key, (C,), jnp.float32) * 0.1
        gn_w = jnp.ones((C,), jnp.float32)
        gn_b = jnp.zeros((C,), jnp.float32)
        a = jnp.full((1,), 0.25, jnp.float32)
        return (w, b, gn_w, gn_b, a)

    p1 = init_block(k_w1, k_b1)
    p2 = init_block(k_w2, k_b2)

    out = jax.jit(resblock_forward)(x, p1, p2)
    out = jax.block_until_ready(out)

    # reference check
    ref = _ref_block(x, *p1)
    ref = _ref_block(ref, *p2) + x

    assert out.shape == x.shape and out.dtype == jnp.float32
    assert jnp.allclose(out, ref, atol=1e-4, rtol=1e-4), "mismatch vs reference"
    print("KERNEL_OK")
</pallas_src>

<mosaic_0001>
module attributes {stable_mosaic.version = 11 : i64} {
  func.func @_resblock_kernel(%arg0: i32, %arg1: memref<1x8x512xf32, #tpu.memory_space<vmem>>, %arg2: memref<27x1x512xf32, #tpu.memory_space<vmem>>, %arg3: memref<27x8x8xf32, #tpu.memory_space<vmem>>, %arg4: memref<8x1xf32, #tpu.memory_space<vmem>>, %arg5: memref<8x1xf32, #tpu.memory_space<vmem>>, %arg6: memref<8x1xf32, #tpu.memory_space<vmem>>, %arg7: memref<27x8x8xf32, #tpu.memory_space<vmem>>, %arg8: memref<8x1xf32, #tpu.memory_space<vmem>>, %arg9: memref<8x1xf32, #tpu.memory_space<vmem>>, %arg10: memref<8x1xf32, #tpu.memory_space<vmem>>, %arg11: memref<2xf32, #tpu.memory_space<smem>>, %arg12: memref<1x8x512xf32, #tpu.memory_space<vmem>>) attributes {dimension_semantics = [#tpu.dimension_semantics<parallel>], iteration_bounds = array<i64: 1>, scalar_prefetch = 0 : i64, scratch_operands = 0 : i64, tpu.core_type = #tpu.core_type<tc>, window_params = [{transform_indices = @transform_0, window_bounds = array<i64: 1, 8, 512>}, {pipeline_mode = #tpu.pipeline_mode<synchronous>, transform_indices = @transform_1, window_bounds = array<i64: 27, 1, 512>}, {pipeline_mode = #tpu.pipeline_mode<synchronous>, transform_indices = @transform_2, window_bounds = array<i64: 27, 8, 8>}, {pipeline_mode = #tpu.pipeline_mode<synchronous>, transform_indices = @transform_3, window_bounds = array<i64: 8, 1>}, {pipeline_mode = #tpu.pipeline_mode<synchronous>, transform_indices = @transform_4, window_bounds = array<i64: 8, 1>}, {pipeline_mode = #tpu.pipeline_mode<synchronous>, transform_indices = @transform_5, window_bounds = array<i64: 8, 1>}, {pipeline_mode = #tpu.pipeline_mode<synchronous>, transform_indices = @transform_6, window_bounds = array<i64: 27, 8, 8>}, {pipeline_mode = #tpu.pipeline_mode<synchronous>, transform_indices = @transform_7, window_bounds = array<i64: 8, 1>}, {pipeline_mode = #tpu.pipeline_mode<synchronous>, transform_indices = @transform_8, window_bounds = array<i64: 8, 1>}, {pipeline_mode = #tpu.pipeline_mode<synchronous>, transform_indices = @transform_9, window_bounds = array<i64: 8, 1>}, {transform_indices = @transform_10, window_bounds = array<i64: 2>}, {transform_indices = @transform_11, window_bounds = array<i64: 1, 8, 512>}]} {
    %c0 = arith.constant 0 : index
    %c0_0 = arith.constant 0 : index
    %c0_1 = arith.constant 0 : index
    %0 = vector.load %arg1[%c0, %c0_0, %c0_1] : memref<1x8x512xf32, #tpu.memory_space<vmem>>, vector<1x8x512xf32>
    %1 = vector.shape_cast %0 : vector<1x8x512xf32> to vector<8x512xf32>
    %c0_2 = arith.constant 0 : index
    %2 = memref.load %arg11[%c0_2] : memref<2xf32, #tpu.memory_space<smem>>
    %c1 = arith.constant 1 : index
    %3 = memref.load %arg11[%c1] : memref<2xf32, #tpu.memory_space<smem>>
    %c0_3 = arith.constant 0 : index
    %c0_4 = arith.constant 0 : index
    %4 = vector.load %arg4[%c0_3, %c0_4] : memref<8x1xf32, #tpu.memory_space<vmem>>, vector<8x1xf32>
    %c0_5 = arith.constant 0 : index
    %c0_6 = arith.constant 0 : index
    %5 = vector.load %arg5[%c0_5, %c0_6] : memref<8x1xf32, #tpu.memory_space<vmem>>, vector<8x1xf32>
    %c0_7 = arith.constant 0 : index
    %c0_8 = arith.constant 0 : index
    %6 = vector.load %arg6[%c0_7, %c0_8] : memref<8x1xf32, #tpu.memory_space<vmem>>, vector<8x1xf32>
    %cst = arith.constant 0.000000e+00 : f32
    %7 = vector.broadcast %cst : f32 to vector<8x512xf32>
    %c73_i32 = arith.constant 73 : i32
    %8 = tpu.dynamic_rotate %1 by %c73_i32 dim 1 : vector<8x512xf32>, i32 -> vector<8x512xf32>
    %c0_9 = arith.constant 0 : index
    %c0_10 = arith.constant 0 : index
    %c0_11 = arith.constant 0 : index
    %9 = vector.load %arg2[%c0_9, %c0_10, %c0_11] : memref<27x1x512xf32, #tpu.memory_space<vmem>>, vector<1x1x512xf32>
    %10 = vector.shape_cast %9 : vector<1x1x512xf32> to vector<1x512xf32>
    %11 = vector.broadcast %10 : vector<1x512xf32> to vector<8x512xf32>
    %12 = arith.mulf %8, %11 : vector<8x512xf32>
    %c0_12 = arith.constant 0 : index
    %c0_13 = arith.constant 0 : index
    %c0_14 = arith.constant 0 : index
    %13 = vector.load %arg3[%c0_12, %c0_13, %c0_14] : memref<27x8x8xf32, #tpu.memory_space<vmem>>, vector<1x8x8xf32>
    %14 = vector.shape_cast %13 : vector<1x8x8xf32> to vector<8x8xf32>
    %cst_15 = arith.constant dense<0.000000e+00> : vector<8x512xf32>
    %15 = tpu.matmul %14, %12, %cst_15 {dimension_numbers = #tpu.dot_dimension_numbers<[1], [0], [0], [1], [0, 0, 1, 1], [], []>} : vector<8x8xf32>, vector<8x512xf32>, vector<8x512xf32> -> vector<8x512xf32>
    %16 = arith.addf %7, %15 : vector<8x512xf32>
    %c72_i32 = arith.constant 72 : i32
    %17 = tpu.dynamic_rotate %1 by %c72_i32 dim 1 : vector<8x512xf32>, i32 -> vector<8x512xf32>
    %c1_16 = arith.constant 1 : index
    %c0_17 = arith.constant 0 : index
    %c0_18 = arith.constant 0 : index
    %18 = vector.load %arg2[%c1_16, %c0_17, %c0_18] : memref<27x1x512xf32, #tpu.memory_space<vmem>>, vector<1x1x512xf32>
    %19 = vector.shape_cast %18 : vector<1x1x512xf32> to vector<1x512xf32>
    %20 = vector.broadcast %19 : vector<1x512xf32> to vector<8x512xf32>
    %21 = arith.mulf %17, %20 : vector<8x512xf32>
    %c1_19 = arith.constant 1 : index
    %c0_20 = arith.constant 0 : index
    %c0_21 = arith.constant 0 : index
    %22 = vector.load %arg3[%c1_19, %c0_20, %c0_21] : memref<27x8x8xf32, #tpu.memory_space<vmem>>, vector<1x8x8xf32>
    %23 = vector.shape_cast %22 : vector<1x8x8xf32> to vector<8x8xf32>
    %cst_22 = arith.constant dense<0.000000e+00> : vector<8x512xf32>
    %24 = tpu.matmul %23, %21, %cst_22 {dimension_numbers = #tpu.dot_dimension_numbers<[1], [0], [0], [1], [0, 0, 1, 1], [], []>} : vector<8x8xf32>, vector<8x512xf32>, vector<8x512xf32> -> vector<8x512xf32>
    %25 = arith.addf %16, %24 : vector<8x512xf32>
    %c71_i32 = arith.constant 71 : i32
    %26 = tpu.dynamic_rotate %1 by %c71_i32 dim 1 : vector<8x512xf32>, i32 -> vector<8x512xf32>
    %c2 = arith.constant 2 : index
    %c0_23 = arith.constant 0 : index
    %c0_24 = arith.constant 0 : index
    %27 = vector.load %arg2[%c2, %c0_23, %c0_24] : memref<27x1x512xf32, #tpu.memory_space<vmem>>, vector<1x1x512xf32>
    %28 = vector.shape_cast %27 : vector<1x1x512xf32> to vector<1x512xf32>
    %29 = vector.broadcast %28 : vector<1x512xf32> to vector<8x512xf32>
    %30 = arith.mulf %26, %29 : vector<8x512xf32>
    %c2_25 = arith.constant 2 : index
    %c0_26 = arith.constant 0 : index
    %c0_27 = arith.constant 0 : index
    %31 = vector.load %arg3[%c2_25, %c0_26, %c0_27] : memref<27x8x8xf32, #tpu.memory_space<vmem>>, vector<1x8x8xf32>
    %32 = vector.shape_cast %31 : vector<1x8x8xf32> to vector<8x8xf32>
    %cst_28 = arith.constant dense<0.000000e+00> : vector<8x512xf32>
    %33 = tpu.matmul %32, %30, %cst_28 {dimension_numbers = #tpu.dot_dimension_numbers<[1], [0], [0], [1], [0, 0, 1, 1], [], []>} : vector<8x8xf32>, vector<8x512xf32>, vector<8x512xf32> -> vector<8x512xf32>
    %34 = arith.addf %25, %33 : vector<8x512xf32>
    %c65_i32 = arith.constant 65 : i32
    %35 = tpu.dynamic_rotate %1 by %c65_i32 dim 1 : vector<8x512xf32>, i32 -> vector<8x512xf32>
    %c3 = arith.constant 3 : index
    %c0_29 = arith.constant 0 : index
    %c0_30 = arith.constant 0 : index
    %36 = vector.load %arg2[%c3, %c0_29, %c0_30] : memref<27x1x512xf32, #tpu.memory_space<vmem>>, vector<1x1x512xf32>
    %37 = vector.shape_cast %36 : vector<1x1x512xf32> to vector<1x512xf32>
    %38 = vector.broadcast %37 : vector<1x512xf32> to vector<8x512xf32>
    %39 = arith.mulf %35, %38 : vector<8x512xf32>
    %c3_31 = arith.constant 3 : index
    %c0_32 = arith.constant 0 : index
    %c0_33 = arith.constant 0 : index
    %40 = vector.load %arg3[%c3_31, %c0_32, %c0_33] : memref<27x8x8xf32, #tpu.memory_space<vmem>>, vector<1x8x8xf32>
    %41 = vector.shape_cast %40 : vector<1x8x8xf32> to vector<8x8xf32>
    %cst_34 = arith.constant dense<0.000000e+00> : vector<8x512xf32>
    %42 = tpu.matmul %41, %39, %cst_34 {dimension_numbers = #tpu.dot_dimension_numbers<[1], [0], [0], [1], [0, 0, 1, 1], [], []>} : vector<8x8xf32>, vector<8x512xf32>, vector<8x512xf32> -> vector<8x512xf32>
    %43 = arith.addf %34, %42 : vector<8x512xf32>
    %c64_i32 = arith.constant 64 : i32
    %44 = tpu.dynamic_rotate %1 by %c64_i32 dim 1 : vector<8x512xf32>, i32 -> vector<8x512xf32>
    %c4 = arith.constant 4 : index
    %c0_35 = arith.constant 0 : index
    %c0_36 = arith.constant 0 : index
    %45 = vector.load %arg2[%c4, %c0_35, %c0_36] : memref<27x1x512xf32, #tpu.memory_space<vmem>>, vector<1x1x512xf32>
    %46 = vector.shape_cast %45 : vector<1x1x512xf32> to vector<1x512xf32>
    %47 = vector.broadcast %46 : vector<1x512xf32> to vector<8x512xf32>
    %48 = arith.mulf %44, %47 : vector<8x512xf32>
    %c4_37 = arith.constant 4 : index
    %c0_38 = arith.constant 0 : index
    %c0_39 = arith.constant 0 : index
    %49 = vector.load %arg3[%c4_37, %c0_38, %c0_39] : memref<27x8x8xf32, #tpu.memory_space<vmem>>, vector<1x8x8xf32>
    %50 = vector.shape_cast %49 : vector<1x8x8xf32> to vector<8x8xf32>
    %cst_40 = arith.constant dense<0.000000e+00> : vector<8x512xf32>
    %51 = tpu.matmul %50, %48, %cst_40 {dimension_numbers = #tpu.dot_dimension_numbers<[1], [0], [0], [1], [0, 0, 1, 1], [], []>} : vector<8x8xf32>, vector<8x512xf32>, vector<8x512xf32> -> vector<8x512xf32>
    %52 = arith.addf %43, %51 : vector<8x512xf32>
    %c63_i32 = arith.constant 63 : i32
    %53 = tpu.dynamic_rotate %1 by %c63_i32 dim 1 : vector<8x512xf32>, i32 -> vector<8x512xf32>
    %c5 = arith.constant 5 : index
    %c0_41 = arith.constant 0 : index
    %c0_42 = arith.constant 0 : index
    %54 = vector.load %arg2[%c5, %c0_41, %c0_42] : memref<27x1x512xf32, #tpu.memory_space<vmem>>, vector<1x1x512xf32>
    %55 = vector.shape_cast %54 : vector<1x1x512xf32> to vector<1x512xf32>
    %56 = vector.broadcast %55 : vector<1x512xf32> to vector<8x512xf32>
    %57 = arith.mulf %53, %56 : vector<8x512xf32>
    %c5_43 = arith.constant 5 : index
    %c0_44 = arith.constant 0 : index
    %c0_45 = arith.constant 0 : index
    %58 = vector.load %arg3[%c5_43, %c0_44, %c0_45] : memref<27x8x8xf32, #tpu.memory_space<vmem>>, vector<1x8x8xf32>
    %59 = vector.shape_cast %58 : vector<1x8x8xf32> to vector<8x8xf32>
    %cst_46 = arith.constant dense<0.000000e+00> : vector<8x512xf32>
    %60 = tpu.matmul %59, %57, %cst_46 {dimension_numbers = #tpu.dot_dimension_numbers<[1], [0], [0], [1], [0, 0, 1, 1], [], []>} : vector<8x8xf32>, vector<8x512xf32>, vector<8x512xf32> -> vector<8x512xf32>
    %61 = arith.addf %52, %60 : vector<8x512xf32>
    %c57_i32 = arith.constant 57 : i32
    %62 = tpu.dynamic_rotate %1 by %c57_i32 dim 1 : vector<8x512xf32>, i32 -> vector<8x512xf32>
    %c6 = arith.constant 6 : index
    %c0_47 = arith.constant 0 : index
    %c0_48 = arith.constant 0 : index
    %63 = vector.load %arg2[%c6, %c0_47, %c0_48] : memref<27x1x512xf32, #tpu.memory_space<vmem>>, vector<1x1x512xf32>
    %64 = vector.shape_cast %63 : vector<1x1x512xf32> to vector<1x512xf32>
    %65 = vector.broadcast %64 : vector<1x512xf32> to vector<8x512xf32>
    %66 = arith.mulf %62, %65 : vector<8x512xf32>
    %c6_49 = arith.constant 6 : index
    %c0_50 = arith.constant 0 : index
    %c0_51 = arith.constant 0 : index
    %67 = vector.load %arg3[%c6_49, %c0_50, %c0_51] : memref<27x8x8xf32, #tpu.memory_space<vmem>>, vector<1x8x8xf32>
    %68 = vector.shape_cast %67 : vector<1x8x8xf32> to vector<8x8xf32>
    %cst_52 = arith.constant dense<0.000000e+00> : vector<8x512xf32>
    %69 = tpu.matmul %68, %66, %cst_52 {dimension_numbers = #tpu.dot_dimension_numbers<[1], [0], [0], [1], [0, 0, 1, 1], [], []>} : vector<8x8xf32>, vector<8x512xf32>, vector<8x512xf32> -> vector<8x512xf32>
    %70 = arith.addf %61, %69 : vector<8x512xf32>
    %c56_i32 = arith.constant 56 : i32
    %71 = tpu.dynamic_rotate %1 by %c56_i32 dim 1 : vector<8x512xf32>, i32 -> vector<8x512xf32>
    %c7 = arith.constant 7 : index
    %c0_53 = arith.constant 0 : index
    %c0_54 = arith.constant 0 : index
    %72 = vector.load %arg2[%c7, %c0_53, %c0_54] : memref<27x1x512xf32, #tpu.memory_space<vmem>>, vector<1x1x512xf32>
    %73 = vector.shape_cast %72 : vector<1x1x512xf32> to vector<1x512xf32>
    %74 = vector.broadcast %73 : vector<1x512xf32> to vector<8x512xf32>
    %75 = arith.mulf %71, %74 : vector<8x512xf32>
    %c7_55 = arith.constant 7 : index
    %c0_56 = arith.constant 0 : index
    %c0_57 = arith.constant 0 : index
    %76 = vector.load %arg3[%c7_55, %c0_56, %c0_57] : memref<27x8x8xf32, #tpu.memory_space<vmem>>, vector<1x8x8xf32>
    %77 = vector.shape_cast %76 : vector<1x8x8xf32> to vector<8x8xf32>
    %cst_58 = arith.constant dense<0.000000e+00> : vector<8x512xf32>
    %78 = tpu.matmul %77, %75, %cst_58 {dimension_numbers = #tpu.dot_dimension_numbers<[1], [0], [0], [1], [0, 0, 1, 1], [], []>} : vector<8x8xf32>, vector<8x512xf32>, vector<8x512xf32> -> vector<8x512xf32>
    %79 = arith.addf %70, %78 : vector<8x512xf32>
    %c55_i32 = arith.constant 55 : i32
    %80 = tpu.dynamic_rotate %1 by %c55_i32 dim 1 : vector<8x512xf32>, i32 -> vector<8x512xf32>
    %c8 = arith.constant 8 : index
    %c0_59 = arith.constant 0 : index
    %c0_60 = arith.constant 0 : index
    %81 = vector.load %arg2[%c8, %c0_59, %c0_60] : memref<27x1x512xf32, #tpu.memory_space<vmem>>, vector<1x1x512xf32>
    %82 = vector.shape_cast %81 : vector<1x1x512xf32> to vector<1x512xf32>
    %83 = vector.broadcast %82 : vector<1x512xf32> to vector<8x512xf32>
    %84 = arith.mulf %80, %83 : vector<8x512xf32>
    %c8_61 = arith.constant 8 : index
    %c0_62 = arith.constant 0 : index
    %c0_63 = arith.constant 0 : index
    %85 = vector.load %arg3[%c8_61, %c0_62, %c0_63] : memref<27x8x8xf32, #tpu.memory_space<vmem>>, vector<1x8x8xf32>
    %86 = vector.shape_cast %85 : vector<1x8x8xf32> to vector<8x8xf32>
    %cst_64 = arith.constant dense<0.000000e+00> : vector<8x512xf32>
    %87 = tpu.matmul %86, %84, %cst_64 {dimension_numbers = #tpu.dot_dimension_numbers<[1], [0], [0], [1], [0, 0, 1, 1], [], []>} : vector<8x8xf32>, vector<8x512xf32>, vector<8x512xf32> -> vector<8x512xf32>
    %88 = arith.addf %79, %87 : vector<8x512xf32>
    %c9_i32 = arith.constant 9 : i32
    %89 = tpu.dynamic_rotate %1 by %c9_i32 dim 1 : vector<8x512xf32>, i32 -> vector<8x512xf32>
    %c9 = arith.constant 9 : index
    %c0_65 = arith.constant 0 : index
    %c0_66 = arith.constant 0 : index
    %90 = vector.load %arg2[%c9, %c0_65, %c0_66] : memref<27x1x512xf32, #tpu.memory_space<vmem>>, vector<1x1x512xf32>
    %91 = vector.shape_cast %90 : vector<1x1x512xf32> to vector<1x512xf32>
    %92 = vector.broadcast %91 : vector<1x512xf32> to vector<8x512xf32>
    %93 = arith.mulf %89, %92 : vector<8x512xf32>
    %c9_67 = arith.constant 9 : index
    %c0_68 = arith.constant 0 : index
    %c0_69 = arith.constant 0 : index
    %94 = vector.load %arg3[%c9_67, %c0_68, %c0_69] : memref<27x8x8xf32, #tpu.memory_space<vmem>>, vector<1x8x8xf32>
    %95 = vector.shape_cast %94 : vector<1x8x8xf32> to vector<8x8xf32>
    %cst_70 = arith.constant dense<0.000000e+00> : vector<8x512xf32>
    %96 = tpu.matmul %95, %93, %cst_70 {dimension_numbers = #tpu.dot_dimension_numbers<[1], [0], [0], [1], [0, 0, 1, 1], [], []>} : vector<8x8xf32>, vector<8x512xf32>, vector<8x512xf32> -> vector<8x512xf32>
    %97 = arith.addf %88, %96 : vector<8x512xf32>
    %c8_i32 = arith.constant 8 : i32
    %98 = tpu.dynamic_rotate %1 by %c8_i32 dim 1 : vector<8x512xf32>, i32 -> vector<8x512xf32>
    %c10 = arith.constant 10 : index
    %c0_71 = arith.constant 0 : index
    %c0_72 = arith.constant 0 : index
    %99 = vector.load %arg2[%c10, %c0_71, %c0_72] : memref<27x1x512xf32, #tpu.memory_space<vmem>>, vector<1x1x512xf32>
    %100 = vector.shape_cast %99 : vector<1x1x512xf32> to vector<1x512xf32>
    %101 = vector.broadcast %100 : vector<1x512xf32> to vector<8x512xf32>
    %102 = arith.mulf %98, %101 : vector<8x512xf32>
    %c10_73 = arith.constant 10 : index
    %c0_74 = arith.constant 0 : index
    %c0_75 = arith.constant 0 : index
    %103 = vector.load %arg3[%c10_73, %c0_74, %c0_75] : memref<27x8x8xf32, #tpu.memory_space<vmem>>, vector<1x8x8xf32>
    %104 = vector.shape_cast %103 : vector<1x8x8xf32> to vector<8x8xf32>
    %cst_76 = arith.constant dense<0.000000e+00> : vector<8x512xf32>
    %105 = tpu.matmul %104, %102, %cst_76 {dimension_numbers = #tpu.dot_dimension_numbers<[1], [0], [0], [1], [0, 0, 1, 1], [], []>} : vector<8x8xf32>, vector<8x512xf32>, vector<8x512xf32> -> vector<8x512xf32>
    %106 = arith.addf %97, %105 : vector<8x512xf32>
    %c7_i32 = arith.constant 7 : i32
    %107 = tpu.dynamic_rotate %1 by %c7_i32 dim 1 : vector<8x512xf32>, i32 -> vector<8x512xf32>
    %c11 = arith.constant 11 : index
    %c0_77 = arith.constant 0 : index
    %c0_78 = arith.constant 0 : index
    %108 = vector.load %arg2[%c11, %c0_77, %c0_78] : memref<27x1x512xf32, #tpu.memory_space<vmem>>, vector<1x1x512xf32>
    %109 = vector.shape_cast %108 : vector<1x1x512xf32> to vector<1x512xf32>
    %110 = vector.broadcast %109 : vector<1x512xf32> to vector<8x512xf32>
    %111 = arith.mulf %107, %110 : vector<8x512xf32>
    %c11_79 = arith.constant 11 : index
    %c0_80 = arith.constant 0 : index
    %c0_81 = arith.constant 0 : index
    %112 = vector.load %arg3[%c11_79, %c0_80, %c0_81] : memref<27x8x8xf32, #tpu.memory_space<vmem>>, vector<1x8x8xf32>
    %113 = vector.shape_cast %112 : vector<1x8x8xf32> to vector<8x8xf32>
    %cst_82 = arith.constant dense<0.000000e+00> : vector<8x512xf32>
    %114 = tpu.matmul %113, %111, %cst_82 {dimension_numbers = #tpu.dot_dimension_numbers<[1], [0], [0], [1], [0, 0, 1, 1], [], []>} : vector<8x8xf32>, vector<8x512xf32>, vector<8x512xf32> -> vector<8x512xf32>
    %115 = arith.addf %106, %114 : vector<8x512xf32>
    %c1_i32 = arith.constant 1 : i32
    %116 = tpu.dynamic_rotate %1 by %c1_i32 dim 1 : vector<8x512xf32>, i32 -> vector<8x512xf32>
    %c12 = arith.constant 12 : index
    %c0_83 = arith.constant 0 : index
    %c0_84 = arith.constant 0 : index
    %117 = vector.load %arg2[%c12, %c0_83, %c0_84] : memref<27x1x512xf32, #tpu.memory_space<vmem>>, vector<1x1x512xf32>
    %118 = vector.shape_cast %117 : vector<1x1x512xf32> to vector<1x512xf32>
    %119 = vector.broadcast %118 : vector<1x512xf32> to vector<8x512xf32>
    %120 = arith.mulf %116, %119 : vector<8x512xf32>
    %c12_85 = arith.constant 12 : index
    %c0_86 = arith.constant 0 : index
    %c0_87 = arith.constant 0 : index
    %121 = vector.load %arg3[%c12_85, %c0_86, %c0_87] : memref<27x8x8xf32, #tpu.memory_space<vmem>>, vector<1x8x8xf32>
    %122 = vector.shape_cast %121 : vector<1x8x8xf32> to vector<8x8xf32>
    %cst_88 = arith.constant dense<0.000000e+00> : vector<8x512xf32>
    %123 = tpu.matmul %122, %120, %cst_88 {dimension_numbers = #tpu.dot_dimension_numbers<[1], [0], [0], [1], [0, 0, 1, 1], [], []>} : vector<8x8xf32>, vector<8x512xf32>, vector<8x512xf32> -> vector<8x512xf32>
    %124 = arith.addf %115, %123 : vector<8x512xf32>
    %c13 = arith.constant 13 : index
    %c0_89 = arith.constant 0 : index
    %c0_90 = arith.constant 0 : index
    %125 = vector.load %arg3[%c13, %c0_89, %c0_90] : memref<27x8x8xf32, #tpu.memory_space<vmem>>, vector<1x8x8xf32>
    %126 = vector.shape_cast %125 : vector<1x8x8xf32> to vector<8x8xf32>
    %cst_91 = arith.constant dense<0.000000e+00> : vector<8x512xf32>
    %127 = tpu.matmul %126, %1, %cst_91 {dimension_numbers = #tpu.dot_dimension_numbers<[1], [0], [0], [1], [0, 0, 1, 1], [], []>} : vector<8x8xf32>, vector<8x512xf32>, vector<8x512xf32> -> vector<8x512xf32>
    %128 = arith.addf %124, %127 : vector<8x512xf32>
    %c511_i32 = arith.constant 511 : i32
    %129 = tpu.dynamic_rotate %1 by %c511_i32 dim 1 : vector<8x512xf32>, i32 -> vector<8x512xf32>
    %c14 = arith.constant 14 : index
    %c0_92 = arith.constant 0 : index
    %c0_93 = arith.constant 0 : index
    %130 = vector.load %arg2[%c14, %c0_92, %c0_93] : memref<27x1x512xf32, #tpu.memory_space<vmem>>, vector<1x1x512xf32>
    %131 = vector.shape_cast %130 : vector<1x1x512xf32> to vector<1x512xf32>
    %132 = vector.broadcast %131 : vector<1x512xf32> to vector<8x512xf32>
    %133 = arith.mulf %129, %132 : vector<8x512xf32>
    %c14_94 = arith.constant 14 : index
    %c0_95 = arith.constant 0 : index
    %c0_96 = arith.constant 0 : index
    %134 = vector.load %arg3[%c14_94, %c0_95, %c0_96] : memref<27x8x8xf32, #tpu.memory_space<vmem>>, vector<1x8x8xf32>
    %135 = vector.shape_cast %134 : vector<1x8x8xf32> to vector<8x8xf32>
    %cst_97 = arith.constant dense<0.000000e+00> : vector<8x512xf32>
    %136 = tpu.matmul %135, %133, %cst_97 {dimension_numbers = #tpu.dot_dimension_numbers<[1], [0], [0], [1], [0, 0, 1, 1], [], []>} : vector<8x8xf32>, vector<8x512xf32>, vector<8x512xf32> -> vector<8x512xf32>
    %137 = arith.addf %128, %136 : vector<8x512xf32>
    %c505_i32 = arith.constant 505 : i32
    %138 = tpu.dynamic_rotate %1 by %c505_i32 dim 1 : vector<8x512xf32>, i32 -> vector<8x512xf32>
    %c15 = arith.constant 15 : index
    %c0_98 = arith.constant 0 : index
    %c0_99 = arith.constant 0 : index
    %139 = vector.load %arg2[%c15, %c0_98, %c0_99] : memref<27x1x512xf32, #tpu.memory_space<vmem>>, vector<1x1x512xf32>
    %140 = vector.shape_cast %139 : vector<1x1x512xf32> to vector<1x512xf32>
    %141 = vector.broadcast %140 : vector<1x512xf32> to vector<8x512xf32>
    %142 = arith.mulf %138, %141 : vector<8x512xf32>
    %c15_100 = arith.constant 15 : index
    %c0_101 = arith.constant 0 : index
    %c0_102 = arith.constant 0 : index
    %143 = vector.load %arg3[%c15_100, %c0_101, %c0_102] : memref<27x8x8xf32, #tpu.memory_space<vmem>>, vector<1x8x8xf32>
    %144 = vector.shape_cast %143 : vector<1x8x8xf32> to vector<8x8xf32>
    %cst_103 = arith.constant dense<0.000000e+00> : vector<8x512xf32>
    %145 = tpu.matmul %144, %142, %cst_103 {dimension_numbers = #tpu.dot_dimension_numbers<[1], [0], [0], [1], [0, 0, 1, 1], [], []>} : vector<8x8xf32>, vector<8x512xf32>, vector<8x512xf32> -> vector<8x512xf32>
    %146 = arith.addf %137, %145 : vector<8x512xf32>
    %c504_i32 = arith.constant 504 : i32
    %147 = tpu.dynamic_rotate %1 by %c504_i32 dim 1 : vector<8x512xf32>, i32 -> vector<8x512xf32>
    %c16 = arith.constant 16 : index
    %c0_104 = arith.constant 0 : index
    %c0_105 = arith.constant 0 : index
    %148 = vector.load %arg2[%c16, %c0_104, %c0_105] : memref<27x1x512xf32, #tpu.memory_space<vmem>>, vector<1x1x512xf32>
    %149 = vector.shape_cast %148 : vector<1x1x512xf32> to vector<1x512xf32>
    %150 = vector.broadcast %149 : vector<1x512xf32> to vector<8x512xf32>
    %151 = arith.mulf %147, %150 : vector<8x512xf32>
    %c16_106 = arith.constant 16 : index
    %c0_107 = arith.constant 0 : index
    %c0_108 = arith.constant 0 : index
    %152 = vector.load %arg3[%c16_106, %c0_107, %c0_108] : memref<27x8x8xf32, #tpu.memory_space<vmem>>, vector<1x8x8xf32>
    %153 = vector.shape_cast %152 : vector<1x8x8xf32> to vector<8x8xf32>
    %cst_109 = arith.constant dense<0.000000e+00> : vector<8x512xf32>
    %154 = tpu.matmul %153, %151, %cst_109 {dimension_numbers = #tpu.dot_dimension_numbers<[1], [0], [0], [1], [0, 0, 1, 1], [], []>} : vector<8x8xf32>, vector<8x512xf32>, vector<8x512xf32> -> vector<8x512xf32>
    %155 = arith.addf %146, %154 : vector<8x512xf32>
    %c503_i32 = arith.constant 503 : i32
    %156 = tpu.dynamic_rotate %1 by %c503_i32 dim 1 : vector<8x512xf32>, i32 -> vector<8x512xf32>
    %c17 = arith.constant 17 : index
    %c0_110 = arith.constant 0 : index
    %c0_111 = arith.constant 0 : index
    %157 = vector.load %arg2[%c17, %c0_110, %c0_111] : memref<27x1x512xf32, #tpu.memory_space<vmem>>, vector<1x1x512xf32>
    %158 = vector.shape_cast %157 : vector<1x1x512xf32> to vector<1x512xf32>
    %159 = vector.broadcast %158 : vector<1x512xf32> to vector<8x512xf32>
    %160 = arith.mulf %156, %159 : vector<8x512xf32>
    %c17_112 = arith.constant 17 : index
    %c0_113 = arith.constant 0 : index
    %c0_114 = arith.constant 0 : index
    %161 = vector.load %arg3[%c17_112, %c0_113, %c0_114] : memref<27x8x8xf32, #tpu.memory_space<vmem>>, vector<1x8x8xf32>
    %162 = vector.shape_cast %161 : vector<1x8x8xf32> to vector<8x8xf32>
    %cst_115 = arith.constant dense<0.000000e+00> : vector<8x512xf32>
    %163 = tpu.matmul %162, %160, %cst_115 {dimension_numbers = #tpu.dot_dimension_numbers<[1], [0], [0], [1], [0, 0, 1, 1], [], []>} : vector<8x8xf32>, vector<8x512xf32>, vector<8x512xf32> -> vector<8x512xf32>
    %164 = arith.addf %155, %163 : vector<8x512xf32>
    %c457_i32 = arith.constant 457 : i32
    %165 = tpu.dynamic_rotate %1 by %c457_i32 dim 1 : vector<8x512xf32>, i32 -> vector<8x512xf32>
    %c18 = arith.constant 18 : index
    %c0_116 = arith.constant 0 : index
    %c0_117 = arith.constant 0 : index
    %166 = vector.load %arg2[%c18, %c0_116, %c0_117] : memref<27x1x512xf32, #tpu.memory_space<vmem>>, vector<1x1x512xf32>
    %167 = vector.shape_cast %166 : vector<1x1x512xf32> to vector<1x512xf32>
    %168 = vector.broadcast %167 : vector<1x512xf32> to vector<8x512xf32>
    %169 = arith.mulf %165, %168 : vector<8x512xf32>
    %c18_118 = arith.constant 18 : index
    %c0_119 = arith.constant 0 : index
    %c0_120 = arith.constant 0 : index
    %170 = vector.load %arg3[%c18_118, %c0_119, %c0_120] : memref<27x8x8xf32, #tpu.memory_space<vmem>>, vector<1x8x8xf32>
    %171 = vector.shape_cast %170 : vector<1x8x8xf32> to vector<8x8xf32>
    %cst_121 = arith.constant dense<0.000000e+00> : vector<8x512xf32>
    %172 = tpu.matmul %171, %169, %cst_121 {dimension_numbers = #tpu.dot_dimension_numbers<[1], [0], [0], [1], [0, 0, 1, 1], [], []>} : vector<8x8xf32>, vector<8x512xf32>, vector<8x512xf32> -> vector<8x512xf32>
    %173 = arith.addf %164, %172 : vector<8x512xf32>
    %c456_i32 = arith.constant 456 : i32
    %174 = tpu.dynamic_rotate %1 by %c456_i32 dim 1 : vector<8x512xf32>, i32 -> vector<8x512xf32>
    %c19 = arith.constant 19 : index
    %c0_122 = arith.constant 0 : index
    %c0_123 = arith.constant 0 : index
    %175 = vector.load %arg2[%c19, %c0_122, %c0_123] : memref<27x1x512xf32, #tpu.memory_space<vmem>>, vector<1x1x512xf32>
    %176 = vector.shape_cast %175 : vector<1x1x512xf32> to vector<1x512xf32>
    %177 = vector.broadcast %176 : vector<1x512xf32> to vector<8x512xf32>
    %178 = arith.mulf %174, %177 : vector<8x512xf32>
    %c19_124 = arith.constant 19 : index
    %c0_125 = arith.constant 0 : index
    %c0_126 = arith.constant 0 : index
    %179 = vector.load %arg3[%c19_124, %c0_125, %c0_126] : memref<27x8x8xf32, #tpu.memory_space<vmem>>, vector<1x8x8xf32>
    %180 = vector.shape_cast %179 : vector<1x8x8xf32> to vector<8x8xf32>
    %cst_127 = arith.constant dense<0.000000e+00> : vector<8x512xf32>
    %181 = tpu.matmul %180, %178, %cst_127 {dimension_numbers = #tpu.dot_dimension_numbers<[1], [0], [0], [1], [0, 0, 1, 1], [], []>} : vector<8x8xf32>, vector<8x512xf32>, vector<8x512xf32> -> vector<8x512xf32>
    %182 = arith.addf %173, %181 : vector<8x512xf32>
    %c455_i32 = arith.constant 455 : i32
    %183 = tpu.dynamic_rotate %1 by %c455_i32 dim 1 : vector<8x512xf32>, i32 -> vector<8x512xf32>
    %c20 = arith.constant 20 : index
    %c0_128 = arith.constant 0 : index
    %c0_129 = arith.constant 0 : index
    %184 = vector.load %arg2[%c20, %c0_128, %c0_129] : memref<27x1x512xf32, #tpu.memory_space<vmem>>, vector<1x1x512xf32>
    %185 = vector.shape_cast %184 : vector<1x1x512xf32> to vector<1x512xf32>
    %186 = vector.broadcast %185 : vector<1x512xf32> to vector<8x512xf32>
    %187 = arith.mulf %183, %186 : vector<8x512xf32>
    %c20_130 = arith.constant 20 : index
    %c0_131 = arith.constant 0 : index
    %c0_132 = arith.constant 0 : index
    %188 = vector.load %arg3[%c20_130, %c0_131, %c0_132] : memref<27x8x8xf32, #tpu.memory_space<vmem>>, vector<1x8x8xf32>
    %189 = vector.shape_cast %188 : vector<1x8x8xf32> to vector<8x8xf32>
    %cst_133 = arith.constant dense<0.000000e+00> : vector<8x512xf32>
    %190 = tpu.matmul %189, %187, %cst_133 {dimension_numbers = #tpu.dot_dimension_numbers<[1], [0], [0], [1], [0, 0, 1, 1], [], []>} : vector<8x8xf32>, vector<8x512xf32>, vector<8x512xf32> -> vector<8x512xf32>
    %191 = arith.addf %182, %190 : vector<8x512xf32>
    %c449_i32 = arith.constant 449 : i32
    %192 = tpu.dynamic_rotate %1 by %c449_i32 dim 1 : vector<8x512xf32>, i32 -> vector<8x512xf32>
    %c21 = arith.constant 21 : index
    %c0_134 = arith.constant 0 : index
    %c0_135 = arith.constant 0 : index
    %193 = vector.load %arg2[%c21, %c0_134, %c0_135] : memref<27x1x512xf32, #tpu.memory_space<vmem>>, vector<1x1x512xf32>
    %194 = vector.shape_cast %193 : vector<1x1x512xf32> to vector<1x512xf32>
    %195 = vector.broadcast %194 : vector<1x512xf32> to vector<8x512xf32>
    %196 = arith.mulf %192, %195 : vector<8x512xf32>
    %c21_136 = arith.constant 21 : index
    %c0_137 = arith.constant 0 : index
    %c0_138 = arith.constant 0 : index
    %197 = vector.load %arg3[%c21_136, %c0_137, %c0_138] : memref<27x8x8xf32, #tpu.memory_space<vmem>>, vector<1x8x8xf32>
    %198 = vector.shape_cast %197 : vector<1x8x8xf32> to vector<8x8xf32>
    %cst_139 = arith.constant dense<0.000000e+00> : vector<8x512xf32>
    %199 = tpu.matmul %198, %196, %cst_139 {dimension_numbers = #tpu.dot_dimension_numbers<[1], [0], [0], [1], [0, 0, 1, 1], [], []>} : vector<8x8xf32>, vector<8x512xf32>, vector<8x512xf32> -> vector<8x512xf32>
    %200 = arith.addf %191, %199 : vector<8x512xf32>
    %c448_i32 = arith.constant 448 : i32
    %201 = tpu.dynamic_rotate %1 by %c448_i32 dim 1 : vector<8x512xf32>, i32 -> vector<8x512xf32>
    %c22 = arith.constant 22 : index
    %c0_140 = arith.constant 0 : index
    %c0_141 = arith.constant 0 : index
    %202 = vector.load %arg2[%c22, %c0_140, %c0_141] : memref<27x1x512xf32, #tpu.memory_space<vmem>>, vector<1x1x512xf32>
    %203 = vector.shape_cast %202 : vector<1x1x512xf32> to vector<1x512xf32>
    %204 = vector.broadcast %203 : vector<1x512xf32> to vector<8x512xf32>
    %205 = arith.mulf %201, %204 : vector<8x512xf32>
    %c22_142 = arith.constant 22 : index
    %c0_143 = arith.constant 0 : index
    %c0_144 = arith.constant 0 : index
    %206 = vector.load %arg3[%c22_142, %c0_143, %c0_144] : memref<27x8x8xf32, #tpu.memory_space<vmem>>, vector<1x8x8xf32>
    %207 = vector.shape_cast %206 : vector<1x8x8xf32> to vector<8x8xf32>
    %cst_145 = arith.constant dense<0.000000e+00> : vector<8x512xf32>
    %208 = tpu.matmul %207, %205, %cst_145 {dimension_numbers = #tpu.dot_dimension_numbers<[1], [0], [0], [1], [0, 0, 1, 1], [], []>} : vector<8x8xf32>, vector<8x512xf32>, vector<8x512xf32> -> vector<8x512xf32>
    %209 = arith.addf %200, %208 : vector<8x512xf32>
    %c447_i32 = arith.constant 447 : i32
    %210 = tpu.dynamic_rotate %1 by %c447_i32 dim 1 : vector<8x512xf32>, i32 -> vector<8x512xf32>
    %c23 = arith.constant 23 : index
    %c0_146 = arith.constant 0 : index
    %c0_147 = arith.constant 0 : index
    %211 = vector.load %arg2[%c23, %c0_146, %c0_147] : memref<27x1x512xf32, #tpu.memory_space<vmem>>, vector<1x1x512xf32>
    %212 = vector.shape_cast %211 : vector<1x1x512xf32> to vector<1x512xf32>
    %213 = vector.broadcast %212 : vector<1x512xf32> to vector<8x512xf32>
    %214 = arith.mulf %210, %213 : vector<8x512xf32>
    %c23_148 = arith.constant 23 : index
    %c0_149 = arith.constant 0 : index
    %c0_150 = arith.constant 0 : index
    %215 = vector.load %arg3[%c23_148, %c0_149, %c0_150] : memref<27x8x8xf32, #tpu.memory_space<vmem>>, vector<1x8x8xf32>
    %216 = vector.shape_cast %215 : vector<1x8x8xf32> to vector<8x8xf32>
    %cst_151 = arith.constant dense<0.000000e+00> : vector<8x512xf32>
    %217 = tpu.matmul %216, %214, %cst_151 {dimension_numbers = #tpu.dot_dimension_numbers<[1], [0], [0], [1], [0, 0, 1, 1], [], []>} : vector<8x8xf32>, vector<8x512xf32>, vector<8x512xf32> -> vector<8x512xf32>
    %218 = arith.addf %209, %217 : vector<8x512xf32>
    %c441_i32 = arith.constant 441 : i32
    %219 = tpu.dynamic_rotate %1 by %c441_i32 dim 1 : vector<8x512xf32>, i32 -> vector<8x512xf32>
    %c24 = arith.constant 24 : index
    %c0_152 = arith.constant 0 : index
    %c0_153 = arith.constant 0 : index
    %220 = vector.load %arg2[%c24, %c0_152, %c0_153] : memref<27x1x512xf32, #tpu.memory_space<vmem>>, vector<1x1x512xf32>
    %221 = vector.shape_cast %220 : vector<1x1x512xf32> to vector<1x512xf32>
    %222 = vector.broadcast %221 : vector<1x512xf32> to vector<8x512xf32>
    %223 = arith.mulf %219, %222 : vector<8x512xf32>
    %c24_154 = arith.constant 24 : index
    %c0_155 = arith.constant 0 : index
    %c0_156 = arith.constant 0 : index
    %224 = vector.load %arg3[%c24_154, %c0_155, %c0_156] : memref<27x8x8xf32, #tpu.memory_space<vmem>>, vector<1x8x8xf32>
    %225 = vector.shape_cast %224 : vector<1x8x8xf32> to vector<8x8xf32>
    %cst_157 = arith.constant dense<0.000000e+00> : vector<8x512xf32>
    %226 = tpu.matmul %225, %223, %cst_157 {dimension_numbers = #tpu.dot_dimension_numbers<[1], [0], [0], [1], [0, 0, 1, 1], [], []>} : vector<8x8xf32>, vector<8x512xf32>, vector<8x512xf32> -> vector<8x512xf32>
    %227 = arith.addf %218, %226 : vector<8x512xf32>
    %c440_i32 = arith.constant 440 : i32
    %228 = tpu.dynamic_rotate %1 by %c440_i32 dim 1 : vector<8x512xf32>, i32 -> vector<8x512xf32>
    %c25 = arith.constant 25 : index
    %c0_158 = arith.constant 0 : index
    %c0_159 = arith.constant 0 : index
    %229 = vector.load %arg2[%c25, %c0_158, %c0_159] : memref<27x1x512xf32, #tpu.memory_space<vmem>>, vector<1x1x512xf32>
    %230 = vector.shape_cast %229 : vector<1x1x512xf32> to vector<1x512xf32>
    %231 = vector.broadcast %230 : vector<1x512xf32> to vector<8x512xf32>
    %232 = arith.mulf %228, %231 : vector<8x512xf32>
    %c25_160 = arith.constant 25 : index
    %c0_161 = arith.constant 0 : index
    %c0_162 = arith.constant 0 : index
    %233 = vector.load %arg3[%c25_160, %c0_161, %c0_162] : memref<27x8x8xf32, #tpu.memory_space<vmem>>, vector<1x8x8xf32>
    %234 = vector.shape_cast %233 : vector<1x8x8xf32> to vector<8x8xf32>
    %cst_163 = arith.constant dense<0.000000e+00> : vector<8x512xf32>
    %235 = tpu.matmul %234, %232, %cst_163 {dimension_numbers = #tpu.dot_dimension_numbers<[1], [0], [0], [1], [0, 0, 1, 1], [], []>} : vector<8x8xf32>, vector<8x512xf32>, vector<8x512xf32> -> vector<8x512xf32>
    %236 = arith.addf %227, %235 : vector<8x512xf32>
    %c439_i32 = arith.constant 439 : i32
    %237 = tpu.dynamic_rotate %1 by %c439_i32 dim 1 : vector<8x512xf32>, i32 -> vector<8x512xf32>
    %c26 = arith.constant 26 : index
    %c0_164 = arith.constant 0 : index
    %c0_165 = arith.constant 0 : index
    %238 = vector.load %arg2[%c26, %c0_164, %c0_165] : memref<27x1x512xf32, #tpu.memory_space<vmem>>, vector<1x1x512xf32>
    %239 = vector.shape_cast %238 : vector<1x1x512xf32> to vector<1x512xf32>
    %240 = vector.broadcast %239 : vector<1x512xf32> to vector<8x512xf32>
    %241 = arith.mulf %237, %240 : vector<8x512xf32>
    %c26_166 = arith.constant 26 : index
    %c0_167 = arith.constant 0 : index
    %c0_168 = arith.constant 0 : index
    %242 = vector.load %arg3[%c26_166, %c0_167, %c0_168] : memref<27x8x8xf32, #tpu.memory_space<vmem>>, vector<1x8x8xf32>
    %243 = vector.shape_cast %242 : vector<1x8x8xf32> to vector<8x8xf32>
    %cst_169 = arith.constant dense<0.000000e+00> : vector<8x512xf32>
    %244 = tpu.matmul %243, %241, %cst_169 {dimension_numbers = #tpu.dot_dimension_numbers<[1], [0], [0], [1], [0, 0, 1, 1], [], []>} : vector<8x8xf32>, vector<8x512xf32>, vector<8x512xf32> -> vector<8x512xf32>
    %245 = arith.addf %236, %244 : vector<8x512xf32>
    %246 = vector.broadcast %4 : vector<8x1xf32> to vector<8x512xf32>
    %247 = arith.addf %245, %246 : vector<8x512xf32>
    %cst_170 = arith.constant dense<0.000000e+00> : vector<8xf32>
    %248 = vector.multi_reduction <add>, %247, %cst_170 [1] : vector<8x512xf32> to vector<8xf32>
    %249 = vector.shape_cast %248 : vector<8xf32> to vector<8x1xf32>
    %250 = arith.mulf %247, %247 : vector<8x512xf32>
    %cst_171 = arith.constant dense<0.000000e+00> : vector<8xf32>
    %251 = vector.multi_reduction <add>, %250, %cst_171 [1] : vector<8x512xf32> to vector<8xf32>
    %252 = vector.shape_cast %251 : vector<8xf32> to vector<8x1xf32>
    %253 = vector.extract_strided_slice %249 {offsets = [0, 0], sizes = [2, 1], strides = [1, 1]} : vector<8x1xf32> to vector<2x1xf32>
    %254 = vector.shape_cast %253 : vector<2x1xf32> to vector<1x2x1xf32>
    %cst_172 = arith.constant dense<0.000000e+00> : vector<1xf32>
    %255 = vector.multi_reduction <add>, %254, %cst_172 [1, 2] : vector<1x2x1xf32> to vector<1xf32>
    %256 = vector.shape_cast %255 : vector<1xf32> to vector<1x1x1xf32>
    %257 = vector.extract %256[0, 0, 0] : f32 from vector<1x1x1xf32>
    %258 = vector.extract_strided_slice %252 {offsets = [0, 0], sizes = [2, 1], strides = [1, 1]} : vector<8x1xf32> to vector<2x1xf32>
    %259 = vector.shape_cast %258 : vector<2x1xf32> to vector<1x2x1xf32>
    %cst_173 = arith.constant dense<0.000000e+00> : vector<1xf32>
    %260 = vector.multi_reduction <add>, %259, %cst_173 [1, 2] : vector<1x2x1xf32> to vector<1xf32>
    %261 = vector.shape_cast %260 : vector<1xf32> to vector<1x1x1xf32>
    %262 = vector.extract %261[0, 0, 0] : f32 from vector<1x1x1xf32>
    %cst_174 = arith.constant 9.765625E-4 : f32
    %263 = arith.mulf %257, %cst_174 : f32
    %cst_175 = arith.constant 9.765625E-4 : f32
    %264 = arith.mulf %262, %cst_175 : f32
    %265 = arith.mulf %263, %263 : f32
    %266 = arith.subf %264, %265 : f32
    %cst_176 = arith.constant 0.000000e+00 : f32
    %267 = arith.maximumf %266, %cst_176 : f32
    %cst_177 = arith.constant 9.99999974E-6 : f32
    %268 = arith.addf %267, %cst_177 : f32
    %269 = math.rsqrt %268 : f32
    %270 = vector.broadcast %269 : f32 to vector<2x1xf32>
    %cst_178 = arith.constant 0.000000e+00 : f32
    %271 = arith.subf %cst_178, %263 : f32
    %272 = arith.mulf %271, %269 : f32
    %273 = vector.broadcast %272 : f32 to vector<2x1xf32>
    %274 = vector.extract_strided_slice %249 {offsets = [2, 0], sizes = [2, 1], strides = [1, 1]} : vector<8x1xf32> to vector<2x1xf32>
    %275 = vector.shape_cast %274 : vector<2x1xf32> to vector<1x2x1xf32>
    %cst_179 = arith.constant dense<0.000000e+00> : vector<1xf32>
    %276 = vector.multi_reduction <add>, %275, %cst_179 [1, 2] : vector<1x2x1xf32> to vector<1xf32>
    %277 = vector.shape_cast %276 : vector<1xf32> to vector<1x1x1xf32>
    %278 = vector.extract %277[0, 0, 0] : f32 from vector<1x1x1xf32>
    %279 = vector.extract_strided_slice %252 {offsets = [2, 0], sizes = [2, 1], strides = [1, 1]} : vector<8x1xf32> to vector<2x1xf32>
    %280 = vector.shape_cast %279 : vector<2x1xf32> to vector<1x2x1xf32>
    %cst_180 = arith.constant dense<0.000000e+00> : vector<1xf32>
    %281 = vector.multi_reduction <add>, %280, %cst_180 [1, 2] : vector<1x2x1xf32> to vector<1xf32>
    %282 = vector.shape_cast %281 : vector<1xf32> to vector<1x1x1xf32>
    %283 = vector.extract %282[0, 0, 0] : f32 from vector<1x1x1xf32>
    %cst_181 = arith.constant 9.765625E-4 : f32
    %284 = arith.mulf %278, %cst_181 : f32
    %cst_182 = arith.constant 9.765625E-4 : f32
    %285 = arith.mulf %283, %cst_182 : f32
    %286 = arith.mulf %284, %284 : f32
    %287 = arith.subf %285, %286 : f32
    %cst_183 = arith.constant 0.000000e+00 : f32
    %288 = arith.maximumf %287, %cst_183 : f32
    %cst_184 = arith.constant 9.99999974E-6 : f32
    %289 = arith.addf %288, %cst_184 : f32
    %290 = math.rsqrt %289 : f32
    %291 = vector.broadcast %290 : f32 to vector<2x1xf32>
    %cst_185 = arith.constant 0.000000e+00 : f32
    %292 = arith.subf %cst_185, %284 : f32
    %293 = arith.mulf %292, %290 : f32
    %294 = vector.broadcast %293 : f32 to vector<2x1xf32>
    %295 = vector.extract_strided_slice %249 {offsets = [4, 0], sizes = [2, 1], strides = [1, 1]} : vector<8x1xf32> to vector<2x1xf32>
    %296 = vector.shape_cast %295 : vector<2x1xf32> to vector<1x2x1xf32>
    %cst_186 = arith.constant dense<0.000000e+00> : vector<1xf32>
    %297 = vector.multi_reduction <add>, %296, %cst_186 [1, 2] : vector<1x2x1xf32> to vector<1xf32>
    %298 = vector.shape_cast %297 : vector<1xf32> to vector<1x1x1xf32>
    %299 = vector.extract %298[0, 0, 0] : f32 from vector<1x1x1xf32>
    %300 = vector.extract_strided_slice %252 {offsets = [4, 0], sizes = [2, 1], strides = [1, 1]} : vector<8x1xf32> to vector<2x1xf32>
    %301 = vector.shape_cast %300 : vector<2x1xf32> to vector<1x2x1xf32>
    %cst_187 = arith.constant dense<0.000000e+00> : vector<1xf32>
    %302 = vector.multi_reduction <add>, %301, %cst_187 [1, 2] : vector<1x2x1xf32> to vector<1xf32>
    %303 = vector.shape_cast %302 : vector<1xf32> to vector<1x1x1xf32>
    %304 = vector.extract %303[0, 0, 0] : f32 from vector<1x1x1xf32>
    %cst_188 = arith.constant 9.765625E-4 : f32
    %305 = arith.mulf %299, %cst_188 : f32
    %cst_189 = arith.constant 9.765625E-4 : f32
    %306 = arith.mulf %304, %cst_189 : f32
    %307 = arith.mulf %305, %305 : f32
    %308 = arith.subf %306, %307 : f32
    %cst_190 = arith.constant 0.000000e+00 : f32
    %309 = arith.maximumf %308, %cst_190 : f32
    %cst_191 = arith.constant 9.99999974E-6 : f32
    %310 = arith.addf %309, %cst_191 : f32
    %311 = math.rsqrt %310 : f32
    %312 = vector.broadcast %311 : f32 to vector<2x1xf32>
    %cst_192 = arith.constant 0.000000e+00 : f32
    %313 = arith.subf %cst_192, %305 : f32
    %314 = arith.mulf %313, %311 : f32
    %315 = vector.broadcast %314 : f32 to vector<2x1xf32>
    %316 = vector.extract_strided_slice %249 {offsets = [6, 0], sizes = [2, 1], strides = [1, 1]} : vector<8x1xf32> to vector<2x1xf32>
    %317 = vector.shape_cast %316 : vector<2x1xf32> to vector<1x2x1xf32>
    %cst_193 = arith.constant dense<0.000000e+00> : vector<1xf32>
    %318 = vector.multi_reduction <add>, %317, %cst_193 [1, 2] : vector<1x2x1xf32> to vector<1xf32>
    %319 = vector.shape_cast %318 : vector<1xf32> to vector<1x1x1xf32>
    %320 = vector.extract %319[0, 0, 0] : f32 from vector<1x1x1xf32>
    %321 = vector.extract_strided_slice %252 {offsets = [6, 0], sizes = [2, 1], strides = [1, 1]} : vector<8x1xf32> to vector<2x1xf32>
    %322 = vector.shape_cast %321 : vector<2x1xf32> to vector<1x2x1xf32>
    %cst_194 = arith.constant dense<0.000000e+00> : vector<1xf32>
    %323 = vector.multi_reduction <add>, %322, %cst_194 [1, 2] : vector<1x2x1xf32> to vector<1xf32>
    %324 = vector.shape_cast %323 : vector<1xf32> to vector<1x1x1xf32>
    %325 = vector.extract %324[0, 0, 0] : f32 from vector<1x1x1xf32>
    %cst_195 = arith.constant 9.765625E-4 : f32
    %326 = arith.mulf %320, %cst_195 : f32
    %cst_196 = arith.constant 9.765625E-4 : f32
    %327 = arith.mulf %325, %cst_196 : f32
    %328 = arith.mulf %326, %326 : f32
    %329 = arith.subf %327, %328 : f32
    %cst_197 = arith.constant 0.000000e+00 : f32
    %330 = arith.maximumf %329, %cst_197 : f32
    %cst_198 = arith.constant 9.99999974E-6 : f32
    %331 = arith.addf %330, %cst_198 : f32
    %332 = math.rsqrt %331 : f32
    %333 = vector.broadcast %332 : f32 to vector<2x1xf32>
    %cst_199 = arith.constant 0.000000e+00 : f32
    %334 = arith.subf %cst_199, %326 : f32
    %335 = arith.mulf %334, %332 : f32
    %336 = vector.broadcast %335 : f32 to vector<2x1xf32>
    %337 = tpu.concatenate %270, %291, %312, %333 in 0 : vector<2x1xf32>, vector<2x1xf32>, vector<2x1xf32>, vector<2x1xf32> -> vector<8x1xf32>
    %338 = arith.mulf %337, %5 : vector<8x1xf32>
    %339 = tpu.concatenate %273, %294, %315, %336 in 0 : vector<2x1xf32>, vector<2x1xf32>, vector<2x1xf32>, vector<2x1xf32> -> vector<8x1xf32>
    %340 = arith.mulf %339, %5 : vector<8x1xf32>
    %341 = arith.addf %340, %6 : vector<8x1xf32>
    %342 = vector.broadcast %338 : vector<8x1xf32> to vector<8x512xf32>
    %343 = arith.mulf %247, %342 : vector<8x512xf32>
    %344 = vector.broadcast %341 : vector<8x1xf32> to vector<8x512xf32>
    %345 = arith.addf %343, %344 : vector<8x512xf32>
    %cst_200 = arith.constant 0.000000e+00 : f32
    %346 = vector.broadcast %cst_200 : f32 to vector<8x512xf32>
    %347 = arith.cmpf ogt, %345, %346 : vector<8x512xf32>
    %348 = vector.broadcast %2 : f32 to vector<8x512xf32>
    %349 = arith.mulf %348, %345 : vector<8x512xf32>
    %350 = arith.select %347, %345, %349 : vector<8x512xi1>, vector<8x512xf32>
    %c0_201 = arith.constant 0 : index
    %c0_202 = arith.constant 0 : index
    %351 = vector.load %arg8[%c0_201, %c0_202] : memref<8x1xf32, #tpu.memory_space<vmem>>, vector<8x1xf32>
    %c0_203 = arith.constant 0 : index
    %c0_204 = arith.constant 0 : index
    %352 = vector.load %arg9[%c0_203, %c0_204] : memref<8x1xf32, #tpu.memory_space<vmem>>, vector<8x1xf32>
    %c0_205 = arith.constant 0 : index
    %c0_206 = arith.constant 0 : index
    %353 = vector.load %arg10[%c0_205, %c0_206] : memref<8x1xf32, #tpu.memory_space<vmem>>, vector<8x1xf32>
    %cst_207 = arith.constant 0.000000e+00 : f32
    %354 = vector.broadcast %cst_207 : f32 to vector<8x512xf32>
    %c73_i32_208 = arith.constant 73 : i32
    %355 = tpu.dynamic_rotate %350 by %c73_i32_208 dim 1 : vector<8x512xf32>, i32 -> vector<8x512xf32>
    %c0_209 = arith.constant 0 : index
    %c0_210 = arith.constant 0 : index
    %c0_211 = arith.constant 0 : index
    %356 = vector.load %arg2[%c0_209, %c0_210, %c0_211] : memref<27x1x512xf32, #tpu.memory_space<vmem>>, vector<1x1x512xf32>
    %357 = vector.shape_cast %356 : vector<1x1x512xf32> to vector<1x512xf32>
    %358 = vector.broadcast %357 : vector<1x512xf32> to vector<8x512xf32>
    %359 = arith.mulf %355, %358 : vector<8x512xf32>
    %c0_212 = arith.constant 0 : index
    %c0_213 = arith.constant 0 : index
    %c0_214 = arith.constant 0 : index
    %360 = vector.load %arg7[%c0_212, %c0_213, %c0_214] : memref<27x8x8xf32, #tpu.memory_space<vmem>>, vector<1x8x8xf32>
    %361 = vector.shape_cast %360 : vector<1x8x8xf32> to vector<8x8xf32>
    %cst_215 = arith.constant dense<0.000000e+00> : vector<8x512xf32>
    %362 = tpu.matmul %361, %359, %cst_215 {dimension_numbers = #tpu.dot_dimension_numbers<[1], [0], [0], [1], [0, 0, 1, 1], [], []>} : vector<8x8xf32>, vector<8x512xf32>, vector<8x512xf32> -> vector<8x512xf32>
    %363 = arith.addf %354, %362 : vector<8x512xf32>
    %c72_i32_216 = arith.constant 72 : i32
    %364 = tpu.dynamic_rotate %350 by %c72_i32_216 dim 1 : vector<8x512xf32>, i32 -> vector<8x512xf32>
    %c1_217 = arith.constant 1 : index
    %c0_218 = arith.constant 0 : index
    %c0_219 = arith.constant 0 : index
    %365 = vector.load %arg2[%c1_217, %c0_218, %c0_219] : memref<27x1x512xf32, #tpu.memory_space<vmem>>, vector<1x1x512xf32>
    %366 = vector.shape_cast %365 : vector<1x1x512xf32> to vector<1x512xf32>
    %367 = vector.broadcast %366 : vector<1x512xf32> to vector<8x512xf32>
    %368 = arith.mulf %364, %367 : vector<8x512xf32>
    %c1_220 = arith.constant 1 : index
    %c0_221 = arith.constant 0 : index
    %c0_222 = arith.constant 0 : index
    %369 = vector.load %arg7[%c1_220, %c0_221, %c0_222] : memref<27x8x8xf32, #tpu.memory_space<vmem>>, vector<1x8x8xf32>
    %370 = vector.shape_cast %369 : vector<1x8x8xf32> to vector<8x8xf32>
    %cst_223 = arith.constant dense<0.000000e+00> : vector<8x512xf32>
    %371 = tpu.matmul %370, %368, %cst_223 {dimension_numbers = #tpu.dot_dimension_numbers<[1], [0], [0], [1], [0, 0, 1, 1], [], []>} : vector<8x8xf32>, vector<8x512xf32>, vector<8x512xf32> -> vector<8x512xf32>
    %372 = arith.addf %363, %371 : vector<8x512xf32>
    %c71_i32_224 = arith.constant 71 : i32
    %373 = tpu.dynamic_rotate %350 by %c71_i32_224 dim 1 : vector<8x512xf32>, i32 -> vector<8x512xf32>
    %c2_225 = arith.constant 2 : index
    %c0_226 = arith.constant 0 : index
    %c0_227 = arith.constant 0 : index
    %374 = vector.load %arg2[%c2_225, %c0_226, %c0_227] : memref<27x1x512xf32, #tpu.memory_space<vmem>>, vector<1x1x512xf32>
    %375 = vector.shape_cast %374 : vector<1x1x512xf32> to vector<1x512xf32>
    %376 = vector.broadcast %375 : vector<1x512xf32> to vector<8x512xf32>
    %377 = arith.mulf %373, %376 : vector<8x512xf32>
    %c2_228 = arith.constant 2 : index
    %c0_229 = arith.constant 0 : index
    %c0_230 = arith.constant 0 : index
    %378 = vector.load %arg7[%c2_228, %c0_229, %c0_230] : memref<27x8x8xf32, #tpu.memory_space<vmem>>, vector<1x8x8xf32>
    %379 = vector.shape_cast %378 : vector<1x8x8xf32> to vector<8x8xf32>
    %cst_231 = arith.constant dense<0.000000e+00> : vector<8x512xf32>
    %380 = tpu.matmul %379, %377, %cst_231 {dimension_numbers = #tpu.dot_dimension_numbers<[1], [0], [0], [1], [0, 0, 1, 1], [], []>} : vector<8x8xf32>, vector<8x512xf32>, vector<8x512xf32> -> vector<8x512xf32>
    %381 = arith.addf %372, %380 : vector<8x512xf32>
    %c65_i32_232 = arith.constant 65 : i32
    %382 = tpu.dynamic_rotate %350 by %c65_i32_232 dim 1 : vector<8x512xf32>, i32 -> vector<8x512xf32>
    %c3_233 = arith.constant 3 : index
    %c0_234 = arith.constant 0 : index
    %c0_235 = arith.constant 0 : index
    %383 = vector.load %arg2[%c3_233, %c0_234, %c0_235] : memref<27x1x512xf32, #tpu.memory_space<vmem>>, vector<1x1x512xf32>
    %384 = vector.shape_cast %383 : vector<1x1x512xf32> to vector<1x512xf32>
    %385 = vector.broadcast %384 : vector<1x512xf32> to vector<8x512xf32>
    %386 = arith.mulf %382, %385 : vector<8x512xf32>
    %c3_236 = arith.constant 3 : index
    %c0_237 = arith.constant 0 : index
    %c0_238 = arith.constant 0 : index
    %387 = vector.load %arg7[%c3_236, %c0_237, %c0_238] : memref<27x8x8xf32, #tpu.memory_space<vmem>>, vector<1x8x8xf32>
    %388 = vector.shape_cast %387 : vector<1x8x8xf32> to vector<8x8xf32>
    %cst_239 = arith.constant dense<0.000000e+00> : vector<8x512xf32>
    %389 = tpu.matmul %388, %386, %cst_239 {dimension_numbers = #tpu.dot_dimension_numbers<[1], [0], [0], [1], [0, 0, 1, 1], [], []>} : vector<8x8xf32>, vector<8x512xf32>, vector<8x512xf32> -> vector<8x512xf32>
    %390 = arith.addf %381, %389 : vector<8x512xf32>
    %c64_i32_240 = arith.constant 64 : i32
    %391 = tpu.dynamic_rotate %350 by %c64_i32_240 dim 1 : vector<8x512xf32>, i32 -> vector<8x512xf32>
    %c4_241 = arith.constant 4 : index
    %c0_242 = arith.constant 0 : index
    %c0_243 = arith.constant 0 : index
    %392 = vector.load %arg2[%c4_241, %c0_242, %c0_243] : memref<27x1x512xf32, #tpu.memory_space<vmem>>, vector<1x1x512xf32>
    %393 = vector.shape_cast %392 : vector<1x1x512xf32> to vector<1x512xf32>
    %394 = vector.broadcast %393 : vector<1x512xf32> to vector<8x512xf32>
    %395 = arith.mulf %391, %394 : vector<8x512xf32>
    %c4_244 = arith.constant 4 : index
    %c0_245 = arith.constant 0 : index
    %c0_246 = arith.constant 0 : index
    %396 = vector.load %arg7[%c4_244, %c0_245, %c0_246] : memref<27x8x8xf32, #tpu.memory_space<vmem>>, vector<1x8x8xf32>
    %397 = vector.shape_cast %396 : vector<1x8x8xf32> to vector<8x8xf32>
    %cst_247 = arith.constant dense<0.000000e+00> : vector<8x512xf32>
    %398 = tpu.matmul %397, %395, %cst_247 {dimension_numbers = #tpu.dot_dimension_numbers<[1], [0], [0], [1], [0, 0, 1, 1], [], []>} : vector<8x8xf32>, vector<8x512xf32>, vector<8x512xf32> -> vector<8x512xf32>
    %399 = arith.addf %390, %398 : vector<8x512xf32>
    %c63_i32_248 = arith.constant 63 : i32
    %400 = tpu.dynamic_rotate %350 by %c63_i32_248 dim 1 : vector<8x512xf32>, i32 -> vector<8x512xf32>
    %c5_249 = arith.constant 5 : index
    %c0_250 = arith.constant 0 : index
    %c0_251 = arith.constant 0 : index
    %401 = vector.load %arg2[%c5_249, %c0_250, %c0_251] : memref<27x1x512xf32, #tpu.memory_space<vmem>>, vector<1x1x512xf32>
    %402 = vector.shape_cast %401 : vector<1x1x512xf32> to vector<1x512xf32>
    %403 = vector.broadcast %402 : vector<1x512xf32> to vector<8x512xf32>
    %404 = arith.mulf %400, %403 : vector<8x512xf32>
    %c5_252 = arith.constant 5 : index
    %c0_253 = arith.constant 0 : index
    %c0_254 = arith.constant 0 : index
    %405 = vector.load %arg7[%c5_252, %c0_253, %c0_254] : memref<27x8x8xf32, #tpu.memory_space<vmem>>, vector<1x8x8xf32>
    %406 = vector.shape_cast %405 : vector<1x8x8xf32> to vector<8x8xf32>
    %cst_255 = arith.constant dense<0.000000e+00> : vector<8x512xf32>
    %407 = tpu.matmul %406, %404, %cst_255 {dimension_numbers = #tpu.dot_dimension_numbers<[1], [0], [0], [1], [0, 0, 1, 1], [], []>} : vector<8x8xf32>, vector<8x512xf32>, vector<8x512xf32> -> vector<8x512xf32>
    %408 = arith.addf %399, %407 : vector<8x512xf32>
    %c57_i32_256 = arith.constant 57 : i32
    %409 = tpu.dynamic_rotate %350 by %c57_i32_256 dim 1 : vector<8x512xf32>, i32 -> vector<8x512xf32>
    %c6_257 = arith.constant 6 : index
    %c0_258 = arith.constant 0 : index
    %c0_259 = arith.constant 0 : index
    %410 = vector.load %arg2[%c6_257, %c0_258, %c0_259] : memref<27x1x512xf32, #tpu.memory_space<vmem>>, vector<1x1x512xf32>
    %411 = vector.shape_cast %410 : vector<1x1x512xf32> to vector<1x512xf32>
    %412 = vector.broadcast %411 : vector<1x512xf32> to vector<8x512xf32>
    %413 = arith.mulf %409, %412 : vector<8x512xf32>
    %c6_260 = arith.constant 6 : index
    %c0_261 = arith.constant 0 : index
    %c0_262 = arith.constant 0 : index
    %414 = vector.load %arg7[%c6_260, %c0_261, %c0_262] : memref<27x8x8xf32, #tpu.memory_space<vmem>>, vector<1x8x8xf32>
    %415 = vector.shape_cast %414 : vector<1x8x8xf32> to vector<8x8xf32>
    %cst_263 = arith.constant dense<0.000000e+00> : vector<8x512xf32>
    %416 = tpu.matmul %415, %413, %cst_263 {dimension_numbers = #tpu.dot_dimension_numbers<[1], [0], [0], [1], [0, 0, 1, 1], [], []>} : vector<8x8xf32>, vector<8x512xf32>, vector<8x512xf32> -> vector<8x512xf32>
    %417 = arith.addf %408, %416 : vector<8x512xf32>
    %c56_i32_264 = arith.constant 56 : i32
    %418 = tpu.dynamic_rotate %350 by %c56_i32_264 dim 1 : vector<8x512xf32>, i32 -> vector<8x512xf32>
    %c7_265 = arith.constant 7 : index
    %c0_266 = arith.constant 0 : index
    %c0_267 = arith.constant 0 : index
    %419 = vector.load %arg2[%c7_265, %c0_266, %c0_267] : memref<27x1x512xf32, #tpu.memory_space<vmem>>, vector<1x1x512xf32>
    %420 = vector.shape_cast %419 : vector<1x1x512xf32> to vector<1x512xf32>
    %421 = vector.broadcast %420 : vector<1x512xf32> to vector<8x512xf32>
    %422 = arith.mulf %418, %421 : vector<8x512xf32>
    %c7_268 = arith.constant 7 : index
    %c0_269 = arith.constant 0 : index
    %c0_270 = arith.constant 0 : index
    %423 = vector.load %arg7[%c7_268, %c0_269, %c0_270] : memref<27x8x8xf32, #tpu.memory_space<vmem>>, vector<1x8x8xf32>
    %424 = vector.shape_cast %423 : vector<1x8x8xf32> to vector<8x8xf32>
    %cst_271 = arith.constant dense<0.000000e+00> : vector<8x512xf32>
    %425 = tpu.matmul %424, %422, %cst_271 {dimension_numbers = #tpu.dot_dimension_numbers<[1], [0], [0], [1], [0, 0, 1, 1], [], []>} : vector<8x8xf32>, vector<8x512xf32>, vector<8x512xf32> -> vector<8x512xf32>
    %426 = arith.addf %417, %425 : vector<8x512xf32>
    %c55_i32_272 = arith.constant 55 : i32
    %427 = tpu.dynamic_rotate %350 by %c55_i32_272 dim 1 : vector<8x512xf32>, i32 -> vector<8x512xf32>
    %c8_273 = arith.constant 8 : index
    %c0_274 = arith.constant 0 : index
    %c0_275 = arith.constant 0 : index
    %428 = vector.load %arg2[%c8_273, %c0_274, %c0_275] : memref<27x1x512xf32, #tpu.memory_space<vmem>>, vector<1x1x512xf32>
    %429 = vector.shape_cast %428 : vector<1x1x512xf32> to vector<1x512xf32>
    %430 = vector.broadcast %429 : vector<1x512xf32> to vector<8x512xf32>
    %431 = arith.mulf %427, %430 : vector<8x512xf32>
    %c8_276 = arith.constant 8 : index
    %c0_277 = arith.constant 0 : index
    %c0_278 = arith.constant 0 : index
    %432 = vector.load %arg7[%c8_276, %c0_277, %c0_278] : memref<27x8x8xf32, #tpu.memory_space<vmem>>, vector<1x8x8xf32>
    %433 = vector.shape_cast %432 : vector<1x8x8xf32> to vector<8x8xf32>
    %cst_279 = arith.constant dense<0.000000e+00> : vector<8x512xf32>
    %434 = tpu.matmul %433, %431, %cst_279 {dimension_numbers = #tpu.dot_dimension_numbers<[1], [0], [0], [1], [0, 0, 1, 1], [], []>} : vector<8x8xf32>, vector<8x512xf32>, vector<8x512xf32> -> vector<8x512xf32>
    %435 = arith.addf %426, %434 : vector<8x512xf32>
    %c9_i32_280 = arith.constant 9 : i32
    %436 = tpu.dynamic_rotate %350 by %c9_i32_280 dim 1 : vector<8x512xf32>, i32 -> vector<8x512xf32>
    %c9_281 = arith.constant 9 : index
    %c0_282 = arith.constant 0 : index
    %c0_283 = arith.constant 0 : index
    %437 = vector.load %arg2[%c9_281, %c0_282, %c0_283] : memref<27x1x512xf32, #tpu.memory_space<vmem>>, vector<1x1x512xf32>
    %438 = vector.shape_cast %437 : vector<1x1x512xf32> to vector<1x512xf32>
    %439 = vector.broadcast %438 : vector<1x512xf32> to vector<8x512xf32>
    %440 = arith.mulf %436, %439 : vector<8x512xf32>
    %c9_284 = arith.constant 9 : index
    %c0_285 = arith.constant 0 : index
    %c0_286 = arith.constant 0 : index
    %441 = vector.load %arg7[%c9_284, %c0_285, %c0_286] : memref<27x8x8xf32, #tpu.memory_space<vmem>>, vector<1x8x8xf32>
    %442 = vector.shape_cast %441 : vector<1x8x8xf32> to vector<8x8xf32>
    %cst_287 = arith.constant dense<0.000000e+00> : vector<8x512xf32>
    %443 = tpu.matmul %442, %440, %cst_287 {dimension_numbers = #tpu.dot_dimension_numbers<[1], [0], [0], [1], [0, 0, 1, 1], [], []>} : vector<8x8xf32>, vector<8x512xf32>, vector<8x512xf32> -> vector<8x512xf32>
    %444 = arith.addf %435, %443 : vector<8x512xf32>
    %c8_i32_288 = arith.constant 8 : i32
    %445 = tpu.dynamic_rotate %350 by %c8_i32_288 dim 1 : vector<8x512xf32>, i32 -> vector<8x512xf32>
    %c10_289 = arith.constant 10 : index
    %c0_290 = arith.constant 0 : index
    %c0_291 = arith.constant 0 : index
    %446 = vector.load %arg2[%c10_289, %c0_290, %c0_291] : memref<27x1x512xf32, #tpu.memory_space<vmem>>, vector<1x1x512xf32>
    %447 = vector.shape_cast %446 : vector<1x1x512xf32> to vector<1x512xf32>
    %448 = vector.broadcast %447 : vector<1x512xf32> to vector<8x512xf32>
    %449 = arith.mulf %445, %448 : vector<8x512xf32>
    %c10_292 = arith.constant 10 : index
    %c0_293 = arith.constant 0 : index
    %c0_294 = arith.constant 0 : index
    %450 = vector.load %arg7[%c10_292, %c0_293, %c0_294] : memref<27x8x8xf32, #tpu.memory_space<vmem>>, vector<1x8x8xf32>
    %451 = vector.shape_cast %450 : vector<1x8x8xf32> to vector<8x8xf32>
    %cst_295 = arith.constant dense<0.000000e+00> : vector<8x512xf32>
    %452 = tpu.matmul %451, %449, %cst_295 {dimension_numbers = #tpu.dot_dimension_numbers<[1], [0], [0], [1], [0, 0, 1, 1], [], []>} : vector<8x8xf32>, vector<8x512xf32>, vector<8x512xf32> -> vector<8x512xf32>
    %453 = arith.addf %444, %452 : vector<8x512xf32>
    %c7_i32_296 = arith.constant 7 : i32
    %454 = tpu.dynamic_rotate %350 by %c7_i32_296 dim 1 : vector<8x512xf32>, i32 -> vector<8x512xf32>
    %c11_297 = arith.constant 11 : index
    %c0_298 = arith.constant 0 : index
    %c0_299 = arith.constant 0 : index
    %455 = vector.load %arg2[%c11_297, %c0_298, %c0_299] : memref<27x1x512xf32, #tpu.memory_space<vmem>>, vector<1x1x512xf32>
    %456 = vector.shape_cast %455 : vector<1x1x512xf32> to vector<1x512xf32>
    %457 = vector.broadcast %456 : vector<1x512xf32> to vector<8x512xf32>
    %458 = arith.mulf %454, %457 : vector<8x512xf32>
    %c11_300 = arith.constant 11 : index
    %c0_301 = arith.constant 0 : index
    %c0_302 = arith.constant 0 : index
    %459 = vector.load %arg7[%c11_300, %c0_301, %c0_302] : memref<27x8x8xf32, #tpu.memory_space<vmem>>, vector<1x8x8xf32>
    %460 = vector.shape_cast %459 : vector<1x8x8xf32> to vector<8x8xf32>
    %cst_303 = arith.constant dense<0.000000e+00> : vector<8x512xf32>
    %461 = tpu.matmul %460, %458, %cst_303 {dimension_numbers = #tpu.dot_dimension_numbers<[1], [0], [0], [1], [0, 0, 1, 1], [], []>} : vector<8x8xf32>, vector<8x512xf32>, vector<8x512xf32> -> vector<8x512xf32>
    %462 = arith.addf %453, %461 : vector<8x512xf32>
    %c1_i32_304 = arith.constant 1 : i32
    %463 = tpu.dynamic_rotate %350 by %c1_i32_304 dim 1 : vector<8x512xf32>, i32 -> vector<8x512xf32>
    %c12_305 = arith.constant 12 : index
    %c0_306 = arith.constant 0 : index
    %c0_307 = arith.constant 0 : index
    %464 = vector.load %arg2[%c12_305, %c0_306, %c0_307] : memref<27x1x512xf32, #tpu.memory_space<vmem>>, vector<1x1x512xf32>
    %465 = vector.shape_cast %464 : vector<1x1x512xf32> to vector<1x512xf32>
    %466 = vector.broadcast %465 : vector<1x512xf32> to vector<8x512xf32>
    %467 = arith.mulf %463, %466 : vector<8x512xf32>
    %c12_308 = arith.constant 12 : index
    %c0_309 = arith.constant 0 : index
    %c0_310 = arith.constant 0 : index
    %468 = vector.load %arg7[%c12_308, %c0_309, %c0_310] : memref<27x8x8xf32, #tpu.memory_space<vmem>>, vector<1x8x8xf32>
    %469 = vector.shape_cast %468 : vector<1x8x8xf32> to vector<8x8xf32>
    %cst_311 = arith.constant dense<0.000000e+00> : vector<8x512xf32>
    %470 = tpu.matmul %469, %467, %cst_311 {dimension_numbers = #tpu.dot_dimension_numbers<[1], [0], [0], [1], [0, 0, 1, 1], [], []>} : vector<8x8xf32>, vector<8x512xf32>, vector<8x512xf32> -> vector<8x512xf32>
    %471 = arith.addf %462, %470 : vector<8x512xf32>
    %c13_312 = arith.constant 13 : index
    %c0_313 = arith.constant 0 : index
    %c0_314 = arith.constant 0 : index
    %472 = vector.load %arg7[%c13_312, %c0_313, %c0_314] : memref<27x8x8xf32, #tpu.memory_space<vmem>>, vector<1x8x8xf32>
    %473 = vector.shape_cast %472 : vector<1x8x8xf32> to vector<8x8xf32>
    %cst_315 = arith.constant dense<0.000000e+00> : vector<8x512xf32>
    %474 = tpu.matmul %473, %350, %cst_315 {dimension_numbers = #tpu.dot_dimension_numbers<[1], [0], [0], [1], [0, 0, 1, 1], [], []>} : vector<8x8xf32>, vector<8x512xf32>, vector<8x512xf32> -> vector<8x512xf32>
    %475 = arith.addf %471, %474 : vector<8x512xf32>
    %c511_i32_316 = arith.constant 511 : i32
    %476 = tpu.dynamic_rotate %350 by %c511_i32_316 dim 1 : vector<8x512xf32>, i32 -> vector<8x512xf32>
    %c14_317 = arith.constant 14 : index
    %c0_318 = arith.constant 0 : index
    %c0_319 = arith.constant 0 : index
    %477 = vector.load %arg2[%c14_317, %c0_318, %c0_319] : memref<27x1x512xf32, #tpu.memory_space<vmem>>, vector<1x1x512xf32>
    %478 = vector.shape_cast %477 : vector<1x1x512xf32> to vector<1x512xf32>
    %479 = vector.broadcast %478 : vector<1x512xf32> to vector<8x512xf32>
    %480 = arith.mulf %476, %479 : vector<8x512xf32>
    %c14_320 = arith.constant 14 : index
    %c0_321 = arith.constant 0 : index
    %c0_322 = arith.constant 0 : index
    %481 = vector.load %arg7[%c14_320, %c0_321, %c0_322] : memref<27x8x8xf32, #tpu.memory_space<vmem>>, vector<1x8x8xf32>
    %482 = vector.shape_cast %481 : vector<1x8x8xf32> to vector<8x8xf32>
    %cst_323 = arith.constant dense<0.000000e+00> : vector<8x512xf32>
    %483 = tpu.matmul %482, %480, %cst_323 {dimension_numbers = #tpu.dot_dimension_numbers<[1], [0], [0], [1], [0, 0, 1, 1], [], []>} : vector<8x8xf32>, vector<8x512xf32>, vector<8x512xf32> -> vector<8x512xf32>
    %484 = arith.addf %475, %483 : vector<8x512xf32>
    %c505_i32_324 = arith.constant 505 : i32
    %485 = tpu.dynamic_rotate %350 by %c505_i32_324 dim 1 : vector<8x512xf32>, i32 -> vector<8x512xf32>
    %c15_325 = arith.constant 15 : index
    %c0_326 = arith.constant 0 : index
    %c0_327 = arith.constant 0 : index
    %486 = vector.load %arg2[%c15_325, %c0_326, %c0_327] : memref<27x1x512xf32, #tpu.memory_space<vmem>>, vector<1x1x512xf32>
    %487 = vector.shape_cast %486 : vector<1x1x512xf32> to vector<1x512xf32>
    %488 = vector.broadcast %487 : vector<1x512xf32> to vector<8x512xf32>
    %489 = arith.mulf %485, %488 : vector<8x512xf32>
    %c15_328 = arith.constant 15 : index
    %c0_329 = arith.constant 0 : index
    %c0_330 = arith.constant 0 : index
    %490 = vector.load %arg7[%c15_328, %c0_329, %c0_330] : memref<27x8x8xf32, #tpu.memory_space<vmem>>, vector<1x8x8xf32>
    %491 = vector.shape_cast %490 : vector<1x8x8xf32> to vector<8x8xf32>
    %cst_331 = arith.constant dense<0.000000e+00> : vector<8x512xf32>
    %492 = tpu.matmul %491, %489, %cst_331 {dimension_numbers = #tpu.dot_dimension_numbers<[1], [0], [0], [1], [0, 0, 1, 1], [], []>} : vector<8x8xf32>, vector<8x512xf32>, vector<8x512xf32> -> vector<8x512xf32>
    %493 = arith.addf %484, %492 : vector<8x512xf32>
    %c504_i32_332 = arith.constant 504 : i32
    %494 = tpu.dynamic_rotate %350 by %c504_i32_332 dim 1 : vector<8x512xf32>, i32 -> vector<8x512xf32>
    %c16_333 = arith.constant 16 : index
    %c0_334 = arith.constant 0 : index
    %c0_335 = arith.constant 0 : index
    %495 = vector.load %arg2[%c16_333, %c0_334, %c0_335] : memref<27x1x512xf32, #tpu.memory_space<vmem>>, vector<1x1x512xf32>
    %496 = vector.shape_cast %495 : vector<1x1x512xf32> to vector<1x512xf32>
    %497 = vector.broadcast %496 : vector<1x512xf32> to vector<8x512xf32>
    %498 = arith.mulf %494, %497 : vector<8x512xf32>
    %c16_336 = arith.constant 16 : index
    %c0_337 = arith.constant 0 : index
    %c0_338 = arith.constant 0 : index
    %499 = vector.load %arg7[%c16_336, %c0_337, %c0_338] : memref<27x8x8xf32, #tpu.memory_space<vmem>>, vector<1x8x8xf32>
    %500 = vector.shape_cast %499 : vector<1x8x8xf32> to vector<8x8xf32>
    %cst_339 = arith.constant dense<0.000000e+00> : vector<8x512xf32>
    %501 = tpu.matmul %500, %498, %cst_339 {dimension_numbers = #tpu.dot_dimension_numbers<[1], [0], [0], [1], [0, 0, 1, 1], [], []>} : vector<8x8xf32>, vector<8x512xf32>, vector<8x512xf32> -> vector<8x512xf32>
    %502 = arith.addf %493, %501 : vector<8x512xf32>
    %c503_i32_340 = arith.constant 503 : i32
    %503 = tpu.dynamic_rotate %350 by %c503_i32_340 dim 1 : vector<8x512xf32>, i32 -> vector<8x512xf32>
    %c17_341 = arith.constant 17 : index
    %c0_342 = arith.constant 0 : index
    %c0_343 = arith.constant 0 : index
    %504 = vector.load %arg2[%c17_341, %c0_342, %c0_343] : memref<27x1x512xf32, #tpu.memory_space<vmem>>, vector<1x1x512xf32>
    %505 = vector.shape_cast %504 : vector<1x1x512xf32> to vector<1x512xf32>
    %506 = vector.broadcast %505 : vector<1x512xf32> to vector<8x512xf32>
    %507 = arith.mulf %503, %506 : vector<8x512xf32>
    %c17_344 = arith.constant 17 : index
    %c0_345 = arith.constant 0 : index
    %c0_346 = arith.constant 0 : index
    %508 = vector.load %arg7[%c17_344, %c0_345, %c0_346] : memref<27x8x8xf32, #tpu.memory_space<vmem>>, vector<1x8x8xf32>
    %509 = vector.shape_cast %508 : vector<1x8x8xf32> to vector<8x8xf32>
    %cst_347 = arith.constant dense<0.000000e+00> : vector<8x512xf32>
    %510 = tpu.matmul %509, %507, %cst_347 {dimension_numbers = #tpu.dot_dimension_numbers<[1], [0], [0], [1], [0, 0, 1, 1], [], []>} : vector<8x8xf32>, vector<8x512xf32>, vector<8x512xf32> -> vector<8x512xf32>
    %511 = arith.addf %502, %510 : vector<8x512xf32>
    %c457_i32_348 = arith.constant 457 : i32
    %512 = tpu.dynamic_rotate %350 by %c457_i32_348 dim 1 : vector<8x512xf32>, i32 -> vector<8x512xf32>
    %c18_349 = arith.constant 18 : index
    %c0_350 = arith.constant 0 : index
    %c0_351 = arith.constant 0 : index
    %513 = vector.load %arg2[%c18_349, %c0_350, %c0_351] : memref<27x1x512xf32, #tpu.memory_space<vmem>>, vector<1x1x512xf32>
    %514 = vector.shape_cast %513 : vector<1x1x512xf32> to vector<1x512xf32>
    %515 = vector.broadcast %514 : vector<1x512xf32> to vector<8x512xf32>
    %516 = arith.mulf %512, %515 : vector<8x512xf32>
    %c18_352 = arith.constant 18 : index
    %c0_353 = arith.constant 0 : index
    %c0_354 = arith.constant 0 : index
    %517 = vector.load %arg7[%c18_352, %c0_353, %c0_354] : memref<27x8x8xf32, #tpu.memory_space<vmem>>, vector<1x8x8xf32>
    %518 = vector.shape_cast %517 : vector<1x8x8xf32> to vector<8x8xf32>
    %cst_355 = arith.constant dense<0.000000e+00> : vector<8x512xf32>
    %519 = tpu.matmul %518, %516, %cst_355 {dimension_numbers = #tpu.dot_dimension_numbers<[1], [0], [0], [1], [0, 0, 1, 1], [], []>} : vector<8x8xf32>, vector<8x512xf32>, vector<8x512xf32> -> vector<8x512xf32>
    %520 = arith.addf %511, %519 : vector<8x512xf32>
    %c456_i32_356 = arith.constant 456 : i32
    %521 = tpu.dynamic_rotate %350 by %c456_i32_356 dim 1 : vector<8x512xf32>, i32 -> vector<8x512xf32>
    %c19_357 = arith.constant 19 : index
    %c0_358 = arith.constant 0 : index
    %c0_359 = arith.constant 0 : index
    %522 = vector.load %arg2[%c19_357, %c0_358, %c0_359] : memref<27x1x512xf32, #tpu.memory_space<vmem>>, vector<1x1x512xf32>
    %523 = vector.shape_cast %522 : vector<1x1x512xf32> to vector<1x512xf32>
    %524 = vector.broadcast %523 : vector<1x512xf32> to vector<8x512xf32>
    %525 = arith.mulf %521, %524 : vector<8x512xf32>
    %c19_360 = arith.constant 19 : index
    %c0_361 = arith.constant 0 : index
    %c0_362 = arith.constant 0 : index
    %526 = vector.load %arg7[%c19_360, %c0_361, %c0_362] : memref<27x8x8xf32, #tpu.memory_space<vmem>>, vector<1x8x8xf32>
    %527 = vector.shape_cast %526 : vector<1x8x8xf32> to vector<8x8xf32>
    %cst_363 = arith.constant dense<0.000000e+00> : vector<8x512xf32>
    %528 = tpu.matmul %527, %525, %cst_363 {dimension_numbers = #tpu.dot_dimension_numbers<[1], [0], [0], [1], [0, 0, 1, 1], [], []>} : vector<8x8xf32>, vector<8x512xf32>, vector<8x512xf32> -> vector<8x512xf32>
    %529 = arith.addf %520, %528 : vector<8x512xf32>
    %c455_i32_364 = arith.constant 455 : i32
    %530 = tpu.dynamic_rotate %350 by %c455_i32_364 dim 1 : vector<8x512xf32>, i32 -> vector<8x512xf32>
    %c20_365 = arith.constant 20 : index
    %c0_366 = arith.constant 0 : index
    %c0_367 = arith.constant 0 : index
    %531 = vector.load %arg2[%c20_365, %c0_366, %c0_367] : memref<27x1x512xf32, #tpu.memory_space<vmem>>, vector<1x1x512xf32>
    %532 = vector.shape_cast %531 : vector<1x1x512xf32> to vector<1x512xf32>
    %533 = vector.broadcast %532 : vector<1x512xf32> to vector<8x512xf32>
    %534 = arith.mulf %530, %533 : vector<8x512xf32>
    %c20_368 = arith.constant 20 : index
    %c0_369 = arith.constant 0 : index
    %c0_370 = arith.constant 0 : index
    %535 = vector.load %arg7[%c20_368, %c0_369, %c0_370] : memref<27x8x8xf32, #tpu.memory_space<vmem>>, vector<1x8x8xf32>
    %536 = vector.shape_cast %535 : vector<1x8x8xf32> to vector<8x8xf32>
    %cst_371 = arith.constant dense<0.000000e+00> : vector<8x512xf32>
    %537 = tpu.matmul %536, %534, %cst_371 {dimension_numbers = #tpu.dot_dimension_numbers<[1], [0], [0], [1], [0, 0, 1, 1], [], []>} : vector<8x8xf32>, vector<8x512xf32>, vector<8x512xf32> -> vector<8x512xf32>
    %538 = arith.addf %529, %537 : vector<8x512xf32>
    %c449_i32_372 = arith.constant 449 : i32
    %539 = tpu.dynamic_rotate %350 by %c449_i32_372 dim 1 : vector<8x512xf32>, i32 -> vector<8x512xf32>
    %c21_373 = arith.constant 21 : index
    %c0_374 = arith.constant 0 : index
    %c0_375 = arith.constant 0 : index
    %540 = vector.load %arg2[%c21_373, %c0_374, %c0_375] : memref<27x1x512xf32, #tpu.memory_space<vmem>>, vector<1x1x512xf32>
    %541 = vector.shape_cast %540 : vector<1x1x512xf32> to vector<1x512xf32>
    %542 = vector.broadcast %541 : vector<1x512xf32> to vector<8x512xf32>
    %543 = arith.mulf %539, %542 : vector<8x512xf32>
    %c21_376 = arith.constant 21 : index
    %c0_377 = arith.constant 0 : index
    %c0_378 = arith.constant 0 : index
    %544 = vector.load %arg7[%c21_376, %c0_377, %c0_378] : memref<27x8x8xf32, #tpu.memory_space<vmem>>, vector<1x8x8xf32>
    %545 = vector.shape_cast %544 : vector<1x8x8xf32> to vector<8x8xf32>
    %cst_379 = arith.constant dense<0.000000e+00> : vector<8x512xf32>
    %546 = tpu.matmul %545, %543, %cst_379 {dimension_numbers = #tpu.dot_dimension_numbers<[1], [0], [0], [1], [0, 0, 1, 1], [], []>} : vector<8x8xf32>, vector<8x512xf32>, vector<8x512xf32> -> vector<8x512xf32>
    %547 = arith.addf %538, %546 : vector<8x512xf32>
    %c448_i32_380 = arith.constant 448 : i32
    %548 = tpu.dynamic_rotate %350 by %c448_i32_380 dim 1 : vector<8x512xf32>, i32 -> vector<8x512xf32>
    %c22_381 = arith.constant 22 : index
    %c0_382 = arith.constant 0 : index
    %c0_383 = arith.constant 0 : index
    %549 = vector.load %arg2[%c22_381, %c0_382, %c0_383] : memref<27x1x512xf32, #tpu.memory_space<vmem>>, vector<1x1x512xf32>
    %550 = vector.shape_cast %549 : vector<1x1x512xf32> to vector<1x512xf32>
    %551 = vector.broadcast %550 : vector<1x512xf32> to vector<8x512xf32>
    %552 = arith.mulf %548, %551 : vector<8x512xf32>
    %c22_384 = arith.constant 22 : index
    %c0_385 = arith.constant 0 : index
    %c0_386 = arith.constant 0 : index
    %553 = vector.load %arg7[%c22_384, %c0_385, %c0_386] : memref<27x8x8xf32, #tpu.memory_space<vmem>>, vector<1x8x8xf32>
    %554 = vector.shape_cast %553 : vector<1x8x8xf32> to vector<8x8xf32>
    %cst_387 = arith.constant dense<0.000000e+00> : vector<8x512xf32>
    %555 = tpu.matmul %554, %552, %cst_387 {dimension_numbers = #tpu.dot_dimension_numbers<[1], [0], [0], [1], [0, 0, 1, 1], [], []>} : vector<8x8xf32>, vector<8x512xf32>, vector<8x512xf32> -> vector<8x512xf32>
    %556 = arith.addf %547, %555 : vector<8x512xf32>
    %c447_i32_388 = arith.constant 447 : i32
    %557 = tpu.dynamic_rotate %350 by %c447_i32_388 dim 1 : vector<8x512xf32>, i32 -> vector<8x512xf32>
    %c23_389 = arith.constant 23 : index
    %c0_390 = arith.constant 0 : index
    %c0_391 = arith.constant 0 : index
    %558 = vector.load %arg2[%c23_389, %c0_390, %c0_391] : memref<27x1x512xf32, #tpu.memory_space<vmem>>, vector<1x1x512xf32>
    %559 = vector.shape_cast %558 : vector<1x1x512xf32> to vector<1x512xf32>
    %560 = vector.broadcast %559 : vector<1x512xf32> to vector<8x512xf32>
    %561 = arith.mulf %557, %560 : vector<8x512xf32>
    %c23_392 = arith.constant 23 : index
    %c0_393 = arith.constant 0 : index
    %c0_394 = arith.constant 0 : index
    %562 = vector.load %arg7[%c23_392, %c0_393, %c0_394] : memref<27x8x8xf32, #tpu.memory_space<vmem>>, vector<1x8x8xf32>
    %563 = vector.shape_cast %562 : vector<1x8x8xf32> to vector<8x8xf32>
    %cst_395 = arith.constant dense<0.000000e+00> : vector<8x512xf32>
    %564 = tpu.matmul %563, %561, %cst_395 {dimension_numbers = #tpu.dot_dimension_numbers<[1], [0], [0], [1], [0, 0, 1, 1], [], []>} : vector<8x8xf32>, vector<8x512xf32>, vector<8x512xf32> -> vector<8x512xf32>
    %565 = arith.addf %556, %564 : vector<8x512xf32>
    %c441_i32_396 = arith.constant 441 : i32
    %566 = tpu.dynamic_rotate %350 by %c441_i32_396 dim 1 : vector<8x512xf32>, i32 -> vector<8x512xf32>
    %c24_397 = arith.constant 24 : index
    %c0_398 = arith.constant 0 : index
    %c0_399 = arith.constant 0 : index
    %567 = vector.load %arg2[%c24_397, %c0_398, %c0_399] : memref<27x1x512xf32, #tpu.memory_space<vmem>>, vector<1x1x512xf32>
    %568 = vector.shape_cast %567 : vector<1x1x512xf32> to vector<1x512xf32>
    %569 = vector.broadcast %568 : vector<1x512xf32> to vector<8x512xf32>
    %570 = arith.mulf %566, %569 : vector<8x512xf32>
    %c24_400 = arith.constant 24 : index
    %c0_401 = arith.constant 0 : index
    %c0_402 = arith.constant 0 : index
    %571 = vector.load %arg7[%c24_400, %c0_401, %c0_402] : memref<27x8x8xf32, #tpu.memory_space<vmem>>, vector<1x8x8xf32>
    %572 = vector.shape_cast %571 : vector<1x8x8xf32> to vector<8x8xf32>
    %cst_403 = arith.constant dense<0.000000e+00> : vector<8x512xf32>
    %573 = tpu.matmul %572, %570, %cst_403 {dimension_numbers = #tpu.dot_dimension_numbers<[1], [0], [0], [1], [0, 0, 1, 1], [], []>} : vector<8x8xf32>, vector<8x512xf32>, vector<8x512xf32> -> vector<8x512xf32>
    %574 = arith.addf %565, %573 : vector<8x512xf32>
    %c440_i32_404 = arith.constant 440 : i32
    %575 = tpu.dynamic_rotate %350 by %c440_i32_404 dim 1 : vector<8x512xf32>, i32 -> vector<8x512xf32>
    %c25_405 = arith.constant 25 : index
    %c0_406 = arith.constant 0 : index
    %c0_407 = arith.constant 0 : index
    %576 = vector.load %arg2[%c25_405, %c0_406, %c0_407] : memref<27x1x512xf32, #tpu.memory_space<vmem>>, vector<1x1x512xf32>
    %577 = vector.shape_cast %576 : vector<1x1x512xf32> to vector<1x512xf32>
    %578 = vector.broadcast %577 : vector<1x512xf32> to vector<8x512xf32>
    %579 = arith.mulf %575, %578 : vector<8x512xf32>
    %c25_408 = arith.constant 25 : index
    %c0_409 = arith.constant 0 : index
    %c0_410 = arith.constant 0 : index
    %580 = vector.load %arg7[%c25_408, %c0_409, %c0_410] : memref<27x8x8xf32, #tpu.memory_space<vmem>>, vector<1x8x8xf32>
    %581 = vector.shape_cast %580 : vector<1x8x8xf32> to vector<8x8xf32>
    %cst_411 = arith.constant dense<0.000000e+00> : vector<8x512xf32>
    %582 = tpu.matmul %581, %579, %cst_411 {dimension_numbers = #tpu.dot_dimension_numbers<[1], [0], [0], [1], [0, 0, 1, 1], [], []>} : vector<8x8xf32>, vector<8x512xf32>, vector<8x512xf32> -> vector<8x512xf32>
    %583 = arith.addf %574, %582 : vector<8x512xf32>
    %c439_i32_412 = arith.constant 439 : i32
    %584 = tpu.dynamic_rotate %350 by %c439_i32_412 dim 1 : vector<8x512xf32>, i32 -> vector<8x512xf32>
    %c26_413 = arith.constant 26 : index
    %c0_414 = arith.constant 0 : index
    %c0_415 = arith.constant 0 : index
    %585 = vector.load %arg2[%c26_413, %c0_414, %c0_415] : memref<27x1x512xf32, #tpu.memory_space<vmem>>, vector<1x1x512xf32>
    %586 = vector.shape_cast %585 : vector<1x1x512xf32> to vector<1x512xf32>
    %587 = vector.broadcast %586 : vector<1x512xf32> to vector<8x512xf32>
    %588 = arith.mulf %584, %587 : vector<8x512xf32>
    %c26_416 = arith.constant 26 : index
    %c0_417 = arith.constant 0 : index
    %c0_418 = arith.constant 0 : index
    %589 = vector.load %arg7[%c26_416, %c0_417, %c0_418] : memref<27x8x8xf32, #tpu.memory_space<vmem>>, vector<1x8x8xf32>
    %590 = vector.shape_cast %589 : vector<1x8x8xf32> to vector<8x8xf32>
    %cst_419 = arith.constant dense<0.000000e+00> : vector<8x512xf32>
    %591 = tpu.matmul %590, %588, %cst_419 {dimension_numbers = #tpu.dot_dimension_numbers<[1], [0], [0], [1], [0, 0, 1, 1], [], []>} : vector<8x8xf32>, vector<8x512xf32>, vector<8x512xf32> -> vector<8x512xf32>
    %592 = arith.addf %583, %591 : vector<8x512xf32>
    %593 = vector.broadcast %351 : vector<8x1xf32> to vector<8x512xf32>
    %594 = arith.addf %592, %593 : vector<8x512xf32>
    %cst_420 = arith.constant dense<0.000000e+00> : vector<8xf32>
    %595 = vector.multi_reduction <add>, %594, %cst_420 [1] : vector<8x512xf32> to vector<8xf32>
    %596 = vector.shape_cast %595 : vector<8xf32> to vector<8x1xf32>
    %597 = arith.mulf %594, %594 : vector<8x512xf32>
    %cst_421 = arith.constant dense<0.000000e+00> : vector<8xf32>
    %598 = vector.multi_reduction <add>, %597, %cst_421 [1] : vector<8x512xf32> to vector<8xf32>
    %599 = vector.shape_cast %598 : vector<8xf32> to vector<8x1xf32>
    %600 = vector.extract_strided_slice %596 {offsets = [0, 0], sizes = [2, 1], strides = [1, 1]} : vector<8x1xf32> to vector<2x1xf32>
    %601 = vector.shape_cast %600 : vector<2x1xf32> to vector<1x2x1xf32>
    %cst_422 = arith.constant dense<0.000000e+00> : vector<1xf32>
    %602 = vector.multi_reduction <add>, %601, %cst_422 [1, 2] : vector<1x2x1xf32> to vector<1xf32>
    %603 = vector.shape_cast %602 : vector<1xf32> to vector<1x1x1xf32>
    %604 = vector.extract %603[0, 0, 0] : f32 from vector<1x1x1xf32>
    %605 = vector.extract_strided_slice %599 {offsets = [0, 0], sizes = [2, 1], strides = [1, 1]} : vector<8x1xf32> to vector<2x1xf32>
    %606 = vector.shape_cast %605 : vector<2x1xf32> to vector<1x2x1xf32>
    %cst_423 = arith.constant dense<0.000000e+00> : vector<1xf32>
    %607 = vector.multi_reduction <add>, %606, %cst_423 [1, 2] : vector<1x2x1xf32> to vector<1xf32>
    %608 = vector.shape_cast %607 : vector<1xf32> to vector<1x1x1xf32>
    %609 = vector.extract %608[0, 0, 0] : f32 from vector<1x1x1xf32>
    %cst_424 = arith.constant 9.765625E-4 : f32
    %610 = arith.mulf %604, %cst_424 : f32
    %cst_425 = arith.constant 9.765625E-4 : f32
    %611 = arith.mulf %609, %cst_425 : f32
    %612 = arith.mulf %610, %610 : f32
    %613 = arith.subf %611, %612 : f32
    %cst_426 = arith.constant 0.000000e+00 : f32
    %614 = arith.maximumf %613, %cst_426 : f32
    %cst_427 = arith.constant 9.99999974E-6 : f32
    %615 = arith.addf %614, %cst_427 : f32
    %616 = math.rsqrt %615 : f32
    %617 = vector.broadcast %616 : f32 to vector<2x1xf32>
    %cst_428 = arith.constant 0.000000e+00 : f32
    %618 = arith.subf %cst_428, %610 : f32
    %619 = arith.mulf %618, %616 : f32
    %620 = vector.broadcast %619 : f32 to vector<2x1xf32>
    %621 = vector.extract_strided_slice %596 {offsets = [2, 0], sizes = [2, 1], strides = [1, 1]} : vector<8x1xf32> to vector<2x1xf32>
    %622 = vector.shape_cast %621 : vector<2x1xf32> to vector<1x2x1xf32>
    %cst_429 = arith.constant dense<0.000000e+00> : vector<1xf32>
    %623 = vector.multi_reduction <add>, %622, %cst_429 [1, 2] : vector<1x2x1xf32> to vector<1xf32>
    %624 = vector.shape_cast %623 : vector<1xf32> to vector<1x1x1xf32>
    %625 = vector.extract %624[0, 0, 0] : f32 from vector<1x1x1xf32>
    %626 = vector.extract_strided_slice %599 {offsets = [2, 0], sizes = [2, 1], strides = [1, 1]} : vector<8x1xf32> to vector<2x1xf32>
    %627 = vector.shape_cast %626 : vector<2x1xf32> to vector<1x2x1xf32>
    %cst_430 = arith.constant dense<0.000000e+00> : vector<1xf32>
    %628 = vector.multi_reduction <add>, %627, %cst_430 [1, 2] : vector<1x2x1xf32> to vector<1xf32>
    %629 = vector.shape_cast %628 : vector<1xf32> to vector<1x1x1xf32>
    %630 = vector.extract %629[0, 0, 0] : f32 from vector<1x1x1xf32>
    %cst_431 = arith.constant 9.765625E-4 : f32
    %631 = arith.mulf %625, %cst_431 : f32
    %cst_432 = arith.constant 9.765625E-4 : f32
    %632 = arith.mulf %630, %cst_432 : f32
    %633 = arith.mulf %631, %631 : f32
    %634 = arith.subf %632, %633 : f32
    %cst_433 = arith.constant 0.000000e+00 : f32
    %635 = arith.maximumf %634, %cst_433 : f32
    %cst_434 = arith.constant 9.99999974E-6 : f32
    %636 = arith.addf %635, %cst_434 : f32
    %637 = math.rsqrt %636 : f32
    %638 = vector.broadcast %637 : f32 to vector<2x1xf32>
    %cst_435 = arith.constant 0.000000e+00 : f32
    %639 = arith.subf %cst_435, %631 : f32
    %640 = arith.mulf %639, %637 : f32
    %641 = vector.broadcast %640 : f32 to vector<2x1xf32>
    %642 = vector.extract_strided_slice %596 {offsets = [4, 0], sizes = [2, 1], strides = [1, 1]} : vector<8x1xf32> to vector<2x1xf32>
    %643 = vector.shape_cast %642 : vector<2x1xf32> to vector<1x2x1xf32>
    %cst_436 = arith.constant dense<0.000000e+00> : vector<1xf32>
    %644 = vector.multi_reduction <add>, %643, %cst_436 [1, 2] : vector<1x2x1xf32> to vector<1xf32>
    %645 = vector.shape_cast %644 : vector<1xf32> to vector<1x1x1xf32>
    %646 = vector.extract %645[0, 0, 0] : f32 from vector<1x1x1xf32>
    %647 = vector.extract_strided_slice %599 {offsets = [4, 0], sizes = [2, 1], strides = [1, 1]} : vector<8x1xf32> to vector<2x1xf32>
    %648 = vector.shape_cast %647 : vector<2x1xf32> to vector<1x2x1xf32>
    %cst_437 = arith.constant dense<0.000000e+00> : vector<1xf32>
    %649 = vector.multi_reduction <add>, %648, %cst_437 [1, 2] : vector<1x2x1xf32> to vector<1xf32>
    %650 = vector.shape_cast %649 : vector<1xf32> to vector<1x1x1xf32>
    %651 = vector.extract %650[0, 0, 0] : f32 from vector<1x1x1xf32>
    %cst_438 = arith.constant 9.765625E-4 : f32
    %652 = arith.mulf %646, %cst_438 : f32
    %cst_439 = arith.constant 9.765625E-4 : f32
    %653 = arith.mulf %651, %cst_439 : f32
    %654 = arith.mulf %652, %652 : f32
    %655 = arith.subf %653, %654 : f32
    %cst_440 = arith.constant 0.000000e+00 : f32
    %656 = arith.maximumf %655, %cst_440 : f32
    %cst_441 = arith.constant 9.99999974E-6 : f32
    %657 = arith.addf %656, %cst_441 : f32
    %658 = math.rsqrt %657 : f32
    %659 = vector.broadcast %658 : f32 to vector<2x1xf32>
    %cst_442 = arith.constant 0.000000e+00 : f32
    %660 = arith.subf %cst_442, %652 : f32
    %661 = arith.mulf %660, %658 : f32
    %662 = vector.broadcast %661 : f32 to vector<2x1xf32>
    %663 = vector.extract_strided_slice %596 {offsets = [6, 0], sizes = [2, 1], strides = [1, 1]} : vector<8x1xf32> to vector<2x1xf32>
    %664 = vector.shape_cast %663 : vector<2x1xf32> to vector<1x2x1xf32>
    %cst_443 = arith.constant dense<0.000000e+00> : vector<1xf32>
    %665 = vector.multi_reduction <add>, %664, %cst_443 [1, 2] : vector<1x2x1xf32> to vector<1xf32>
    %666 = vector.shape_cast %665 : vector<1xf32> to vector<1x1x1xf32>
    %667 = vector.extract %666[0, 0, 0] : f32 from vector<1x1x1xf32>
    %668 = vector.extract_strided_slice %599 {offsets = [6, 0], sizes = [2, 1], strides = [1, 1]} : vector<8x1xf32> to vector<2x1xf32>
    %669 = vector.shape_cast %668 : vector<2x1xf32> to vector<1x2x1xf32>
    %cst_444 = arith.constant dense<0.000000e+00> : vector<1xf32>
    %670 = vector.multi_reduction <add>, %669, %cst_444 [1, 2] : vector<1x2x1xf32> to vector<1xf32>
    %671 = vector.shape_cast %670 : vector<1xf32> to vector<1x1x1xf32>
    %672 = vector.extract %671[0, 0, 0] : f32 from vector<1x1x1xf32>
    %cst_445 = arith.constant 9.765625E-4 : f32
    %673 = arith.mulf %667, %cst_445 : f32
    %cst_446 = arith.constant 9.765625E-4 : f32
    %674 = arith.mulf %672, %cst_446 : f32
    %675 = arith.mulf %673, %673 : f32
    %676 = arith.subf %674, %675 : f32
    %cst_447 = arith.constant 0.000000e+00 : f32
    %677 = arith.maximumf %676, %cst_447 : f32
    %cst_448 = arith.constant 9.99999974E-6 : f32
    %678 = arith.addf %677, %cst_448 : f32
    %679 = math.rsqrt %678 : f32
    %680 = vector.broadcast %679 : f32 to vector<2x1xf32>
    %cst_449 = arith.constant 0.000000e+00 : f32
    %681 = arith.subf %cst_449, %673 : f32
    %682 = arith.mulf %681, %679 : f32
    %683 = vector.broadcast %682 : f32 to vector<2x1xf32>
    %684 = tpu.concatenate %617, %638, %659, %680 in 0 : vector<2x1xf32>, vector<2x1xf32>, vector<2x1xf32>, vector<2x1xf32> -> vector<8x1xf32>
    %685 = arith.mulf %684, %352 : vector<8x1xf32>
    %686 = tpu.concatenate %620, %641, %662, %683 in 0 : vector<2x1xf32>, vector<2x1xf32>, vector<2x1xf32>, vector<2x1xf32> -> vector<8x1xf32>
    %687 = arith.mulf %686, %352 : vector<8x1xf32>
    %688 = arith.addf %687, %353 : vector<8x1xf32>
    %689 = vector.broadcast %685 : vector<8x1xf32> to vector<8x512xf32>
    %690 = arith.mulf %594, %689 : vector<8x512xf32>
    %691 = vector.broadcast %688 : vector<8x1xf32> to vector<8x512xf32>
    %692 = arith.addf %690, %691 : vector<8x512xf32>
    %cst_450 = arith.constant 0.000000e+00 : f32
    %693 = vector.broadcast %cst_450 : f32 to vector<8x512xf32>
    %694 = arith.cmpf ogt, %692, %693 : vector<8x512xf32>
    %695 = vector.broadcast %3 : f32 to vector<8x512xf32>
    %696 = arith.mulf %695, %692 : vector<8x512xf32>
    %697 = arith.select %694, %692, %696 : vector<8x512xi1>, vector<8x512xf32>
    %698 = arith.addf %697, %1 : vector<8x512xf32>
    %c0_451 = arith.constant 0 : index
    %c0_452 = arith.constant 0 : index
    %c0_453 = arith.constant 0 : index
    %699 = vector.load %arg12[%c0_451, %c0_452, %c0_453] : memref<1x8x512xf32, #tpu.memory_space<vmem>>, vector<1x8x512xf32>
    %700 = vector.shape_cast %699 : vector<1x8x512xf32> to vector<8x512xf32>
    %701 = vector.shape_cast %698 : vector<8x512xf32> to vector<1x8x512xf32>
    tpu.vector_store %arg12[%c0_451, %c0_452, %c0_453], %701 {strides = array<i32>} : memref<1x8x512xf32, #tpu.memory_space<vmem>>, vector<1x8x512xf32>,
    return
  }
  func.func @transform_0(%arg0: i32) -> (i32, i32, i32) {
    %c0_i32 = arith.constant 0 : i32
    %c0_i32_0 = arith.constant 0 : i32
    %c0_i32_1 = arith.constant 0 : i32
    return %arg0, %c0_i32, %c0_i32_0 : i32, i32, i32
  }
  func.func @transform_1(%arg0: i32) -> (i32, i32, i32) {
    %c0_i32 = arith.constant 0 : i32
    %c0_i32_0 = arith.constant 0 : i32
    %c0_i32_1 = arith.constant 0 : i32
    %c0_i32_2 = arith.constant 0 : i32
    return %c0_i32, %c0_i32_0, %c0_i32_1 : i32, i32, i32
  }
  func.func @transform_2(%arg0: i32) -> (i32, i32, i32) {
    %c0_i32 = arith.constant 0 : i32
    %c0_i32_0 = arith.constant 0 : i32
    %c0_i32_1 = arith.constant 0 : i32
    %c0_i32_2 = arith.constant 0 : i32
    return %c0_i32, %c0_i32_0, %c0_i32_1 : i32, i32, i32
  }
  func.func @transform_3(%arg0: i32) -> (i32, i32) {
    %c0_i32 = arith.constant 0 : i32
    %c0_i32_0 = arith.constant 0 : i32
    %c0_i32_1 = arith.constant 0 : i32
    return %c0_i32, %c0_i32_0 : i32, i32
  }
  func.func @transform_4(%arg0: i32) -> (i32, i32) {
    %c0_i32 = arith.constant 0 : i32
    %c0_i32_0 = arith.constant 0 : i32
    %c0_i32_1 = arith.constant 0 : i32
    return %c0_i32, %c0_i32_0 : i32, i32
  }
  func.func @transform_5(%arg0: i32) -> (i32, i32) {
    %c0_i32 = arith.constant 0 : i32
    %c0_i32_0 = arith.constant 0 : i32
    %c0_i32_1 = arith.constant 0 : i32
    return %c0_i32, %c0_i32_0 : i32, i32
  }
  func.func @transform_6(%arg0: i32) -> (i32, i32, i32) {
    %c0_i32 = arith.constant 0 : i32
    %c0_i32_0 = arith.constant 0 : i32
    %c0_i32_1 = arith.constant 0 : i32
    %c0_i32_2 = arith.constant 0 : i32
    return %c0_i32, %c0_i32_0, %c0_i32_1 : i32, i32, i32
  }
  func.func @transform_7(%arg0: i32) -> (i32, i32) {
    %c0_i32 = arith.constant 0 : i32
    %c0_i32_0 = arith.constant 0 : i32
    %c0_i32_1 = arith.constant 0 : i32
    return %c0_i32, %c0_i32_0 : i32, i32
  }
  func.func @transform_8(%arg0: i32) -> (i32, i32) {
    %c0_i32 = arith.constant 0 : i32
    %c0_i32_0 = arith.constant 0 : i32
    %c0_i32_1 = arith.constant 0 : i32
    return %c0_i32, %c0_i32_0 : i32, i32
  }
  func.func @transform_9(%arg0: i32) -> (i32, i32) {
    %c0_i32 = arith.constant 0 : i32
    %c0_i32_0 = arith.constant 0 : i32
    %c0_i32_1 = arith.constant 0 : i32
    return %c0_i32, %c0_i32_0 : i32, i32
  }
  func.func @transform_10(%arg0: i32) -> i32 {
    %c0_i32 = arith.constant 0 : i32
    %c0_i32_0 = arith.constant 0 : i32
    return %c0_i32 : i32
  }
  func.func @transform_11(%arg0: i32) -> (i32, i32, i32) {
    %c0_i32 = arith.constant 0 : i32
    %c0_i32_0 = arith.constant 0 : i32
    %c0_i32_1 = arith.constant 0 : i32
    return %arg0, %c0_i32, %c0_i32_0 : i32, i32, i32
  }
}

</mosaic_0001>

<bundles_post_ra>
// kernel: tile.33
= control target key start
LH: loop header
LB: loop body
LE: loop exit
PB: predicated region body
PF: predicated region fallthrough
CT: control target
= control target key end

     0   :  { %s22_s0 = inlined_call_operand.vmem [shape: f32[4], index: 0, kind: input, shape index: {}]   ;;  %s23_s1 = inlined_call_operand.vmem [shape: f32[2,4], index: 1, kind: output, shape index: {}]  }
   0x1   :  { %v4_v0 = vld [vmem:[%s22_s0] ss:$0 sm:$0xff] }
   0x2   :  { %5 = vst [vmem:[%s23_s1] sm:$0x3] %v4_v0 }

// kernel: tile.0
= control target key start
LH: loop header
LB: loop body
LE: loop exit
PB: predicated region body
PF: predicated region fallthrough
CT: control target
= control target key end

     0   :  { %s34_s8 = smov 125   ;;  %vm7_vm0 = vcmask 7168   ;;  %s35_s11 = smov 126   ;;  %s61_s0 = inlined_call_operand.vmem [shape: f32[2,4], index: 0, kind: input, shape index: {}]   ;;  %s62_s1 = inlined_call_operand.vmem [shape: f32[8,1], index: 1, kind: output, shape index: {}]  }
   0x1   :  { %v4_v0 = vld [vmem:[%s61_s0] sm:$0x3]  ;;  %s33_s0 = smov 127  }
   0x2   :  { %5 = vst [vmem:[#allocation0] sm:$0x3] %v4_v0 }
   0x9   :  { %v9_v1 = vld [vmem:[#allocation0] sm:$0x3]  }
   0xa   :  { %v21_v2 = vld [vmem:[#allocation0] sm:$0x3]   ;;  %10 = vrot.lane.b32.xlu0 %v9_v1, %s33_s0 }
   0xb   :  { %22 = vrot.lane.b32.xlu1 %v21_v2, %s34_s8  ;;  %v6_v3 = vld [vmem:[#allocation0] sm:$0x3]  }
   0xc   :  { %v15_v4 = vld [vmem:[#allocation0] sm:$0x3]   ;;  %8 = vst.msk [vmem:[%s62_s1] ss:$4 sm:$0x3] %vm7_vm0, %v6_v3  }
   0xe   :  { %16 = vrot.lane.b32.xlu0 %v15_v4, %s35_s11 }
  0x7c   :  { %v11_v5 = vpop.permute.xlu0 %10  }
  0x7d   :  { %v23_v6 = vpop.permute.xlu1 %22   ;;  %27 = vst.msk [vmem:[%s62_s1 + $0x1] ss:$4 sm:$0x3] %vm7_vm0, %v11_v5  }
  0x7e   :  { %29 = vst.msk [vmem:[%s62_s1 + $0x3] ss:$4 sm:$0x3] %vm7_vm0, %v23_v6  }
  0x80   :  { %v17_v7 = vpop.permute.xlu0 %16  }
  0x81   :  { %28 = vst.msk [vmem:[%s62_s1 + $0x2] ss:$4 sm:$0x3] %vm7_vm0, %v17_v7  }

// kernel: resblock_forward.1
= control target key start
LH: loop header
LB: loop body
LE: loop exit
PB: predicated region body
PF: predicated region fallthrough
CT: control target
= control target key end

     0   :  { %16 = vsyncpa [#allocation3], 0  ;;  %s12491_s0 = inlined_call_operand.vmem [shape: f32[1,8,512], index: 0, kind: input, shape index: {}]   ;;  %s12492_s1 = inlined_call_operand.vmem [shape: f32[27,1,512], index: 1, kind: input, shape index: {}]   ;;  %s12493_s2 = inlined_call_operand.vmem [shape: f32[27,8,8], index: 2, kind: input, shape index: {}]   ;;  %s12494_s3 = inlined_call_operand.vmem [shape: f32[8,1], index: 3, kind: input, shape index: {}]   ;;  %s12495_s4 = inlined_call_operand.vmem [shape: f32[8,1], index: 4, kind: input, shape index: {}]   ;;  %s12496_s5 = inlined_call_operand.vmem [shape: f32[8,1], index: 5, kind: input, shape index: {}]   ;;  %s12497_s6 = inlined_call_operand.vmem [shape: f32[27,8,8], index: 6, kind: input, shape index: {}]   ;;  %s12498_s7 = inlined_call_operand.vmem [shape: f32[8,1], index: 7, kind: input, shape index: {}]   ;;  %s12499_s8 = inlined_call_operand.vmem [shape: f32[8,1], index: 8, kind: input, shape index: {}]   ;;  %s12500_s9 = inlined_call_operand.vmem [shape: f32[8,1], index: 9, kind: input, shape index: {}]   ;;  %s12501_s10 = inlined_call_operand.vmem [shape: f32[2], index: 10, kind: input, shape index: {}]   ;;  %s12502_s11 = inlined_call_operand.vmem [shape: f32[1,8,512], index: 11, kind: output, shape index: {}]  }
   0x1   :  { %s43_s19 = sshll.u32 %s12501_s10, 4  ;;  %s44_s19 = int_to_ptr.vmem [resolvable:$true] %s43_s19 }
   0x2   :  { %s10352_s20 = scalar_lea.vmem %s44_s19, 16  ;;  %p10357_p1 = scmp.lt.s32.totalorder %s44_s19, %s44_s19 }
   0x3   :  { %p10353_p0 = scmp.ne.s32.totalorder %s44_s19, %s10352_s20  ;;  %p10358_p2 = scmp.lt.s32.totalorder %s10352_s20, %s10352_s20 }
   0x5   :  { %p10359_p3 = por %p10358_p2, %p10357_p1 }
   0x7   :  { %p10360_p4 = pnand %p10359_p3, %p10353_p0 }
   0x9   :  { %10363 = shalt.err (!%p10360_p4)
}
   0xa   :  { %s10366_s21 = smov [#allocation2]  }
   0xb   :  { %46 = dma.vmem_to_smem %s44_s19, 16, %s10366_s21, [#allocation3]  }
   0xc   :  { %10364 = dma.done.wait [#allocation3], 16  }
   0xd   :  { %10365 = vsyncadd [#allocation3], 4294967280 }
   0xe   :  { %50 = sfence }
   0xf   :  { %v10453_v0 = vld [vmem:[%s12491_s0 + $0x18] sm:$0xff]  ;;  %v10458_v1 = vld [vmem:[%s12491_s0] sm:$0xff]  ;;  %s10367_s25 = smov 72   ;;  %v10467_v2 = vld [vmem:[%s12491_s0 + $0x10] sm:$0xff]  ;;  %v12503_v4 = vmov 0.0   ;;  %s10369_s30 = smov 73   ;;  %v68_v5 = vlaneseq }
  0x10   :  { %108 = vrot.lane.b32.xlu1 %v10453_v0, %s10367_s25  ;;  %102 = vrot.lane.b32.xlu0 %v10458_v1, %s10367_s25  ;;  %v10472_v3 = vld [vmem:[%s12491_s0 + $0x8] sm:$0xff]  ;;  %s10370_s12 = smov 71   ;;  %s10371_s13 = smov 65   ;;  %v9868_v14 = vld [vmem:[%s12492_s1 + $0x4] sm:$0xf]  ;;  %vm144_vm2 = vcmask 64512  }
  0x11   :  { %212 = vmatprep.mubr.f32.mxu0 %v12503_v4  ;;  %283 = vmatprep.mubr.f32.mxu1 %v12503_v4  ;;  %s10372_s14 = smov 64   ;;  %s10373_s15 = smov 63   ;;  %v78_v6 = vshrl.u32 %v68_v5, 7  ;;  %v10584_v7 = vand.u32 127, %v68_v5  ;;  %v75_v19 = vld [vmem:[%s12492_s1] sm:$0xf] }
  0x12   :  { %s10374_s16 = smov 57   ;;  %s10375_s17 = smov 56   ;;  %v9869_v31 = vld [vmem:[%s12493_s2 + $0x8] sm:$0xff]  ;;  %v101_v49 = vld [vmem:[%s12493_s2] sm:$0xff] }
  0x13   :  { %s10376_s18 = smov 55   ;;  %s12590_s19 = smov 9   ;;  %v10590_v8 = vsub.s32 1, %v78_v6  ;;  %v10592_v9 = vsub.s32 0, %v78_v6  ;;  %v10594_v10 = vsub.s32 2, %v78_v6  ;;  %v10596_v13 = vsub.s32 3, %v78_v6 }
  0x14   :  { %106 = vrot.lane.b32.xlu1 %v10467_v2, %s10367_s25  ;;  %104 = vrot.lane.b32.xlu0 %v10472_v3, %s10367_s25  ;;  %s12587_s20 = smov 8   ;;  %s12582_s21 = smov 7   ;;  %vm110_vm0 = vcmp.lt.s32.totalorder %v10584_v7, 72  ;;  %vm70_vm1 = vcmp.lt.s32.totalorder %v10584_v7, 73  ;;  %v9874_v39 = vld [vmem:[%s12492_s1 + $0x8] sm:$0xf] }
  0x15   :  { %s12580_s22 = smov 1   ;;  %s12578_s23 = smov 127   ;;  %v10607_v15 = vrot.slane %v9868_v14, %v10596_v13  ;;  %v10610_v16 = vrot.slane %v9868_v14, %v10590_v8  ;;  %v10613_v17 = vrot.slane %v9868_v14, %v10592_v9  ;;  %v10616_v18 = vrot.slane %v9868_v14, %v10594_v10  ;;  %v9878_v57 = vld [vmem:[%s12492_s1 + $0xc] sm:$0xf] }
  0x16   :  { %s12576_s24 = smov 121   ;;  %s12574_s29 = smov 120   ;;  %v10647_v28 = vrot.slane %v75_v19, %v10590_v8  ;;  %v10661_v35 = vrot.slane %v75_v19, %v10594_v10  ;;  %v10666_v36 = vrot.slane %v75_v19, %v10592_v9  ;;  %v10671_v38 = vrot.slane %v75_v19, %v10596_v13 }
  0x17   :  { %12628 = vst [vmem:[#allocation5_spill] sm:$0xff] %v10607_v15  ;;  %12629 = vst [vmem:[#allocation6_spill] sm:$0xff] %v10613_v17  ;;  %vm443_vm3 = vcmp.lt.s32.totalorder %v10584_v7, 71  ;;  %v10702_v48 = vrot.slane %v9874_v39, %v10590_v8  ;;  %s12544_s10 = smov 119   ;;  %v10716_v53 = vrot.slane %v9874_v39, %v10594_v10  ;;  %v10721_v54 = vrot.slane %v9874_v39, %v10592_v9 }
  0x18   :  { %62 = vrot.lane.b32.xlu1 %v10472_v3, %s10369_s30  ;;  %60 = vrot.lane.b32.xlu0 %v10458_v1, %s10369_s30  ;;  %12630 = vst [vmem:[#allocation7_spill] sm:$0xff] %v10616_v18  ;;  %12631 = vst [vmem:[#allocation8_spill] sm:$0xff] %v10647_v28  ;;  %v10726_v56 = vrot.slane %v9874_v39, %v10596_v13  ;;  %vm634_vm4 = vcmp.lt.s32.totalorder %v10584_v7, 65  ;;  %vm825_vm5 = vcmp.lt.s32.totalorder %v10584_v7, 64  ;;  %vm1016_vm6 = vcmp.lt.s32.totalorder %v10584_v7, 63 }
  0x19   :  { %12632 = vst [vmem:[#allocation9_spill] sm:$0xff] %v10661_v35  ;;  %12633 = vst [vmem:[#allocation10_spill] sm:$0xff] %v10666_v36  ;;  %vm1207_vm7 = vcmp.lt.s32.totalorder %v10584_v7, 57  ;;  %vm1398_vm8 = vcmp.lt.s32.totalorder %v10584_v7, 56  ;;  %vm1589_vm9 = vcmp.lt.s32.totalorder %v10584_v7, 55  ;;  %vm1780_vm10 = vcmp.lt.s32.totalorder %v10584_v7, 9 }
  0x1a   :  { %12634 = vst [vmem:[#allocation11_spill] sm:$0xff] %v10671_v38  ;;  %12635 = vst [vmem:[#allocation12_spill] sm:$0xff] %v10702_v48  ;;  %vm1971_vm11 = vcmp.lt.s32.totalorder %v10584_v7, 8  ;;  %vm12595_vm12 = vcmp.lt.s32.totalorder %v10584_v7, 7  ;;  %vm12594_vm13 = vcmp.lt.s32.totalorder %v10584_v7, 1  ;;  %vm12556_vm14 = vcmp.lt.s32.totalorder %v10584_v7, 127 }
  0x1b   :  { %12636 = vst [vmem:[#allocation13_spill] sm:$0xff] %v10716_v53  ;;  %12637 = vst [vmem:[#allocation14_spill] sm:$0xff] %v10721_v54  ;;  %vm12560_vm15 = vcmp.lt.s32.totalorder %v10584_v7, 121 }
  0x1c   :  { %64 = vrot.lane.b32.xlu1 %v10467_v2, %s10369_s30  ;;  %66 = vrot.lane.b32.xlu0 %v10453_v0, %s10369_s30  ;;  %12638 = vst [vmem:[#allocation15_spill] sm:$0xff] %v10726_v56 }
  0x20   :  { %437 = vrot.lane.b32.xlu1 %v10472_v3, %s10370_s12  ;;  %435 = vrot.lane.b32.xlu0 %v10458_v1, %s10370_s12 }
  0x24   :  { %439 = vrot.lane.b32.xlu1 %v10467_v2, %s10370_s12  ;;  %441 = vrot.lane.b32.xlu0 %v10453_v0, %s10370_s12 }
  0x28   :  { %628 = vrot.lane.b32.xlu1 %v10472_v3, %s10371_s13  ;;  %626 = vrot.lane.b32.xlu0 %v10458_v1, %s10371_s13 }
  0x2c   :  { %630 = vrot.lane.b32.xlu1 %v10467_v2, %s10371_s13  ;;  %632 = vrot.lane.b32.xlu0 %v10453_v0, %s10371_s13 }
  0x30   :  { %819 = vrot.lane.b32.xlu1 %v10472_v3, %s10372_s14  ;;  %817 = vrot.lane.b32.xlu0 %v10458_v1, %s10372_s14 }
  0x34   :  { %821 = vrot.lane.b32.xlu1 %v10467_v2, %s10372_s14  ;;  %823 = vrot.lane.b32.xlu0 %v10453_v0, %s10372_s14 }
  0x38   :  { %1010 = vrot.lane.b32.xlu1 %v10472_v3, %s10373_s15  ;;  %1008 = vrot.lane.b32.xlu0 %v10458_v1, %s10373_s15 }
  0x3c   :  { %1012 = vrot.lane.b32.xlu1 %v10467_v2, %s10373_s15  ;;  %1014 = vrot.lane.b32.xlu0 %v10453_v0, %s10373_s15 }
  0x40   :  { %1201 = vrot.lane.b32.xlu1 %v10472_v3, %s10374_s16  ;;  %1199 = vrot.lane.b32.xlu0 %v10458_v1, %s10374_s16 }
  0x44   :  { %1203 = vrot.lane.b32.xlu1 %v10467_v2, %s10374_s16  ;;  %1205 = vrot.lane.b32.xlu0 %v10453_v0, %s10374_s16 }
  0x48   :  { %1392 = vrot.lane.b32.xlu1 %v10472_v3, %s10375_s17  ;;  %1390 = vrot.lane.b32.xlu0 %v10458_v1, %s10375_s17 }
  0x4c   :  { %1394 = vrot.lane.b32.xlu1 %v10467_v2, %s10375_s17  ;;  %1396 = vrot.lane.b32.xlu0 %v10453_v0, %s10375_s17 }
  0x50   :  { %1583 = vrot.lane.b32.xlu1 %v10472_v3, %s10376_s18  ;;  %1581 = vrot.lane.b32.xlu0 %v10458_v1, %s10376_s18 }
  0x54   :  { %1585 = vrot.lane.b32.xlu1 %v10467_v2, %s10376_s18  ;;  %1587 = vrot.lane.b32.xlu0 %v10453_v0, %s10376_s18 }
  0x58   :  { %1774 = vrot.lane.b32.xlu1 %v10472_v3, %s12590_s19  ;;  %1772 = vrot.lane.b32.xlu0 %v10458_v1, %s12590_s19 }
  0x5c   :  { %1776 = vrot.lane.b32.xlu1 %v10467_v2, %s12590_s19  ;;  %1778 = vrot.lane.b32.xlu0 %v10453_v0, %s12590_s19 }
  0x60   :  { %1965 = vrot.lane.b32.xlu1 %v10472_v3, %s12587_s20  ;;  %1963 = vrot.lane.b32.xlu0 %v10458_v1, %s12587_s20 }
  0x64   :  { %1967 = vrot.lane.b32.xlu1 %v10467_v2, %s12587_s20  ;;  %1969 = vrot.lane.b32.xlu0 %v10453_v0, %s12587_s20 }
  0x68   :  { %2156 = vrot.lane.b32.xlu1 %v10472_v3, %s12582_s21  ;;  %2154 = vrot.lane.b32.xlu0 %v10458_v1, %s12582_s21 }
  0x6c   :  { %2158 = vrot.lane.b32.xlu1 %v10467_v2, %s12582_s21  ;;  %2160 = vrot.lane.b32.xlu0 %v10453_v0, %s12582_s21 }
  0x70   :  { %2347 = vrot.lane.b32.xlu1 %v10472_v3, %s12580_s22  ;;  %2345 = vrot.lane.b32.xlu0 %v10458_v1, %s12580_s22 }
  0x74   :  { %2349 = vrot.lane.b32.xlu1 %v10467_v2, %s12580_s22  ;;  %2351 = vrot.lane.b32.xlu0 %v10453_v0, %s12580_s22 }
  0x78   :  { %2691 = vrot.lane.b32.xlu1 %v10467_v2, %s12578_s23  ;;  %2689 = vrot.lane.b32.xlu0 %v10472_v3, %s12578_s23 }
  0x7c   :  { %2693 = vrot.lane.b32.xlu1 %v10453_v0, %s12578_s23  ;;  %2687 = vrot.lane.b32.xlu0 %v10458_v1, %s12578_s23 }
  0x80   :  { %2882 = vrot.lane.b32.xlu1 %v10467_v2, %s12576_s24  ;;  %2880 = vrot.lane.b32.xlu0 %v10472_v3, %s12576_s24 }
  0x82   :  { %v109_v11 = vpop.permute.xlu1 %108  ;;  %v103_v12 = vpop.permute.xlu0 %102 }
  0x83   :  { %v10623_v22 = vsel %vm110_vm0, %v109_v11, %v103_v12 }
  0x84   :  { %2884 = vrot.lane.b32.xlu1 %v10453_v0, %s12576_s24  ;;  %2878 = vrot.lane.b32.xlu0 %v10458_v1, %s12576_s24  ;;  %v138_v29 = vmul.f32 %v10613_v17, %v10623_v22 }
  0x86   :  { %v107_v20 = vpop.permute.xlu1 %106  ;;  %v105_v21 = vpop.permute.xlu0 %104 }
  0x87   :  { %v10627_v23 = vsel %vm110_vm0, %v107_v20, %v109_v11  ;;  %v10631_v24 = vsel %vm110_vm0, %v103_v12, %v105_v21  ;;  %v10635_v25 = vsel %vm110_vm0, %v105_v21, %v107_v20  ;;  %v10757_v11 = vrot.slane %v9878_v57, %v10590_v8  ;;  %v9875_v12 = vld [vmem:[%s12493_s2 + $0x10] sm:$0xff] }
  0x88   :  { %3073 = vrot.lane.b32.xlu1 %v10467_v2, %s12574_s29  ;;  %3071 = vrot.lane.b32.xlu0 %v10472_v3, %s12574_s29  ;;  %v141_v26 = vmul.f32 %v10607_v15, %v10627_v23  ;;  %v139_v27 = vmul.f32 %v10610_v16, %v10631_v24  ;;  %v140_v30 = vmul.f32 %v10616_v18, %v10635_v25 }
  0x89   :  { %12639 = vst [vmem:[#allocation16_spill] sm:$0xff] %v10757_v11  ;;  %v10767_v21 = vrot.slane %v9878_v57, %v10594_v10 }
  0x8a   :  { %219 = vmatprep.subr.mxu1 %v141_v26  ;;  %v63_v32 = vpop.permute.xlu1 %62  ;;  %148 = vmatprep.subr.mxu0 %v139_v27  ;;  %v61_v33 = vpop.permute.xlu0 %60  ;;  %v10772_v26 = vrot.slane %v9878_v57, %v10592_v9 }
  0x8b   :  { %v10658_v34 = vsel %vm70_vm1, %v61_v33, %v63_v32  ;;  %149 = vmatpush1.msra.mxu0 %v138_v29  ;;  %220 = vmatpush1.msra.mxu1 %v140_v30  ;;  %12640 = vst [vmem:[#allocation17_spill] sm:$0xff] %v10767_v21  ;;  %v10777_v29 = vrot.slane %v9878_v57, %v10596_v13  ;;  %v9882_v30 = vld [vmem:[%s12492_s1 + $0x10] sm:$0xf] }
  0x8c   :  { %9870 = vmatmul.mubr.msk.f32.vlgmr.msra.gmra.mrb[0].mxu0 %vm144_vm2, %v9869_v31  ;;  %9871 = vmatmul.mubr.msk.f32.vlgmr.msra.gmra.mrb[0].mxu1 %vm144_vm2, %v9869_v31  ;;  %v98_v37 = vmul.f32 %v10647_v28, %v10658_v34  ;;  %12641 = vst [vmem:[#allocation18_spill] sm:$0xff] %v10772_v26  ;;  %v10819_v57 = vrot.slane %v9882_v30, %v10592_v9 }
  0x8d   :  { %3075 = vrot.lane.b32.xlu1 %v10453_v0, %s12574_s29  ;;  %3069 = vrot.lane.b32.xlu0 %v10458_v1, %s12574_s29  ;;  %12642 = vst [vmem:[#allocation19_spill] sm:$0xff] %v10777_v29 }
  0x8e   :  { %v65_v40 = vpop.permute.xlu1 %64  ;;  %v67_v41 = vpop.permute.xlu0 %66  ;;  %293 = vmatprep.subr.mxu0 %v98_v37  ;;  %357 = vmatprep.mubr.f32.mxu0 %v12503_v4  ;;  %12645 = vst [vmem:[#allocation22_spill] sm:$0xff] %v10819_v57 }
  0x8f   :  { %v10683_v42 = vsel %vm70_vm1, %v63_v32, %v65_v40  ;;  %v10687_v43 = vsel %vm70_vm1, %v65_v40, %v67_v41  ;;  %v10691_v44 = vsel %vm70_vm1, %v67_v41, %v61_v33  ;;  %428 = vmatprep.mubr.f32.mxu1 %v12503_v4 }
  0x90   :  { %v99_v45 = vmul.f32 %v10661_v35, %v10683_v42  ;;  %v97_v46 = vmul.f32 %v10666_v36, %v10691_v44  ;;  %v100_v47 = vmul.f32 %v10671_v38, %v10687_v43 }
  0x91   :  { %3264 = vrot.lane.b32.xlu1 %v10467_v2, %s12544_s10  ;;  %3262 = vrot.lane.b32.xlu0 %v10472_v3, %s12544_s10 }
  0x92   :  { %v438_v50 = vpop.permute.xlu1 %437  ;;  %294 = vmatpush1.msra.mxu0 %v97_v46  ;;  %364 = vmatprep.subr.mxu1 %v100_v47  ;;  %v436_v51 = vpop.permute.xlu0 %435  ;;  %v10804_v46 = vrot.slane %v9882_v30, %v10590_v8  ;;  %v9879_v47 = vld [vmem:[%s12493_s2 + $0x18] sm:$0xff] }
  0x93   :  { %v10713_v52 = vsel %vm443_vm3, %v436_v51, %v438_v50  ;;  %365 = vmatpush1.msra.mxu1 %v99_v45 }
  0x94   :  { %9872 = vmatmul.mubr.msk.f32.vlgmr.msra.gmra.mrb[0].mxu0 %vm144_vm2, %v101_v49  ;;  %9873 = vmatmul.mubr.msk.f32.vlgmr.msra.gmra.mrb[0].mxu1 %vm144_vm2, %v101_v49  ;;  %v472_v55 = vmul.f32 %v10702_v48, %v10713_v52  ;;  %12643 = vst [vmem:[#allocation20_spill] sm:$0xff] %v10804_v46 }
  0x95   :  { %3266 = vrot.lane.b32.xlu1 %v10453_v0, %s12544_s10  ;;  %3260 = vrot.lane.b32.xlu0 %v10458_v1, %s12544_s10  ;;  %s10386_s10 = smov 0.0  }
  0x96   :  { %v440_v58 = vpop.permute.xlu1 %439  ;;  %v442_v59 = vpop.permute.xlu0 %441  ;;  %480 = vmatprep.subr.mxu0 %v472_v55  ;;  %544 = vmatprep.mubr.f32.mxu0 %v12503_v4  ;;  %v10814_v55 = vrot.slane %v9882_v30, %v10594_v10 }
  0x97   :  { %v10738_v60 = vsel %vm443_vm3, %v438_v50, %v440_v58  ;;  %v10742_v61 = vsel %vm443_vm3, %v440_v58, %v442_v59  ;;  %v10746_v62 = vsel %vm443_vm3, %v442_v59, %v436_v51  ;;  %615 = vmatprep.mubr.f32.mxu1 %v12503_v4  ;;  %v10824_v59 = vrot.slane %v9882_v30, %v10596_v13 }
  0x98   :  { %v473_v63 = vmul.f32 %v10716_v53, %v10738_v60  ;;  %v471_v5 = vmul.f32 %v10721_v54, %v10746_v62  ;;  %v474_v6 = vmul.f32 %v10726_v56, %v10742_v61  ;;  %12644 = vst [vmem:[#allocation21_spill] sm:$0xff] %v10814_v55 }
  0x99   :  { %12646 = vst [vmem:[#allocation23_spill] sm:$0xff] %v10824_v59 }
  0x9a   :  { %v629_v14 = vpop.permute.xlu1 %628  ;;  %481 = vmatpush1.msra.mxu0 %v471_v5  ;;  %551 = vmatprep.subr.mxu1 %v474_v6  ;;  %v627_v19 = vpop.permute.xlu0 %626 }
  0x9b   :  { %v10764_v20 = vsel %vm634_vm4, %v627_v19, %v629_v14  ;;  %552 = vmatpush1.msra.mxu1 %v473_v63  ;;  %v9886_v63 = vld [vmem:[%s12492_s1 + $0x14] sm:$0xf] }
  0x9c   :  { %9876 = vmatmul.mubr.msk.f32.vlgmr.msra.gmra.mrb[0].mxu0 %vm144_vm2, %v9875_v12  ;;  %9877 = vmatmul.mubr.msk.f32.vlgmr.msra.gmra.mrb[0].mxu1 %vm144_vm2, %v9875_v12  ;;  %v663_v27 = vmul.f32 %v10757_v11, %v10764_v20 }
  0x9d   :  { %735 = vmatprep.mubr.f32.mxu0 %v12503_v4  ;;  %806 = vmatprep.mubr.f32.mxu1 %v12503_v4 }
  0x9e   :  { %v631_v31 = vpop.permute.xlu1 %630  ;;  %v633_v32 = vpop.permute.xlu0 %632  ;;  %671 = vmatprep.subr.mxu0 %v663_v27 }
  0x9f   :  { %v10786_v33 = vsel %vm634_vm4, %v629_v14, %v631_v31  ;;  %v10790_v37 = vsel %vm634_vm4, %v631_v31, %v633_v32  ;;  %v10794_v39 = vsel %vm634_vm4, %v633_v32, %v627_v19  ;;  %v10851_v32 = vrot.slane %v9886_v63, %v10590_v8 }
  0xa0   :  { %v664_v40 = vmul.f32 %v10767_v21, %v10786_v33  ;;  %v662_v41 = vmul.f32 %v10772_v26, %v10794_v39  ;;  %v665_v45 = vmul.f32 %v10777_v29, %v10790_v37 }
  0xa1   :  { %12647 = vst [vmem:[#allocation24_spill] sm:$0xff] %v10851_v32 }
  0xa2   :  { %v820_v49 = vpop.permute.xlu1 %819  ;;  %672 = vmatpush1.msra.mxu0 %v662_v41  ;;  %742 = vmatprep.subr.mxu1 %v665_v45  ;;  %v818_v50 = vpop.permute.xlu0 %817 }
  0xa3   :  { %v10811_v51 = vsel %vm825_vm5, %v818_v50, %v820_v49  ;;  %743 = vmatpush1.msra.mxu1 %v664_v40  ;;  %v9883_v40 = vld [vmem:[%s12493_s2 + $0x20] sm:$0xff] }
  0xa4   :  { %9880 = vmatmul.mubr.msk.f32.vlgmr.msra.gmra.mrb[0].mxu0 %vm144_vm2, %v9879_v47  ;;  %9881 = vmatmul.mubr.msk.f32.vlgmr.msra.gmra.mrb[0].mxu1 %vm144_vm2, %v9879_v47  ;;  %v854_v58 = vmul.f32 %v10804_v46, %v10811_v51 }
  0xa5   :  { %926 = vmatprep.mubr.f32.mxu0 %v12503_v4  ;;  %997 = vmatprep.mubr.f32.mxu1 %v12503_v4 }
  0xa6   :  { %v822_v5 = vpop.permute.xlu1 %821  ;;  %v824_v6 = vpop.permute.xlu0 %823  ;;  %862 = vmatprep.subr.mxu0 %v854_v58 }
  0xa7   :  { %v10833_v12 = vsel %vm825_vm5, %v820_v49, %v822_v5  ;;  %v10837_v14 = vsel %vm825_vm5, %v822_v5, %v824_v6  ;;  %v10841_v19 = vsel %vm825_vm5, %v824_v6, %v818_v50  ;;  %v10861_v49 = vrot.slane %v9886_v63, %v10594_v10  ;;  %v9890_v6 = vld [vmem:[%s12492_s1 + $0x18] sm:$0xf] }
  0xa8   :  { %v855_v27 = vmul.f32 %v10814_v55, %v10833_v12  ;;  %v853_v30 = vmul.f32 %v10819_v57, %v10841_v19  ;;  %v856_v31 = vmul.f32 %v10824_v59, %v10837_v14  ;;  %v10866_v50 = vrot.slane %v9886_v63, %v10592_v9 }
  0xa9   :  { %12648 = vst [vmem:[#allocation25_spill] sm:$0xff] %v10861_v49  ;;  %v10871_v5 = vrot.slane %v9886_v63, %v10596_v13  ;;  %v12655_v59 = vmov 0.0  }
  0xaa   :  { %v1011_v41 = vpop.permute.xlu1 %1010  ;;  %863 = vmatpush1.msra.mxu0 %v853_v30  ;;  %933 = vmatprep.subr.mxu1 %v856_v31  ;;  %v1009_v45 = vpop.permute.xlu0 %1008  ;;  %12649 = vst [vmem:[#allocation26_spill] sm:$0xff] %v10866_v50 }
  0xab   :  { %v10858_v47 = vsel %vm1016_vm6, %v1009_v45, %v1011_v41  ;;  %934 = vmatpush1.msra.mxu1 %v855_v27  ;;  %12650 = vst [vmem:[#allocation27_spill] sm:$0xff] %v10871_v5 }
  0xac   :  { %9884 = vmatmul.mubr.msk.f32.vlgmr.msra.gmra.mrb[0].mxu0 %vm144_vm2, %v9883_v40  ;;  %9885 = vmatmul.mubr.msk.f32.vlgmr.msra.gmra.mrb[0].mxu1 %vm144_vm2, %v9883_v40  ;;  %v1045_v58 = vmul.f32 %v10851_v32, %v10858_v47  ;;  %v10898_v32 = vrot.slane %v9890_v6, %v10590_v8 }
  0xad   :  { %1117 = vmatprep.mubr.f32.mxu0 %v12503_v4  ;;  %1188 = vmatprep.mubr.f32.mxu1 %v12503_v4 }
  0xae   :  { %v1013_v27 = vpop.permute.xlu1 %1012  ;;  %v1015_v30 = vpop.permute.xlu0 %1014  ;;  %1053 = vmatprep.subr.mxu0 %v1045_v58  ;;  %12651 = vst [vmem:[#allocation28_spill] sm:$0xff] %v10898_v32 }
  0xaf   :  { %v10880_v31 = vsel %vm1016_vm6, %v1011_v41, %v1013_v27  ;;  %v10884_v40 = vsel %vm1016_vm6, %v1013_v27, %v1015_v30  ;;  %v10888_v63 = vsel %vm1016_vm6, %v1015_v30, %v1009_v45  ;;  %v9887_v27 = vld [vmem:[%s12493_s2 + $0x28] sm:$0xff] }
  0xb0   :  { %v1046_v4 = vmul.f32 %v10861_v49, %v10880_v31  ;;  %v1044_v58 = vmul.f32 %v10866_v50, %v10888_v63  ;;  %v1047_v41 = vmul.f32 %v10871_v5, %v10884_v40  ;;  %v10908_v50 = vrot.slane %v9890_v6, %v10594_v10 }
  0xb1   :  { %v10913_v5 = vrot.slane %v9890_v6, %v10592_v9 }
  0xb2   :  { %v1202_v45 = vpop.permute.xlu1 %1201  ;;  %1054 = vmatpush1.msra.mxu0 %v1044_v58  ;;  %1124 = vmatprep.subr.mxu1 %v1047_v41  ;;  %v1200_v30 = vpop.permute.xlu0 %1199  ;;  %12652 = vst [vmem:[#allocation29_spill] sm:$0xff] %v10908_v50  ;;  %v10918_v41 = vrot.slane %v9890_v6, %v10596_v13 }
  0xb3   :  { %v10905_v49 = vsel %vm1207_vm7, %v1200_v30, %v1202_v45  ;;  %1125 = vmatpush1.msra.mxu1 %v1046_v4  ;;  %12653 = vst [vmem:[#allocation30_spill] sm:$0xff] %v10913_v5  ;;  %v9894_v4 = vld [vmem:[%s12492_s1 + $0x1c] sm:$0xf] }
  0xb4   :  { %9888 = vmatmul.mubr.msk.f32.vlgmr.msra.gmra.mrb[0].mxu0 %vm144_vm2, %v9887_v27  ;;  %9889 = vmatmul.mubr.msk.f32.vlgmr.msra.gmra.mrb[0].mxu1 %vm144_vm2, %v9887_v27  ;;  %v1236_v58 = vmul.f32 %v10898_v32, %v10905_v49  ;;  %12654 = vst [vmem:[#allocation31_spill] sm:$0xff] %v10918_v41  ;;  %v10945_v29 = vrot.slane %v9894_v4, %v10590_v8 }
  0xb5   :  { %1308 = vmatprep.mubr.f32.mxu0 %v12655_v59  ;;  %1379 = vmatprep.mubr.f32.mxu1 %v12655_v59 }
  0xb6   :  { %v1204_v55 = vpop.permute.xlu1 %1203  ;;  %v1206_v57 = vpop.permute.xlu0 %1205  ;;  %1244 = vmatprep.subr.mxu0 %v1236_v58  ;;  %12656 = vst [vmem:[#allocation32_spill] sm:$0xff] %v10945_v29 }
  0xb7   :  { %v10927_v27 = vsel %vm1207_vm7, %v1202_v45, %v1204_v55  ;;  %v10931_v32 = vsel %vm1207_vm7, %v1204_v55, %v1206_v57  ;;  %v10935_v6 = vsel %vm1207_vm7, %v1206_v57, %v1200_v30  ;;  %v9891_v55 = vld [vmem:[%s12493_s2 + $0x30] sm:$0xff] }
  0xb8   :  { %v1237_v46 = vmul.f32 %v10908_v50, %v10927_v27  ;;  %v1235_v58 = vmul.f32 %v10913_v5, %v10935_v6  ;;  %v1238_v45 = vmul.f32 %v10918_v41, %v10931_v32  ;;  %v10955_v5 = vrot.slane %v9894_v4, %v10594_v10 }
  0xb9   :  { %v10960_v41 = vrot.slane %v9894_v4, %v10592_v9 }
  0xba   :  { %v1393_v57 = vpop.permute.xlu1 %1392  ;;  %1245 = vmatpush1.msra.mxu0 %v1235_v58  ;;  %1315 = vmatprep.subr.mxu1 %v1238_v45  ;;  %v1391_v30 = vpop.permute.xlu0 %1390  ;;  %12657 = vst [vmem:[#allocation33_spill] sm:$0xff] %v10955_v5  ;;  %v10965_v45 = vrot.slane %v9894_v4, %v10596_v13 }
  0xbb   :  { %v10952_v50 = vsel %vm1398_vm8, %v1391_v30, %v1393_v57  ;;  %1316 = vmatpush1.msra.mxu1 %v1237_v46  ;;  %12658 = vst [vmem:[#allocation34_spill] sm:$0xff] %v10960_v41  ;;  %v9898_v46 = vld [vmem:[%s12492_s1 + $0x20] sm:$0xf] }
  0xbc   :  { %9892 = vmatmul.mubr.msk.f32.vlgmr.msra.gmra.mrb[0].mxu0 %vm144_vm2, %v9891_v55  ;;  %9893 = vmatmul.mubr.msk.f32.vlgmr.msra.gmra.mrb[0].mxu1 %vm144_vm2, %v9891_v55  ;;  %v1427_v58 = vmul.f32 %v10945_v29, %v10952_v50  ;;  %12659 = vst [vmem:[#allocation35_spill] sm:$0xff] %v10965_v45  ;;  %v10992_v56 = vrot.slane %v9898_v46, %v10590_v8 }
  0xbd   :  { %1499 = vmatprep.mubr.f32.mxu0 %v12655_v59  ;;  %1570 = vmatprep.mubr.f32.mxu1 %v12655_v59 }
  0xbe   :  { %v1395_v21 = vpop.permute.xlu1 %1394  ;;  %v1397_v26 = vpop.permute.xlu0 %1396  ;;  %1435 = vmatprep.subr.mxu0 %v1427_v58  ;;  %12660 = vst [vmem:[#allocation36_spill] sm:$0xff] %v10992_v56 }
  0xbf   :  { %v10974_v55 = vsel %vm1398_vm8, %v1393_v57, %v1395_v21  ;;  %v10978_v29 = vsel %vm1398_vm8, %v1395_v21, %v1397_v26  ;;  %v10982_v4 = vsel %vm1398_vm8, %v1397_v26, %v1391_v30  ;;  %v9895_v21 = vld [vmem:[%s12493_s2 + $0x38] sm:$0xff] }
  0xc0   :  { %v1428_v11 = vmul.f32 %v10955_v5, %v10974_v55  ;;  %v1426_v58 = vmul.f32 %v10960_v41, %v10982_v4  ;;  %v1429_v57 = vmul.f32 %v10965_v45, %v10978_v29  ;;  %v11002_v41 = vrot.slane %v9898_v46, %v10594_v10 }
  0xc1   :  { %v11007_v45 = vrot.slane %v9898_v46, %v10592_v9 }
  0xc2   :  { %v1584_v26 = vpop.permute.xlu1 %1583  ;;  %1436 = vmatpush1.msra.mxu0 %v1426_v58  ;;  %1506 = vmatprep.subr.mxu1 %v1429_v57  ;;  %v1582_v30 = vpop.permute.xlu0 %1581  ;;  %12661 = vst [vmem:[#allocation37_spill] sm:$0xff] %v11002_v41  ;;  %v11012_v57 = vrot.slane %v9898_v46, %v10596_v13 }
  0xc3   :  { %v10999_v5 = vsel %vm1589_vm9, %v1582_v30, %v1584_v26  ;;  %1507 = vmatpush1.msra.mxu1 %v1428_v11  ;;  %12662 = vst [vmem:[#allocation38_spill] sm:$0xff] %v11007_v45  ;;  %v9902_v11 = vld [vmem:[%s12492_s1 + $0x24] sm:$0xf] }
  0xc4   :  { %9896 = vmatmul.mubr.msk.f32.vlgmr.msra.gmra.mrb[0].mxu0 %vm144_vm2, %v9895_v21  ;;  %9897 = vmatmul.mubr.msk.f32.vlgmr.msra.gmra.mrb[0].mxu1 %vm144_vm2, %v9895_v21  ;;  %v1618_v58 = vmul.f32 %v10992_v56, %v10999_v5  ;;  %12663 = vst [vmem:[#allocation39_spill] sm:$0xff] %v11012_v57  ;;  %v11039_v38 = vrot.slane %v9902_v11, %v10590_v8 }
  0xc5   :  { %1690 = vmatprep.mubr.f32.mxu0 %v12655_v59  ;;  %1761 = vmatprep.mubr.f32.mxu1 %v12655_v59 }
  0xc6   :  { %v1586_v53 = vpop.permute.xlu1 %1585  ;;  %v1588_v54 = vpop.permute.xlu0 %1587  ;;  %1626 = vmatprep.subr.mxu0 %v1618_v58  ;;  %12664 = vst [vmem:[#allocation40_spill] sm:$0xff] %v11039_v38 }
  0xc7   :  { %v11021_v21 = vsel %vm1589_vm9, %v1584_v26, %v1586_v53  ;;  %v11025_v56 = vsel %vm1589_vm9, %v1586_v53, %v1588_v54  ;;  %v11029_v46 = vsel %vm1589_vm9, %v1588_v54, %v1582_v30  ;;  %v9899_v53 = vld [vmem:[%s12493_s2 + $0x40] sm:$0xff] }
  0xc8   :  { %v1619_v48 = vmul.f32 %v11002_v41, %v11021_v21  ;;  %v1617_v58 = vmul.f32 %v11007_v45, %v11029_v46  ;;  %v1620_v26 = vmul.f32 %v11012_v57, %v11025_v56  ;;  %v11047_v45 = vrot.slane %v9902_v11, %v10594_v10 }
  0xc9   :  { %v11052_v57 = vrot.slane %v9902_v11, %v10592_v9 }
  0xca   :  { %v1775_v54 = vpop.permute.xlu1 %1774  ;;  %1627 = vmatpush1.msra.mxu0 %v1617_v58  ;;  %1697 = vmatprep.subr.mxu1 %v1620_v26  ;;  %v1773_v30 = vpop.permute.xlu0 %1772  ;;  %12665 = vst [vmem:[#allocation41_spill] sm:$0xff] %v11047_v45  ;;  %v11056_v58 = vrot.slane %v9902_v11, %v10596_v13 }
  0xcb   :  { %v1783_v41 = vsel %vm1780_vm10, %v1773_v30, %v1775_v54  ;;  %1698 = vmatpush1.msra.mxu1 %v1619_v48  ;;  %12666 = vst [vmem:[#allocation42_spill] sm:$0xff] %v11052_v57  ;;  %v9906_v48 = vld [vmem:[%s12492_s1 + $0x28] sm:$0xf] }
  0xcc   :  { %9900 = vmatmul.mubr.msk.f32.vlgmr.msra.gmra.mrb[0].mxu0 %vm144_vm2, %v9899_v53  ;;  %9901 = vmatmul.mubr.msk.f32.vlgmr.msra.gmra.mrb[0].mxu1 %vm144_vm2, %v9899_v53  ;;  %v1809_v35 = vmul.f32 %v11039_v38, %v1783_v41  ;;  %12667 = vst [vmem:[#allocation43_spill] sm:$0xff] %v11056_v58  ;;  %v11074_v18 = vrot.slane %v9906_v48, %v10590_v8 }
  0xcd   :  { %1881 = vmatprep.mubr.f32.mxu0 %v12655_v59  ;;  %1952 = vmatprep.mubr.f32.mxu1 %v12655_v59 }
  0xce   :  { %v1777_v26 = vpop.permute.xlu1 %1776  ;;  %v1779_v36 = vpop.permute.xlu0 %1778  ;;  %1817 = vmatprep.subr.mxu0 %v1809_v35  ;;  %12668 = vst [vmem:[#allocation44_spill] sm:$0xff] %v11074_v18  ;;  %v9903_v35 = vld [vmem:[%s12493_s2 + $0x48] sm:$0xff] }
  0xcf   :  { %v1782_v53 = vsel %vm1780_vm10, %v1775_v54, %v1777_v26  ;;  %v1781_v41 = vsel %vm1780_vm10, %v1777_v26, %v1779_v36  ;;  %v1784_v11 = vsel %vm1780_vm10, %v1779_v36, %v1773_v30  ;;  %v11082_v30 = vrot.slane %v9906_v48, %v10594_v10 }
  0xd0   :  { %v1810_v38 = vmul.f32 %v11047_v45, %v1782_v53  ;;  %v1808_v28 = vmul.f32 %v11052_v57, %v1784_v11  ;;  %v1811_v15 = vmul.f32 %v11056_v58, %v1781_v41  ;;  %v11087_v53 = vrot.slane %v9906_v48, %v10592_v9 }
  0xd1   :  { %12669 = vst [vmem:[#allocation45_spill] sm:$0xff] %v11082_v30 }
  0xd2   :  { %v1966_v54 = vpop.permute.xlu1 %1965  ;;  %1818 = vmatpush1.msra.mxu0 %v1808_v28  ;;  %1888 = vmatprep.subr.mxu1 %v1811_v15  ;;  %v1964_v26 = vpop.permute.xlu0 %1963  ;;  %12670 = vst [vmem:[#allocation46_spill] sm:$0xff] %v11087_v53  ;;  %v11091_v28 = vrot.slane %v9906_v48, %v10596_v13  ;;  %v9910_v15 = vld [vmem:[%s12492_s1 + $0x2c] sm:$0xf] }
  0xd3   :  { %v1974_v36 = vsel %vm1971_vm11, %v1964_v26, %v1966_v54  ;;  %1889 = vmatpush1.msra.mxu1 %v1810_v38  ;;  %v11109_v57 = vrot.slane %v9910_v15, %v10590_v8 }
  0xd4   :  { %9904 = vmatmul.mubr.msk.f32.vlgmr.msra.gmra.mrb[0].mxu0 %vm144_vm2, %v9903_v35  ;;  %9905 = vmatmul.mubr.msk.f32.vlgmr.msra.gmra.mrb[0].mxu1 %vm144_vm2, %v9903_v35  ;;  %v2000_v41 = vmul.f32 %v11074_v18, %v1974_v36  ;;  %12671 = vst [vmem:[#allocation47_spill] sm:$0xff] %v11091_v28 }
  0xd5   :  { %2072 = vmatprep.mubr.f32.mxu0 %v12655_v59  ;;  %2143 = vmatprep.mubr.f32.mxu1 %v12655_v59  ;;  %12672 = vst [vmem:[#allocation48_spill] sm:$0xff] %v11109_v57 }
  0xd6   :  { %v1968_v38 = vpop.permute.xlu1 %1967  ;;  %v1970_v11 = vpop.permute.xlu0 %1969  ;;  %2008 = vmatprep.subr.mxu0 %v2000_v41 }
  0xd7   :  { %v1973_v35 = vsel %vm1971_vm11, %v1966_v54, %v1968_v38  ;;  %v1972_v36 = vsel %vm1971_vm11, %v1968_v38, %v1970_v11  ;;  %v1975_v48 = vsel %vm1971_vm11, %v1970_v11, %v1964_v26  ;;  %v9907_v54 = vld [vmem:[%s12493_s2 + $0x50] sm:$0xff]  ;;  %v11117_v11 = vrot.slane %v9910_v15, %v10594_v10 }
  0xd8   :  { %v2001_v18 = vmul.f32 %v11082_v30, %v1973_v35  ;;  %v1999_v58 = vmul.f32 %v11087_v53, %v1975_v48  ;;  %v2002_v45 = vmul.f32 %v11091_v28, %v1972_v36  ;;  %v11122_v35 = vrot.slane %v9910_v15, %v10592_v9 }
  0xd9   :  { %12673 = vst [vmem:[#allocation49_spill] sm:$0xff] %v11117_v11  ;;  %v10385_v28 = vmov 0  }
  0xda   :  { %v2157_v41 = vpop.permute.xlu1 %2156  ;;  %2009 = vmatpush1.msra.mxu0 %v1999_v58  ;;  %2079 = vmatprep.subr.mxu1 %v2002_v45  ;;  %v2155_v38 = vpop.permute.xlu0 %2154  ;;  %v11126_v58 = vrot.slane %v9910_v15, %v10596_v13  ;;  %v57_v45 = vld [vmem:[%s12494_s3] sm:$0xff] }
  0xdb   :  { %v2165_v26 = vsel %vm12595_vm12, %v2155_v38, %v2157_v41  ;;  %2080 = vmatpush1.msra.mxu1 %v2001_v18  ;;  %v9914_v18 = vld [vmem:[%s12492_s1 + $0x30] sm:$0xf]  ;;  %10330 = vset.pattern.permute.xlu0 %v10385_v28 }
  0xdc   :  { %9908 = vmatmul.mubr.msk.f32.vlgmr.msra.gmra.mrb[0].mxu0 %vm144_vm2, %v9907_v54  ;;  %9909 = vmatmul.mubr.msk.f32.vlgmr.msra.gmra.mrb[0].mxu1 %vm144_vm2, %v9907_v54  ;;  %v2191_v36 = vmul.f32 %v11109_v57, %v2165_v26  ;;  %12674 = vst [vmem:[#allocation50_spill] sm:$0xff] %v11126_v58  ;;  %v11147_v17 = vrot.slane %v9914_v18, %v10590_v8 }
  0xdd   :  { %2263 = vmatprep.mubr.f32.mxu0 %v12655_v59  ;;  %2334 = vmatprep.mubr.f32.mxu1 %v12655_v59 }
  0xde   :  { %v2159_v48 = vpop.permute.xlu1 %2158  ;;  %v2161_v54 = vpop.permute.xlu0 %2160  ;;  %2199 = vmatprep.subr.mxu0 %v2191_v36  ;;  %5055 = vperm.xlu0 %10330, %v57_v45   ;;  %12675 = vst [vmem:[#allocation51_spill] sm:$0xff] %v11147_v17  ;;  %v11155_v45 = vrot.slane %v9914_v18, %v10594_v10 }
  0xdf   :  { %v2164_v15 = vsel %vm12595_vm12, %v2157_v41, %v2159_v48  ;;  %v2163_v26 = vsel %vm12595_vm12, %v2159_v48, %v2161_v54  ;;  %v2166_v57 = vsel %vm12595_vm12, %v2161_v54, %v2155_v38  ;;  %10331 = vset.pattern.permute.xlu1 %v10385_v28  ;;  %v9911_v41 = vld [vmem:[%s12493_s2 + $0x58] sm:$0xff] }
  0xe0   :  { %v2192_v30 = vmul.f32 %v11117_v11, %v2164_v15  ;;  %v2190_v53 = vmul.f32 %v11122_v35, %v2166_v57  ;;  %v2193_v36 = vmul.f32 %v11126_v58, %v2163_v26  ;;  %v11160_v57 = vrot.slane %v9914_v18, %v10592_v9 }
  0xe2   :  { %v2348_v48 = vpop.permute.xlu1 %2347  ;;  %2200 = vmatpush1.msra.mxu0 %v2190_v53  ;;  %2270 = vmatprep.subr.mxu1 %v2193_v36  ;;  %v2346_v38 = vpop.permute.xlu0 %2345  ;;  %v11164_v53 = vrot.slane %v9914_v18, %v10596_v13 }
  0xe3   :  { %v2356_v28 = vsel %vm12594_vm13, %v2346_v38, %v2348_v48  ;;  %2271 = vmatpush1.msra.mxu1 %v2192_v30  ;;  %v9921_v30 = vld [vmem:[%s12492_s1 + $0x38] sm:$0xf] }
  0xe4   :  { %9912 = vmatmul.mubr.msk.f32.vlgmr.msra.gmra.mrb[0].mxu0 %vm144_vm2, %v9911_v41  ;;  %9913 = vmatmul.mubr.msk.f32.vlgmr.msra.gmra.mrb[0].mxu1 %vm144_vm2, %v9911_v41  ;;  %v2382_v54 = vmul.f32 %v11147_v17, %v2356_v28  ;;  %v11182_v11 = vrot.slane %v9921_v30, %v10590_v8 }
  0xe5   :  { %2454 = vmatprep.mubr.f32.mxu0 %v12655_v59  ;;  %2525 = vmatprep.mubr.f32.mxu1 %v12655_v59 }
  0xe6   :  { %v2350_v15 = vpop.permute.xlu1 %2349  ;;  %v2352_v26 = vpop.permute.xlu0 %2351  ;;  %2390 = vmatprep.subr.mxu0 %v2382_v54  ;;  %12676 = vst [vmem:[#allocation52_spill] sm:$0xff] %v11182_v11 }
  0xe7   :  { %v2355_v36 = vsel %vm12594_vm13, %v2348_v48, %v2350_v15  ;;  %v2354_v41 = vsel %vm12594_vm13, %v2350_v15, %v2352_v26  ;;  %v2357_v18 = vsel %vm12594_vm13, %v2352_v26, %v2346_v38  ;;  %v9915_v48 = vld [vmem:[%s12493_s2 + $0x60] sm:$0xff] }
  0xe8   :  { %v2383_v28 = vmul.f32 %v11155_v45, %v2355_v36  ;;  %v2381_v17 = vmul.f32 %v11160_v57, %v2357_v18  ;;  %v2384_v58 = vmul.f32 %v11164_v53, %v2354_v41  ;;  %v11194_v36 = vrot.slane %v9921_v30, %v10596_v13 }
  0xea   :  { %2391 = vmatpush1.msra.mxu0 %v2381_v17  ;;  %2461 = vmatprep.subr.mxu1 %v2384_v58  ;;  %v2692_v54 = vpop.permute.xlu1 %2691  ;;  %v2690_v15 = vpop.permute.xlu0 %2689  ;;  %12677 = vst [vmem:[#allocation53_spill] sm:$0xff] %v11194_v36  ;;  %v11197_v17 = vrot.slane %v9921_v30, %v10594_v10  ;;  %v11200_v58 = vrot.slane %v9921_v30, %v10592_v9 }
  0xeb   :  { %2462 = vmatpush1.msra.mxu1 %v2383_v28  ;;  %v2697_v38 = vsel %vm12556_vm14, %v2690_v15, %v2692_v54  ;;  %2541 = vmatprep.subr.mxu0 %v10472_v3  ;;  %v9925_v3 = vld [vmem:[%s12492_s1 + $0x3c] sm:$0xf] }
  0xec   :  { %9916 = vmatmul.mubr.msk.f32.vlgmr.msra.gmra.mrb[0].mxu0 %vm144_vm2, %v9915_v48  ;;  %9917 = vmatmul.mubr.msk.f32.vlgmr.msra.gmra.mrb[0].mxu1 %vm144_vm2, %v9915_v48  ;;  %v2724_v26 = vmul.f32 %v11182_v11, %v2697_v38  ;;  %12678 = vst [vmem:[#allocation54_spill] sm:$0xff] %v11197_v17  ;;  %12679 = vst [vmem:[#allocation55_spill] sm:$0xff] %v11200_v58  ;;  %v11219_v48 = vrot.slane %v9925_v3, %v10590_v8 }
  0xed   :  { %2612 = vmatprep.subr.mxu1 %v10453_v0  ;;  %2542 = vmatpush1.msra.mxu0 %v10458_v1 }
  0xee   :  { %v2694_v41 = vpop.permute.xlu1 %2693  ;;  %v2688_v18 = vpop.permute.xlu0 %2687  ;;  %2605 = vmatprep.mubr.f32.mxu0 %v12655_v59  ;;  %2613 = vmatpush1.msra.mxu1 %v10467_v2  ;;  %12680 = vst [vmem:[#allocation56_spill] sm:$0xff] %v11219_v48 }
  0xef   :  { %v2696_v28 = vsel %vm12556_vm14, %v2692_v54, %v2694_v41  ;;  %v2698_v30 = vsel %vm12556_vm14, %v2688_v18, %v2690_v15  ;;  %v2699_v0 = vsel %vm12556_vm14, %v2694_v41, %v2688_v18  ;;  %2676 = vmatprep.mubr.f32.mxu1 %v12655_v59  ;;  %2732 = vmatprep.subr.mxu0 %v2724_v26  ;;  %v9918_v15 = vld [vmem:[%s12493_s2 + $0x68] sm:$0xff]  ;;  %vm12589_vm14 = vcmp.lt.s32.totalorder %v10584_v7, 120 }
  0xf0   :  { %v2726_v1 = vmul.f32 %v11194_v36, %v2699_v0  ;;  %v2725_v2 = vmul.f32 %v11197_v17, %v2696_v28  ;;  %v2723_v54 = vmul.f32 %v11200_v58, %v2698_v30  ;;  %v11232_v28 = vrot.slane %v9925_v3, %v10596_v13 }
  0xf1   :  { %v11235_v30 = vrot.slane %v9925_v3, %v10594_v10  ;;  %v11238_v0 = vrot.slane %v9925_v3, %v10592_v9 }
  0xf2   :  { %v2883_v38 = vpop.permute.xlu1 %2882  ;;  %v2881_v41 = vpop.permute.xlu0 %2880  ;;  %2803 = vmatprep.subr.mxu1 %v2726_v1  ;;  %12681 = vst [vmem:[#allocation57_spill] sm:$0xff] %v11232_v28  ;;  %v9929_v1 = vld [vmem:[%s12492_s1 + $0x40] sm:$0xf] }
  0xf3   :  { %v2888_v26 = vsel %vm12560_vm15, %v2881_v41, %v2883_v38  ;;  %12682 = vst [vmem:[#allocation58_spill] sm:$0xff] %v11235_v30  ;;  %12683 = vst [vmem:[#allocation59_spill] sm:$0xff] %v11238_v0 }
  0xf4   :  { %9919 = vmatmul.mubr.msk.f32.vlgmr.msra.gmra.mrb[0].mxu0 %vm144_vm2, %v9918_v15  ;;  %9920 = vmatmul.mubr.msk.f32.vlgmr.msra.gmra.mrb[0].mxu1 %vm144_vm2, %v9918_v15  ;;  %v2915_v18 = vmul.f32 %v11219_v48, %v2888_v26  ;;  %v11254_v26 = vrot.slane %v9929_v1, %v10590_v8 }
  0xf5   :  { %2733 = vmatpush1.msra.mxu0 %v2723_v54  ;;  %2804 = vmatpush1.msra.mxu1 %v2725_v2 }
  0xf6   :  { %v2885_v17 = vpop.permute.xlu1 %2884  ;;  %v2879_v36 = vpop.permute.xlu0 %2878  ;;  %2796 = vmatprep.mubr.f32.mxu0 %v12655_v59  ;;  %2867 = vmatprep.mubr.f32.mxu1 %v12655_v59  ;;  %12684 = vst [vmem:[#allocation60_spill] sm:$0xff] %v11254_v26 }
  0xf7   :  { %v2887_v15 = vsel %vm12560_vm15, %v2883_v38, %v2885_v17  ;;  %v2889_v54 = vsel %vm12560_vm15, %v2879_v36, %v2881_v41  ;;  %v2890_v3 = vsel %vm12560_vm15, %v2885_v17, %v2879_v36  ;;  %2923 = vmatprep.subr.mxu0 %v2915_v18  ;;  %v9922_v38 = vld [vmem:[%s12493_s2 + $0x70] sm:$0xff]  ;;  %v11267_v18 = vrot.slane %v9929_v1, %v10594_v10 }
  0xf8   :  { %v2917_v2 = vmul.f32 %v11232_v28, %v2890_v3  ;;  %v2916_v48 = vmul.f32 %v11235_v30, %v2887_v15  ;;  %v2914_v58 = vmul.f32 %v11238_v0, %v2889_v54  ;;  %v11270_v15 = vrot.slane %v9929_v1, %v10592_v9  ;;  %v9933_v3 = vld [vmem:[%s12492_s1 + $0x44] sm:$0xf] }
  0xf9   :  { %12685 = vst [vmem:[#allocation61_spill] sm:$0xff] %v11267_v18  ;;  %v11273_v54 = vrot.slane %v9929_v1, %v10596_v13  ;;  %vm12569_vm15 = vcmp.lt.s32.totalorder %v10584_v7, 119  ;;  %v11290_v30 = vrot.slane %v9933_v3, %v10590_v8  ;;  %v9930_v0 = vld [vmem:[%s12493_s2 + $0x80] sm:$0xff] }
  0xfa   :  { %v3074_v41 = vpop.permute.xlu1 %3073  ;;  %v3072_v11 = vpop.permute.xlu0 %3071  ;;  %2994 = vmatprep.subr.mxu1 %v2917_v2  ;;  %12686 = vst [vmem:[#allocation62_spill] sm:$0xff] %v11270_v15 }
  0xfb   :  { %v3079_v36 = vsel %vm12589_vm14, %v3072_v11, %v3074_v41  ;;  %12687 = vst [vmem:[#allocation63_spill] sm:$0xff] %v11273_v54  ;;  %12688 = vst [vmem:[#allocation64_spill] sm:$0xff] %v11290_v30 }
  0xfc   :  { %9923 = vmatmul.mubr.msk.f32.vlgmr.msra.gmra.mrb[0].mxu0 %vm144_vm2, %v9922_v38  ;;  %9924 = vmatmul.mubr.msk.f32.vlgmr.msra.gmra.mrb[0].mxu1 %vm144_vm2, %v9922_v38  ;;  %v3106_v17 = vmul.f32 %v11254_v26, %v3079_v36 }
  0xfd   :  { %2924 = vmatpush1.msra.mxu0 %v2914_v58  ;;  %2995 = vmatpush1.msra.mxu1 %v2916_v48 }
  0xfe   :  { %2987 = vmatprep.mubr.f32.mxu0 %v12655_v59  ;;  %3058 = vmatprep.mubr.f32.mxu1 %v12655_v59 }
  0xff   :  { %v3076_v2 = vpop.permute.xlu1 %3075  ;;  %v3070_v38 = vpop.permute.xlu0 %3069  ;;  %3114 = vmatprep.subr.mxu0 %v3106_v17  ;;  %v9926_v17 = vld [vmem:[%s12493_s2 + $0x78] sm:$0xff] }
 0x100   :  { %v3078_v58 = vsel %vm12589_vm14, %v3074_v41, %v3076_v2  ;;  %v3080_v48 = vsel %vm12589_vm14, %v3070_v38, %v3072_v11  ;;  %v3081_v1 = vsel %vm12589_vm14, %v3076_v2, %v3070_v38  ;;  %v11301_v38 = vrot.slane %v9933_v3, %v10594_v10 }
 0x101   :  { %v3107_v36 = vmul.f32 %v11267_v18, %v3078_v58  ;;  %v3105_v26 = vmul.f32 %v11270_v15, %v3080_v48  ;;  %v3108_v41 = vmul.f32 %v11273_v54, %v3081_v1  ;;  %v11305_v48 = vrot.slane %v9933_v3, %v10592_v9 }
 0x102   :  { %v11308_v1 = vrot.slane %v9933_v3, %v10596_v13  ;;  %vm12592_vm14 = vcmask 1045504  }
 0x103   :  { %v3265_v28 = vpop.permute.xlu1 %3264  ;;  %v3263_v11 = vpop.permute.xlu0 %3262  ;;  %3185 = vmatprep.subr.mxu1 %v3108_v41  ;;  %v9937_v41 = vld [vmem:[%s12492_s1 + $0x48] sm:$0xf] }
 0x104   :  { %v3270_v2 = vsel %vm12569_vm15, %v3263_v11, %v3265_v28  ;;  %9927 = vmatmul.mubr.msk.f32.vlgmr.msra.gmra.mrb[0].mxu0 %vm144_vm2, %v9926_v17  ;;  %9928 = vmatmul.mubr.msk.f32.vlgmr.msra.gmra.mrb[0].mxu1 %vm144_vm2, %v9926_v17 }
 0x105   :  { %v3297_v58 = vmul.f32 %v11290_v30, %v3270_v2  ;;  %3115 = vmatpush1.msra.mxu0 %v3105_v26  ;;  %3186 = vmatpush1.msra.mxu1 %v3107_v36  ;;  %v11316_v26 = vrot.slane %v9937_v41, %v10590_v8  ;;  %v11325_v30 = vrot.slane %v9937_v41, %v10596_v13 }
 0x106   :  { %3178 = vmatprep.mubr.f32.mxu0 %v12655_v59  ;;  %3249 = vmatprep.mubr.f32.mxu1 %v12655_v59 }
 0x107   :  { %v3267_v17 = vpop.permute.xlu1 %3266  ;;  %v3261_v18 = vpop.permute.xlu0 %3260  ;;  %3305 = vmatprep.subr.mxu0 %v3297_v58 }
 0x108   :  { %v3269_v2 = vsel %vm12569_vm15, %v3265_v28, %v3267_v17  ;;  %v3271_v3 = vsel %vm12569_vm15, %v3261_v18, %v3263_v11  ;;  %v3272_v36 = vsel %vm12569_vm15, %v3267_v17, %v3261_v18  ;;  %v3475_v28 = vmul.f32 %v11316_v26, %v10683_v42  ;;  %v9941_v11 = vld [vmem:[%s12492_s1 + $0x4c] sm:$0xf] }
 0x109   :  { %v3298_v54 = vmul.f32 %v11301_v38, %v3269_v2  ;;  %v3296_v15 = vmul.f32 %v11305_v48, %v3271_v3  ;;  %v3299_v58 = vmul.f32 %v11308_v1, %v3272_v36  ;;  %v3477_v18 = vmul.f32 %v11325_v30, %v10691_v44 }
 0x10a   :  { %v11343_v17 = vrot.slane %v9937_v41, %v10592_v9  ;;  %v11346_v2 = vrot.slane %v9937_v41, %v10594_v10  ;;  %v11351_v42 = vrot.slane %v9941_v11, %v10596_v13  ;;  %v11354_v44 = vrot.slane %v9941_v11, %v10590_v8 }
 0x10b   :  { %3376 = vmatprep.subr.mxu1 %v3299_v58  ;;  %v11370_v36 = vrot.slane %v9941_v11, %v10594_v10  ;;  %v9938_v58 = vld [vmem:[%s12493_s2 + $0x90] sm:$0xff]  ;;  %vm12584_vm15 = vcmask 1024  }
 0x10c   :  { %9931 = vmatmul.mubr.msk.f32.vlgmr.msra.gmra.mrb[0].mxu0 %vm144_vm2, %v9930_v0  ;;  %9932 = vmatmul.mubr.msk.f32.vlgmr.msra.gmra.mrb[0].mxu1 %vm144_vm2, %v9930_v0  ;;  %v9934_v0 = vld [vmem:[%s12493_s2 + $0x88] sm:$0xff]  ;;  %v3655_v41 = vmul.f32 %v11351_v42, %v10623_v22  ;;  %v3653_v3 = vmul.f32 %v11354_v44, %v10635_v25  ;;  %v9945_v22 = vld [vmem:[%s12492_s1 + $0x50] sm:$0xf] }
 0x10d   :  { %3306 = vmatpush1.msra.mxu0 %v3296_v15  ;;  %3377 = vmatpush1.msra.mxu1 %v3298_v54  ;;  %v3474_v15 = vmul.f32 %v11343_v17, %v10658_v34  ;;  %v3476_v54 = vmul.f32 %v11346_v2, %v10687_v43  ;;  %v11373_v34 = vrot.slane %v9941_v11, %v10592_v9 }
 0x10e   :  { %3483 = vmatprep.subr.mxu0 %v3475_v28  ;;  %3554 = vmatprep.subr.mxu1 %v3477_v18  ;;  %v11381_v25 = vrot.slane %v9945_v22, %v10590_v8  ;;  %v11384_v43 = vrot.slane %v9945_v22, %v10596_v13  ;;  %v3654_v28 = vmul.f32 %v11370_v36, %v10627_v23 }
 0x10f   :  { %3369 = vmatprep.mubr.f32.mxu0 %v12655_v59  ;;  %3440 = vmatprep.mubr.f32.mxu1 %v12655_v59  ;;  %v3652_v18 = vmul.f32 %v11373_v34, %v10631_v24  ;;  %v11403_v23 = vrot.slane %v9945_v22, %v10594_v10  ;;  %v9949_v24 = vld [vmem:[%s12492_s1 + $0x54] sm:$0xf] }
 0x110   :  { %v3831_v11 = vmul.f32 %v11381_v25, %v10738_v60  ;;  %v11411_v60 = vrot.slane %v9949_v24, %v10590_v8 }
 0x114   :  { %9935 = vmatmul.mubr.msk.f32.vlgmr.msra.gmra.mrb[0].mxu0 %vm144_vm2, %v9934_v0  ;;  %9936 = vmatmul.mubr.msk.f32.vlgmr.msra.gmra.mrb[0].mxu1 %vm144_vm2, %v9934_v0  ;;  %v3833_v0 = vmul.f32 %v11384_v43, %v10746_v62  ;;  %v11414_v62 = vrot.slane %v9949_v24, %v10596_v13 }
 0x115   :  { %3484 = vmatpush1.msra.mxu0 %v3474_v15  ;;  %3555 = vmatpush1.msra.mxu1 %v3476_v54  ;;  %v11400_v15 = vrot.slane %v9945_v22, %v10592_v9  ;;  %v9942_v54 = vld [vmem:[%s12493_s2 + $0x98] sm:$0xff]  ;;  %v4009_v22 = vmul.f32 %v11411_v60, %v10786_v33 }
 0x116   :  { %3661 = vmatprep.subr.mxu0 %v3653_v3  ;;  %3732 = vmatprep.subr.mxu1 %v3655_v41  ;;  %v3832_v3 = vmul.f32 %v11403_v23, %v10742_v61  ;;  %v9953_v61 = vld [vmem:[%s12492_s1 + $0x58] sm:$0xf] }
 0x117   :  { %3547 = vmatprep.mubr.f32.mxu0 %v12655_v59  ;;  %3618 = vmatprep.mubr.f32.mxu1 %v12655_v59  ;;  %v3830_v41 = vmul.f32 %v11400_v15, %v10713_v52  ;;  %v11433_v52 = vrot.slane %v9949_v24, %v10594_v10  ;;  %v11441_v33 = vrot.slane %v9953_v61, %v10590_v8 }
 0x11c   :  { %9939 = vmatmul.mubr.msk.f32.vlgmr.msra.gmra.mrb[0].mxu0 %vm144_vm2, %v9938_v58  ;;  %9940 = vmatmul.mubr.msk.f32.vlgmr.msra.gmra.mrb[0].mxu1 %vm144_vm2, %v9938_v58  ;;  %v4011_v58 = vmul.f32 %v11414_v62, %v10794_v39  ;;  %v11444_v39 = vrot.slane %v9953_v61, %v10596_v13 }
 0x11d   :  { %3662 = vmatpush1.msra.mxu0 %v3652_v18  ;;  %3733 = vmatpush1.msra.mxu1 %v3654_v28  ;;  %v11430_v28 = vrot.slane %v9949_v24, %v10592_v9  ;;  %v9946_v18 = vld [vmem:[%s12493_s2 + $0xa0] sm:$0xff]  ;;  %v4187_v24 = vmul.f32 %v11441_v33, %v10833_v12 }
 0x11e   :  { %3839 = vmatprep.subr.mxu0 %v3831_v11  ;;  %3910 = vmatprep.subr.mxu1 %v3833_v0  ;;  %v4010_v0 = vmul.f32 %v11433_v52, %v10790_v37  ;;  %v9957_v37 = vld [vmem:[%s12492_s1 + $0x5c] sm:$0xf] }
 0x11f   :  { %3725 = vmatprep.mubr.f32.mxu0 %v12655_v59  ;;  %3796 = vmatprep.mubr.f32.mxu1 %v12655_v59  ;;  %v4008_v11 = vmul.f32 %v11430_v28, %v10764_v20  ;;  %v11463_v20 = vrot.slane %v9953_v61, %v10594_v10  ;;  %v11471_v12 = vrot.slane %v9957_v37, %v10590_v8 }
 0x121   :  { %12690 = vst [vmem:[#allocation66_spill] sm:$0xff] %v11463_v20  ;;  %12691 = vst [vmem:[#allocation67_spill] sm:$0xff] %v11471_v12 }
 0x124   :  { %9943 = vmatmul.mubr.msk.f32.vlgmr.msra.gmra.mrb[0].mxu0 %vm144_vm2, %v9942_v54  ;;  %9944 = vmatmul.mubr.msk.f32.vlgmr.msra.gmra.mrb[0].mxu1 %vm144_vm2, %v9942_v54  ;;  %v4189_v54 = vmul.f32 %v11444_v39, %v10841_v19  ;;  %v11474_v19 = vrot.slane %v9957_v37, %v10596_v13 }
 0x125   :  { %3840 = vmatpush1.msra.mxu0 %v3830_v41  ;;  %3911 = vmatpush1.msra.mxu1 %v3832_v3  ;;  %v11460_v41 = vrot.slane %v9953_v61, %v10592_v9  ;;  %v9950_v3 = vld [vmem:[%s12493_s2 + $0xa8] sm:$0xff]  ;;  %v4365_v61 = vmul.f32 %v11471_v12, %v10880_v31 }
 0x126   :  { %4017 = vmatprep.subr.mxu0 %v4009_v22  ;;  %4088 = vmatprep.subr.mxu1 %v4011_v58  ;;  %12692 = vst [vmem:[#allocation68_spill] sm:$0xff] %v11474_v19  ;;  %v4188_v58 = vmul.f32 %v11463_v20, %v10837_v14  ;;  %v9961_v14 = vld [vmem:[%s12492_s1 + $0x60] sm:$0xf] }
 0x127   :  { %3903 = vmatprep.mubr.f32.mxu0 %v12655_v59  ;;  %3974 = vmatprep.mubr.f32.mxu1 %v12655_v59  ;;  %12689 = vst [vmem:[#allocation65_spill] sm:$0xff] %v11460_v41  ;;  %v4186_v22 = vmul.f32 %v11460_v41, %v10811_v51  ;;  %v11493_v51 = vrot.slane %v9957_v37, %v10594_v10  ;;  %v9984_v20 = vld [vmem:[%s12497_s6 + $0x20] sm:$0xff]  ;;  %v9987_v41 = vld [vmem:[%s12497_s6 + $0x28] sm:$0xff] }
 0x128   :  { %v11501_v31 = vrot.slane %v9961_v14, %v10590_v8 }
 0x129   :  { %12694 = vst [vmem:[#allocation70_spill] sm:$0xff] %v11493_v51 }
 0x12a   :  { %12695 = vst [vmem:[#allocation71_spill] sm:$0xff] %v11501_v31 }
 0x12c   :  { %9947 = vmatmul.mubr.msk.f32.vlgmr.msra.gmra.mrb[0].mxu0 %vm144_vm2, %v9946_v18  ;;  %9948 = vmatmul.mubr.msk.f32.vlgmr.msra.gmra.mrb[0].mxu1 %vm144_vm2, %v9946_v18  ;;  %v4367_v18 = vmul.f32 %v11474_v19, %v10888_v63  ;;  %v11504_v63 = vrot.slane %v9961_v14, %v10596_v13 }
 0x12d   :  { %4018 = vmatpush1.msra.mxu0 %v4008_v11  ;;  %4089 = vmatpush1.msra.mxu1 %v4010_v0  ;;  %v11490_v11 = vrot.slane %v9957_v37, %v10592_v9  ;;  %v9954_v0 = vld [vmem:[%s12493_s2 + $0xb0] sm:$0xff]  ;;  %v4543_v37 = vmul.f32 %v11501_v31, %v10927_v27 }
 0x12e   :  { %4195 = vmatprep.subr.mxu0 %v4187_v24  ;;  %4266 = vmatprep.subr.mxu1 %v4189_v54  ;;  %12696 = vst [vmem:[#allocation72_spill] sm:$0xff] %v11504_v63  ;;  %v4366_v54 = vmul.f32 %v11493_v51, %v10884_v40  ;;  %v9965_v40 = vld [vmem:[%s12492_s1 + $0x64] sm:$0xf]  ;;  %v9981_v51 = vld [vmem:[%s12497_s6 + $0x18] sm:$0xff] }
 0x12f   :  { %4081 = vmatprep.mubr.f32.mxu0 %v12655_v59  ;;  %4152 = vmatprep.mubr.f32.mxu1 %v12655_v59  ;;  %12693 = vst [vmem:[#allocation69_spill] sm:$0xff] %v11490_v11  ;;  %v4364_v24 = vmul.f32 %v11490_v11, %v10858_v47  ;;  %v11523_v47 = vrot.slane %v9961_v14, %v10594_v10 }
 0x130   :  { %v11531_v27 = vrot.slane %v9965_v40, %v10590_v8 }
 0x131   :  { %12698 = vst [vmem:[#allocation74_spill] sm:$0xff] %v11523_v47 }
 0x132   :  { %12699 = vst [vmem:[#allocation75_spill] sm:$0xff] %v11531_v27 }
 0x134   :  { %9951 = vmatmul.mubr.msk.f32.vlgmr.msra.gmra.mrb[0].mxu0 %vm144_vm2, %v9950_v3  ;;  %9952 = vmatmul.mubr.msk.f32.vlgmr.msra.gmra.mrb[0].mxu1 %vm144_vm2, %v9950_v3  ;;  %v4545_v3 = vmul.f32 %v11504_v63, %v10935_v6  ;;  %v11534_v6 = vrot.slane %v9965_v40, %v10596_v13 }
 0x135   :  { %4196 = vmatpush1.msra.mxu0 %v4186_v22  ;;  %4267 = vmatpush1.msra.mxu1 %v4188_v58  ;;  %v11520_v22 = vrot.slane %v9961_v14, %v10592_v9  ;;  %v9958_v58 = vld [vmem:[%s12493_s2 + $0xb8] sm:$0xff]  ;;  %v4721_v14 = vmul.f32 %v11531_v27, %v10974_v55 }
 0x136   :  { %4373 = vmatprep.subr.mxu0 %v4365_v61  ;;  %4444 = vmatprep.subr.mxu1 %v4367_v18  ;;  %12700 = vst [vmem:[#allocation76_spill] sm:$0xff] %v11534_v6  ;;  %v4544_v18 = vmul.f32 %v11523_v47, %v10931_v32  ;;  %v9969_v32 = vld [vmem:[%s12492_s1 + $0x68] sm:$0xf]  ;;  %v12725_v47 = vld [vmem:[#allocation15_spill] sm:$0xff] }
 0x137   :  { %4259 = vmatprep.mubr.f32.mxu0 %v12655_v59  ;;  %4330 = vmatprep.mubr.f32.mxu1 %v12655_v59  ;;  %12697 = vst [vmem:[#allocation73_spill] sm:$0xff] %v11520_v22  ;;  %v4542_v61 = vmul.f32 %v11520_v22, %v10905_v49  ;;  %v11553_v49 = vrot.slane %v9965_v40, %v10594_v10 }
 0x138   :  { %v11561_v55 = vrot.slane %v9969_v32, %v10590_v8 }
 0x139   :  { %12702 = vst [vmem:[#allocation78_spill] sm:$0xff] %v11553_v49 }
 0x13a   :  { %12703 = vst [vmem:[#allocation79_spill] sm:$0xff] %v11561_v55  ;;  %v4899_v8 = vmul.f32 %v11561_v55, %v11021_v21 }
 0x13c   :  { %9955 = vmatmul.mubr.msk.f32.vlgmr.msra.gmra.mrb[0].mxu0 %vm144_vm2, %v9954_v0  ;;  %9956 = vmatmul.mubr.msk.f32.vlgmr.msra.gmra.mrb[0].mxu1 %vm144_vm2, %v9954_v0  ;;  %v4723_v0 = vmul.f32 %v11534_v6, %v10982_v4  ;;  %v11564_v4 = vrot.slane %v9969_v32, %v10596_v13 }
 0x13d   :  { %4374 = vmatpush1.msra.mxu0 %v4364_v24  ;;  %4445 = vmatpush1.msra.mxu1 %v4366_v54  ;;  %v11550_v24 = vrot.slane %v9965_v40, %v10592_v9  ;;  %v9962_v54 = vld [vmem:[%s12493_s2 + $0xc0] sm:$0xff]  ;;  %v11580_v40 = vrot.slane %v9969_v32, %v10592_v9  ;;  %v9970_v9 = vld [vmem:[%s12493_s2 + $0xd0] sm:$0xff] }
 0x13e   :  { %4551 = vmatprep.subr.mxu0 %v4543_v37  ;;  %4622 = vmatprep.subr.mxu1 %v4545_v3  ;;  %12704 = vst [vmem:[#allocation80_spill] sm:$0xff] %v11564_v4  ;;  %v4722_v3 = vmul.f32 %v11553_v49, %v10978_v29  ;;  %v4901_v13 = vmul.f32 %v11564_v4, %v11029_v46  ;;  %v9966_v29 = vld [vmem:[%s12493_s2 + $0xc8] sm:$0xff] }
 0x13f   :  { %4437 = vmatprep.mubr.f32.mxu0 %v12655_v59  ;;  %4508 = vmatprep.mubr.f32.mxu1 %v12655_v59  ;;  %12701 = vst [vmem:[#allocation77_spill] sm:$0xff] %v11550_v24  ;;  %v4720_v37 = vmul.f32 %v11550_v24, %v10952_v50  ;;  %12705 = vst [vmem:[#allocation81_spill] sm:$0xff] %v11580_v40  ;;  %v11583_v50 = vrot.slane %v9969_v32, %v10594_v10 }
 0x140   :  { %v4898_v21 = vmul.f32 %v11580_v40, %v10999_v5 }
 0x141   :  { %12706 = vst [vmem:[#allocation82_spill] sm:$0xff] %v11583_v50  ;;  %v4900_v46 = vmul.f32 %v11583_v50, %v11025_v56 }
 0x144   :  { %9959 = vmatmul.mubr.msk.f32.vlgmr.msra.gmra.mrb[0].mxu0 %vm144_vm2, %v9958_v58  ;;  %9960 = vmatmul.mubr.msk.f32.vlgmr.msra.gmra.mrb[0].mxu1 %vm144_vm2, %v9958_v58 }
 0x145   :  { %4552 = vmatpush1.msra.mxu0 %v4542_v61  ;;  %4623 = vmatpush1.msra.mxu1 %v4544_v18 }
 0x146   :  { %4729 = vmatprep.subr.mxu0 %v4721_v14  ;;  %4800 = vmatprep.subr.mxu1 %v4723_v0 }
 0x147   :  { %4615 = vmatprep.mubr.f32.mxu0 %v12655_v59  ;;  %4686 = vmatprep.mubr.f32.mxu1 %v12655_v59 }
 0x14c   :  { %9963 = vmatmul.mubr.msk.f32.vlgmr.msra.gmra.mrb[0].mxu0 %vm144_vm2, %v9962_v54  ;;  %9964 = vmatmul.mubr.msk.f32.vlgmr.msra.gmra.mrb[0].mxu1 %vm144_vm2, %v9962_v54 }
 0x14d   :  { %4730 = vmatpush1.msra.mxu0 %v4720_v37  ;;  %4801 = vmatpush1.msra.mxu1 %v4722_v3 }
 0x14e   :  { %4907 = vmatprep.subr.mxu0 %v4899_v8  ;;  %4978 = vmatprep.subr.mxu1 %v4901_v13 }
 0x14f   :  { %4793 = vmatprep.mubr.f32.mxu0 %v12655_v59  ;;  %4864 = vmatprep.mubr.f32.mxu1 %v12655_v59 }
 0x154   :  { %9967 = vmatmul.mubr.msk.f32.vlgmr.msra.gmra.mrb[0].mxu0 %vm144_vm2, %v9966_v29  ;;  %9968 = vmatmul.mubr.msk.f32.vlgmr.msra.gmra.mrb[0].mxu1 %vm144_vm2, %v9966_v29 }
 0x155   :  { %4908 = vmatpush1.msra.mxu0 %v4898_v21  ;;  %4979 = vmatpush1.msra.mxu1 %v4900_v46 }
 0x156   :  { %4971 = vmatprep.mubr.f32.mxu0 %v12655_v59  ;;  %5042 = vmatprep.mubr.f32.mxu1 %v12655_v59 }
 0x15c   :  { %9971 = vmatmul.mubr.msk.f32.vlgmr.msra.gmra.mrb[0].mxu0 %vm144_vm2, %v9970_v9  ;;  %9972 = vmatmul.mubr.msk.f32.vlgmr.msra.gmra.mrb[0].mxu1 %vm144_vm2, %v9970_v9 }
 0x15d   :  { %5371 = vmatprep.mubr.f32.mxu0 %v12655_v59  ;;  %5442 = vmatprep.mubr.f32.mxu1 %v12655_v59  ;;  %v5056_v10 = vpop.permute.xlu0 %5055 }
 0x22f   :  { %v4973_v56 = vpop.f32.mrb[0].mxu0  ;;  %v5044_v5 = vpop.f32.mrb[0].mxu1 }
 0x230   :  { %v11605_v58 = vadd.f32 %v5056_v10, %v4973_v56  ;;  %v4975_v61 = vpop.f32.mrb[1].mxu0  ;;  %v5046_v18 = vpop.f32.mrb[1].mxu1  ;;  %v11607_v14 = vadd.f32 %v5056_v10, %v5044_v5 }
 0x231   :  { %v11609_v0 = vadd.f32 %v5056_v10, %v4975_v61  ;;  %v11617_v3 = vadd.f32 %v5056_v10, %v5046_v18 }
 0x232   :  { %v5067_v32 = vmul.f32 %v11605_v58, %v11605_v58  ;;  %v5069_v13 = vmul.f32 %v11607_v14, %v11607_v14 }
 0x233   :  { %v5062_v54 = vadd.f32 %v11609_v0, %v11605_v58  ;;  %v5068_v37 = vmul.f32 %v11609_v0, %v11609_v0  ;;  %v5070_v46 = vmul.f32 %v11617_v3, %v11617_v3 }
 0x235   :  { %v5063_v8 = vadd.f32 %v5062_v54, %v11607_v14  ;;  %v5071_v29 = vadd.f32 %v5068_v37, %v5067_v32 }
 0x237   :  { %v5064_v21 = vadd.f32 %v5063_v8, %v11617_v3  ;;  %v5072_v9 = vadd.f32 %v5071_v29, %v5069_v13 }
 0x239   :  { %5065 = vadd.xlane.f32.xlu1 %v5064_v21  ;;  %v5073_v56 = vadd.f32 %v5072_v9, %v5070_v46 }
 0x23b   :  { %5074 = vadd.xlane.f32.xlu0 %v5073_v56 }
 0x2c6   :  { %v5066_v5 = vpop.xlane.xlu1 %5065 }
 0x2c7   :  { %v5077_v10 = vsel %vm12584_vm15, %v5066_v5, 0.0  ;;  %v5111_v61 = vrot.slane %v5066_v5, 2  ;;  %v5149_v37 = vrot.slane %v5066_v5, 4  ;;  %v5186_v21 = vrot.slane %v5066_v5, 6 }
 0x2c8   :  { %v5075_v18 = vpop.xlane.xlu0 %5074  ;;  %5078 = vadd.xlane.f32.xlu1 %v5077_v10 }
 0x2c9   :  { %v5087_v54 = vsel %vm12584_vm15, %v5075_v18, 0.0  ;;  %v5124_v50 = vrot.slane %v5075_v18, 2  ;;  %v5113_v32 = vsel %vm12584_vm15, %v5111_v61, 0.0  ;;  %v5161_v13 = vrot.slane %v5075_v18, 4 }
 0x2ca   :  { %5088 = vadd.xlane.f32.xlu0 %v5087_v54  ;;  %v5151_v29 = vsel %vm12584_vm15, %v5149_v37, 0.0  ;;  %v5198_v9 = vrot.slane %v5075_v18, 6  ;;  %v5188_v56 = vsel %vm12584_vm15, %v5186_v21, 0.0 }
 0x2cb   :  { %v5126_v8 = vsel %vm12584_vm15, %v5124_v50, 0.0  ;;  %v5163_v46 = vsel %vm12584_vm15, %v5161_v13, 0.0 }
 0x2cc   :  { %5114 = vadd.xlane.f32.xlu1 %v5113_v32  ;;  %v5200_v10 = vsel %vm12584_vm15, %v5198_v9, 0.0  ;;  %vm12586_vm15 = vcmask 1041408  }
 0x2ce   :  { %5127 = vadd.xlane.f32.xlu0 %v5126_v8 }
 0x2d0   :  { %5152 = vadd.xlane.f32.xlu1 %v5151_v29 }
 0x2d2   :  { %5164 = vadd.xlane.f32.xlu0 %v5163_v46 }
 0x2d4   :  { %5189 = vadd.xlane.f32.xlu1 %v5188_v56 }
 0x2d6   :  { %5201 = vadd.xlane.f32.xlu0 %v5200_v10 }
 0x355   :  { %v5079_v61 = vpop.xlane.xlu1 %5078 }
 0x356   :  { %v5080_v54 = vrot.slane %v5079_v61, 4 }
 0x357   :  { %v5089_v32 = vpop.xlane.xlu0 %5088 }
 0x358   :  { %v5081_v50 = vadd.f32 %v5080_v54, %v5079_v61  ;;  %v5090_v40 = vrot.slane %v5089_v32, 4 }
 0x359   :  { %v5115_v21 = vpop.xlane.xlu1 %5114 }
 0x35a   :  { %v5082_v8 = vrot.slane %v5081_v50, 2  ;;  %v5091_v4 = vadd.f32 %v5090_v40, %v5089_v32  ;;  %v5116_v56 = vrot.slane %v5115_v21, 4 }
 0x35b   :  { %v5128_v9 = vpop.xlane.xlu0 %5127 }
 0x35c   :  { %v5092_v37 = vrot.slane %v5091_v4, 2  ;;  %v5083_v5 = vadd.f32 %v5082_v8, %v5081_v50  ;;  %v5129_v10 = vrot.slane %v5128_v9, 4  ;;  %v5117_v40 = vadd.f32 %v5116_v56, %v5115_v21 }
 0x35e   :  { %v5084_v29 = vrot.slane %v5083_v5, 1  ;;  %v5093_v49 = vadd.f32 %v5092_v37, %v5091_v4  ;;  %v5130_v4 = vadd.f32 %v5129_v10, %v5128_v9 }
 0x360   :  { %v5085_v13 = vadd.f32 %v5084_v29, %v5083_v5  ;;  %v5094_v18 = vrot.slane %v5093_v49, 1  ;;  %v5131_v61 = vrot.slane %v5130_v4, 2 }
 0x362   :  { %10261 = vpush %v5085_v13  ;;  %v5095_v46 = vadd.f32 %v5094_v18, %v5093_v49  ;;  %v5118_v49 = vrot.slane %v5117_v40, 2  ;;  %v5132_v50 = vadd.f32 %v5131_v61, %v5130_v4  ;;  %v5153_v18 = vpop.xlane.xlu1 %5152 }
 0x363   :  { %v5154_v21 = vrot.slane %v5153_v18, 4 }
 0x364   :  { %10263 = vpush %v5095_v46  ;;  %v5119_v32 = vadd.f32 %v5118_v49, %v5117_v40  ;;  %v5133_v37 = vrot.slane %v5132_v50, 1  ;;  %v5165_v46 = vpop.xlane.xlu0 %5164 }
 0x365   :  { %v5166_v9 = vrot.slane %v5165_v46, 4  ;;  %v5155_v56 = vadd.f32 %v5154_v21, %v5153_v18 }
 0x366   :  { %v5120_v8 = vrot.slane %v5119_v32, 1  ;;  %v5134_v13 = vadd.f32 %v5133_v37, %v5132_v50 }
 0x367   :  { %v5167_v10 = vadd.f32 %v5166_v9, %v5165_v46  ;;  %v5156_v40 = vrot.slane %v5155_v56, 2 }
 0x368   :  { %v5121_v29 = vadd.f32 %v5120_v8, %v5119_v32 }
 0x369   :  { %v5168_v4 = vrot.slane %v5167_v10, 2  ;;  %v5157_v61 = vadd.f32 %v5156_v40, %v5155_v56 }
 0x36b   :  { %v5158_v32 = vrot.slane %v5157_v61, 1 }
 0x36d   :  { %v5159_v37 = vadd.f32 %v5158_v32, %v5157_v61 }
 0x393   :  { %s10262_s2 = spop %10261 }
 0x394   :  { %s11633_s28 = smul.f32 0.0009765625, %s10262_s2 }
 0x395   :  { %s10264_s1 = spop %10263 }
 0x396   :  { %s5099_s26 = smul.f32 %s11633_s28, %s11633_s28  ;;  %s5107_s2 = ssub.f32 0.0, %s11633_s28 }
 0x397   :  { %s5098_s27 = smul.f32 0.0009765625, %s10264_s1 }
 0x399   :  { %s5100_s3 = ssub.f32 %s5098_s27, %s5099_s26 }
 0x39b   :  { %s5101_s29 = smax.f32 %s10386_s10, %s5100_s3 }
 0x39c   :  { %s5102_s24 = sadd.f32 1e-05, %s5101_s29 }
 0x39e   :  { %v5103_v54 = vstv %s5102_s24 }
 0x39f   :  { %10332 = vrsqrt.f32 %v5103_v54  ;;  %v5169_v54 = vadd.f32 %v5168_v4, %v5167_v10 }
 0x3a1   :  { %v5170_v50 = vrot.slane %v5169_v54, 1 }
 0x3a9   :  { %v10333_v5 = vpop.eup %10332 }
 0x3aa   :  { %10265 = vpush %v10333_v5  ;;  %v5171_v5 = vadd.f32 %v5170_v50, %v5169_v54 }
 0x3ab   :  { %10267 = vpush %v5121_v29  ;;  %v5190_v29 = vpop.xlane.xlu1 %5189 }
 0x3ac   :  { %10269 = vpush %v5134_v13  ;;  %v5202_v13 = vpop.xlane.xlu0 %5201  ;;  %v5191_v21 = vrot.slane %v5190_v29, 4 }
 0x3ad   :  { %v5203_v56 = vrot.slane %v5202_v13, 4 }
 0x3af   :  { %v5204_v61 = vadd.f32 %v5203_v56, %v5202_v13 }
 0x3b1   :  { %v5205_v32 = vrot.slane %v5204_v61, 2 }
 0x3db   :  { %s11639_s26 = spop %10265 }
 0x3dc   :  { %s11642_s29 = smul.f32 %s11639_s26, %s5107_s2  ;;  %s10268_s24 = spop %10267  ;;  %v5106_v18 = vstv %s11639_s26 }
 0x3dd   :  { %s11644_s1 = smul.f32 0.0009765625, %s10268_s24  ;;  %s10270_s27 = spop %10269 }
 0x3de   :  { %s5137_s3 = smul.f32 0.0009765625, %s10270_s27  ;;  %v5109_v10 = vstv %s11642_s29 }
 0x3df   :  { %s5138_s23 = smul.f32 %s11644_s1, %s11644_s1 }
 0x3e1   :  { %s5139_s22 = ssub.f32 %s5137_s3, %s5138_s23 }
 0x3e3   :  { %s5140_s28 = smax.f32 %s10386_s10, %s5139_s22  ;;  %s5146_s22 = ssub.f32 0.0, %s11644_s1 }
 0x3e4   :  { %s5141_s21 = sadd.f32 1e-05, %s5140_s28 }
 0x3e6   :  { %v5142_v49 = vstv %s5141_s21 }
 0x3e7   :  { %10334 = vrsqrt.f32 %v5142_v49  ;;  %v5192_v49 = vadd.f32 %v5191_v21, %v5190_v29 }
 0x3e9   :  { %v5193_v54 = vrot.slane %v5192_v49, 2 }
 0x3f1   :  { %v10335_v8 = vpop.eup %10334 }
 0x3f2   :  { %10271 = vpush %v10335_v8  ;;  %v5194_v8 = vadd.f32 %v5193_v54, %v5192_v49 }
 0x3f3   :  { %10273 = vpush %v5159_v37  ;;  %v5206_v37 = vadd.f32 %v5205_v32, %v5204_v61 }
 0x3f4   :  { %10275 = vpush %v5171_v5  ;;  %v5195_v5 = vrot.slane %v5194_v8, 1 }
 0x3f6   :  { %v5196_v55 = vadd.f32 %v5195_v5, %v5194_v8 }
 0x423   :  { %s10272_s23 = spop %10271 }
 0x424   :  { %v5145_v46 = vstv %s10272_s23  ;;  %s5147_s21 = smul.f32 %s10272_s23, %s5146_s22  ;;  %s10274_s2 = spop %10273 }
 0x425   :  { %v5224_v9 = vsel %vm12586_vm15, %v5106_v18, %v5145_v46  ;;  %s11652_s24 = smul.f32 0.0009765625, %s10274_s2  ;;  %s10276_s27 = spop %10275  ;;  %v5207_v18 = vrot.slane %v5206_v37, 1 }
 0x426   :  { %v5148_v40 = vstv %s5147_s21  ;;  %s5174_s3 = smul.f32 0.0009765625, %s10276_s27 }
 0x427   :  { %v5230_v4 = vsel %vm12586_vm15, %v5109_v10, %v5148_v40  ;;  %s5175_s1 = smul.f32 %s11652_s24, %s11652_s24  ;;  %v5208_v10 = vadd.f32 %v5207_v18, %v5206_v37  ;;  %s5183_s29 = ssub.f32 0.0, %s11652_s24  ;;  %vm12593_vm15 = vcmask 1043456  }
 0x429   :  { %s5176_s26 = ssub.f32 %s5174_s3, %s5175_s1 }
 0x42b   :  { %s5177_s28 = smax.f32 %s10386_s10, %s5176_s26 }
 0x42c   :  { %s5178_s22 = sadd.f32 1e-05, %s5177_s28 }
 0x42e   :  { %v5179_v50 = vstv %s5178_s22 }
 0x42f   :  { %10336 = vrsqrt.f32 %v5179_v50  ;;  %v59_v50 = vld [vmem:[%s12496_s5] sm:$0xff]  ;;  %s12708_s5 = smov 8  }
 0x439   :  { %v10337_v46 = vpop.eup %10336 }
 0x43a   :  { %10277 = vpush %v10337_v46 }
 0x43b   :  { %10279 = vpush %v5196_v55 }
 0x43c   :  { %10281 = vpush %v5208_v10 }
 0x46b   :  { %s10278_s23 = spop %10277 }
 0x46c   :  { %v5182_v29 = vstv %s10278_s23  ;;  %s5184_s21 = smul.f32 %s10278_s23, %s5183_s29  ;;  %s10280_s2 = spop %10279 }
 0x46d   :  { %v5226_v13 = vsel %vm12593_vm15, %v5224_v9, %v5182_v29  ;;  %s5210_s27 = smul.f32 0.0009765625, %s10280_s2  ;;  %s10282_s3 = spop %10281  ;;  %v58_v9 = vld [vmem:[%s12495_s4] sm:$0xff] }
 0x46e   :  { %v5185_v21 = vstv %s5184_s21  ;;  %s5211_s1 = smul.f32 0.0009765625, %s10282_s3  ;;  %s12707_s4 = smov 9  }
 0x46f   :  { %v5231_v56 = vsel %vm12593_vm15, %v5230_v4, %v5185_v21  ;;  %s5212_s26 = smul.f32 %s5210_s27, %s5210_s27  ;;  %s5220_s24 = ssub.f32 0.0, %s5210_s27 }
 0x470   :  { %s55_s27 = sld [smem:[#allocation2]] }
 0x471   :  { %s5213_s28 = ssub.f32 %s5211_s1, %s5212_s26 }
 0x473   :  { %s5214_s22 = smax.f32 %s10386_s10, %s5213_s28 }
 0x474   :  { %s5215_s20 = sadd.f32 1e-05, %s5214_s22 }
 0x476   :  { %v5216_v55 = vstv %s5215_s20 }
 0x477   :  { %10338 = vrsqrt.f32 %v5216_v55 }
 0x481   :  { %v10339_v40 = vpop.eup %10338 }
 0x482   :  { %10283 = vpush %v10339_v40 }
 0x4b3   :  { %s10284_s29 = spop %10283 }
 0x4b4   :  { %v5219_v49 = vstv %s10284_s29  ;;  %s5221_s21 = smul.f32 %s10284_s29, %s5220_s24 }
 0x4b5   :  { %v5228_v4 = vsel %vm12592_vm14, %v5226_v13, %v5219_v49  ;;  %v5257_v13 = vstv %s55_s27 }
 0x4b6   :  { %v5222_v61 = vstv %s5221_s21  ;;  %v5229_v54 = vmul.f32 %v5228_v4, %v58_v9 }
 0x4b7   :  { %v5232_v32 = vsel %vm12592_vm14, %v5231_v56, %v5222_v61 }
 0x4b8   :  { %5237 = vperm.xlu1 %10331, %v5229_v54   ;;  %v5233_v8 = vmul.f32 %v5232_v32, %v58_v9 }
 0x4ba   :  { %v5234_v37 = vadd.f32 %v5233_v8, %v59_v50 }
 0x4bc   :  { %5246 = vperm.xlu0 %10330, %v5234_v37  }
 0x537   :  { %v5238_v5 = vpop.permute.xlu1 %5237 }
 0x538   :  { %v5240_v18 = vmul.f32 %v5238_v5, %v11605_v58  ;;  %v5243_v46 = vmul.f32 %v5238_v5, %v11617_v3  ;;  %v5241_v10 = vmul.f32 %v5238_v5, %v11609_v0  ;;  %v5242_v40 = vmul.f32 %v5238_v5, %v11607_v14 }
 0x53b   :  { %v5247_v29 = vpop.permute.xlu0 %5246 }
 0x53c   :  { %v5249_v21 = vadd.f32 %v5247_v29, %v5240_v18  ;;  %v5252_v56 = vadd.f32 %v5247_v29, %v5243_v46  ;;  %v5250_v55 = vadd.f32 %v5247_v29, %v5241_v10  ;;  %v5251_v4 = vadd.f32 %v5247_v29, %v5242_v40  ;;  %v12714_v10 = vld [vmem:[#allocation6_spill] sm:$0xff]  ;;  %v12715_v40 = vld [vmem:[#allocation7_spill] sm:$0xff] }
 0x53e   :  { %vm5253_vm14 = vcmp.gt.f32.partialorder %v5249_v21, 0.0  ;;  %vm5256_vm15 = vcmp.gt.f32.partialorder %v5252_v56, 0.0  ;;  %v5258_v9 = vmul.f32 %v5257_v13, %v5249_v21  ;;  %v5261_v49 = vmul.f32 %v5257_v13, %v5252_v56 }
 0x53f   :  { %v5259_v61 = vmul.f32 %v5257_v13, %v5250_v55  ;;  %vm5254_vm13 = vcmp.gt.f32.partialorder %v5250_v55, 0.0  ;;  %v5260_v0 = vmul.f32 %v5257_v13, %v5251_v4  ;;  %vm5255_vm12 = vcmp.gt.f32.partialorder %v5251_v4, 0.0 }
 0x540   :  { %v11675_v54 = vsel %vm5253_vm14, %v5249_v21, %v5258_v9  ;;  %v11677_v58 = vsel %vm5256_vm15, %v5252_v56, %v5261_v49  ;;  %v9973_v56 = vld [vmem:[%s12497_s6 + $0x8] sm:$0xff]  ;;  %v12716_v49 = vld [vmem:[#allocation5_spill] sm:$0xff] }
 0x541   :  { %5292 = vrot.lane.b32.xlu0 %v11677_v58, %s10367_s25  ;;  %5286 = vrot.lane.b32.xlu1 %v11675_v54, %s10367_s25  ;;  %v11683_v3 = vsel %vm5254_vm13, %v5250_v55, %v5259_v61  ;;  %v11689_v14 = vsel %vm5255_vm12, %v5251_v4, %v5260_v0  ;;  %vm12797_vm13 = vcmp.lt.s32.totalorder %v10584_v7, 121 }
 0x542   :  { %vm12799_vm14 = vmmov %vm12797_vm13 }
 0x543   :  { %vm12800_vm15 = vmmov %vm12797_vm13 }
 0x545   :  { %5269 = vrot.lane.b32.xlu0 %v11675_v54, %s10369_s30  ;;  %5288 = vrot.lane.b32.xlu1 %v11683_v3, %s10367_s25 }
 0x549   :  { %5275 = vrot.lane.b32.xlu0 %v11677_v58, %s10369_s30  ;;  %5290 = vrot.lane.b32.xlu1 %v11689_v14, %s10367_s25  ;;  %s12709_s25 = smov 7  }
 0x54d   :  { %5594 = vrot.lane.b32.xlu0 %v11675_v54, %s10370_s12  ;;  %5271 = vrot.lane.b32.xlu1 %v11683_v3, %s10369_s30 }
 0x551   :  { %5600 = vrot.lane.b32.xlu0 %v11677_v58, %s10370_s12  ;;  %5273 = vrot.lane.b32.xlu1 %v11689_v14, %s10369_s30  ;;  %s12710_s30 = smov 1  }
 0x555   :  { %5761 = vrot.lane.b32.xlu0 %v11675_v54, %s10371_s13  ;;  %5596 = vrot.lane.b32.xlu1 %v11683_v3, %s10370_s12 }
 0x559   :  { %5767 = vrot.lane.b32.xlu0 %v11677_v58, %s10371_s13  ;;  %5598 = vrot.lane.b32.xlu1 %v11689_v14, %s10370_s12  ;;  %s12711_s12 = smov 127  }
 0x55d   :  { %5928 = vrot.lane.b32.xlu0 %v11675_v54, %s10372_s14  ;;  %5763 = vrot.lane.b32.xlu1 %v11683_v3, %s10371_s13 }
 0x561   :  { %5934 = vrot.lane.b32.xlu0 %v11677_v58, %s10372_s14  ;;  %5765 = vrot.lane.b32.xlu1 %v11689_v14, %s10371_s13  ;;  %s12712_s13 = smov 121  }
 0x565   :  { %6095 = vrot.lane.b32.xlu0 %v11675_v54, %s10373_s15  ;;  %5930 = vrot.lane.b32.xlu1 %v11683_v3, %s10372_s14 }
 0x569   :  { %6101 = vrot.lane.b32.xlu0 %v11677_v58, %s10373_s15  ;;  %5932 = vrot.lane.b32.xlu1 %v11689_v14, %s10372_s14  ;;  %s12713_s14 = smov 120  }
 0x56d   :  { %6262 = vrot.lane.b32.xlu0 %v11675_v54, %s10374_s16  ;;  %6097 = vrot.lane.b32.xlu1 %v11683_v3, %s10373_s15 }
 0x571   :  { %6268 = vrot.lane.b32.xlu0 %v11677_v58, %s10374_s16  ;;  %6099 = vrot.lane.b32.xlu1 %v11689_v14, %s10373_s15 }
 0x575   :  { %6429 = vrot.lane.b32.xlu0 %v11675_v54, %s10375_s17  ;;  %6264 = vrot.lane.b32.xlu1 %v11683_v3, %s10374_s16 }
 0x579   :  { %6435 = vrot.lane.b32.xlu0 %v11677_v58, %s10375_s17  ;;  %6266 = vrot.lane.b32.xlu1 %v11689_v14, %s10374_s16 }
 0x57d   :  { %6596 = vrot.lane.b32.xlu0 %v11675_v54, %s10376_s18  ;;  %6431 = vrot.lane.b32.xlu1 %v11683_v3, %s10375_s17 }
 0x581   :  { %6602 = vrot.lane.b32.xlu0 %v11677_v58, %s10376_s18  ;;  %6433 = vrot.lane.b32.xlu1 %v11689_v14, %s10375_s17  ;;  %s12717_s17 = smov 119  }
 0x585   :  { %6763 = vrot.lane.b32.xlu0 %v11675_v54, %s12707_s4  ;;  %6598 = vrot.lane.b32.xlu1 %v11683_v3, %s10376_s18 }
 0x589   :  { %6769 = vrot.lane.b32.xlu0 %v11677_v58, %s12707_s4  ;;  %6600 = vrot.lane.b32.xlu1 %v11689_v14, %s10376_s18 }
 0x58d   :  { %6930 = vrot.lane.b32.xlu0 %v11675_v54, %s12708_s5  ;;  %6765 = vrot.lane.b32.xlu1 %v11683_v3, %s12707_s4 }
 0x591   :  { %6936 = vrot.lane.b32.xlu0 %v11677_v58, %s12708_s5  ;;  %6767 = vrot.lane.b32.xlu1 %v11689_v14, %s12707_s4 }
 0x595   :  { %7097 = vrot.lane.b32.xlu0 %v11675_v54, %s12709_s25  ;;  %6932 = vrot.lane.b32.xlu1 %v11683_v3, %s12708_s5 }
 0x599   :  { %7103 = vrot.lane.b32.xlu0 %v11677_v58, %s12709_s25  ;;  %6934 = vrot.lane.b32.xlu1 %v11689_v14, %s12708_s5 }
 0x59d   :  { %7264 = vrot.lane.b32.xlu0 %v11675_v54, %s12710_s30  ;;  %7099 = vrot.lane.b32.xlu1 %v11683_v3, %s12709_s25 }
 0x5a1   :  { %7270 = vrot.lane.b32.xlu0 %v11677_v58, %s12710_s30  ;;  %7101 = vrot.lane.b32.xlu1 %v11689_v14, %s12709_s25 }
 0x5a5   :  { %7584 = vrot.lane.b32.xlu0 %v11683_v3, %s12711_s12  ;;  %7266 = vrot.lane.b32.xlu1 %v11683_v3, %s12710_s30 }
 0x5a9   :  { %7582 = vrot.lane.b32.xlu0 %v11675_v54, %s12711_s12  ;;  %7268 = vrot.lane.b32.xlu1 %v11689_v14, %s12710_s30 }
 0x5ad   :  { %7751 = vrot.lane.b32.xlu0 %v11683_v3, %s12712_s13  ;;  %7586 = vrot.lane.b32.xlu1 %v11689_v14, %s12711_s12 }
 0x5b1   :  { %7749 = vrot.lane.b32.xlu0 %v11675_v54, %s12712_s13  ;;  %7588 = vrot.lane.b32.xlu1 %v11677_v58, %s12711_s12 }
 0x5b3   :  { %v5293_v32 = vpop.permute.xlu0 %5292  ;;  %v5287_v50 = vpop.permute.xlu1 %5286 }
 0x5b4   :  { %v11805_v8 = vsel %vm110_vm0, %v5293_v32, %v5287_v50 }
 0x5b5   :  { %7918 = vrot.lane.b32.xlu0 %v11683_v3, %s12713_s14  ;;  %7753 = vrot.lane.b32.xlu1 %v11689_v14, %s12712_s13  ;;  %v5298_v29 = vmul.f32 %v11805_v8, %v12714_v10  ;;  %v12719_v10 = vld [vmem:[#allocation10_spill] sm:$0xff] }
 0x5b7   :  { %v5270_v37 = vpop.permute.xlu0 %5269  ;;  %v5289_v5 = vpop.permute.xlu1 %5288 }
 0x5b8   :  { %v11809_v18 = vsel %vm110_vm0, %v5287_v50, %v5289_v5 }
 0x5b9   :  { %v5299_v46 = vmul.f32 %v11809_v18, %v10610_v16  ;;  %7916 = vrot.lane.b32.xlu0 %v11675_v54, %s12713_s14  ;;  %7755 = vrot.lane.b32.xlu1 %v11677_v58, %s12712_s13 }
 0x5bb   :  { %v5276_v13 = vpop.permute.xlu0 %5275  ;;  %5307 = vmatprep.subr.mxu0 %v5299_v46  ;;  %v5291_v21 = vpop.permute.xlu1 %5290 }
 0x5bc   :  { %v11824_v55 = vsel %vm110_vm0, %v5291_v21, %v5293_v32  ;;  %v11828_v16 = vsel %vm110_vm0, %v5289_v5, %v5291_v21  ;;  %5308 = vmatpush1.msra.mxu0 %v5298_v29  ;;  %v11841_v61 = vsel %vm70_vm1, %v5276_v13, %v5270_v37  ;;  %v12718_v5 = vld [vmem:[#allocation8_spill] sm:$0xff]  ;;  %vm12777_vm0 = vcmp.lt.s32.totalorder %v10584_v7, 7 }
 0x5bd   :  { %v5300_v9 = vmul.f32 %v11828_v16, %v12715_v40  ;;  %v5301_v4 = vmul.f32 %v11824_v55, %v12716_v49  ;;  %8085 = vrot.lane.b32.xlu0 %v11683_v3, %s12717_s17  ;;  %7920 = vrot.lane.b32.xlu1 %v11689_v14, %s12713_s14  ;;  %v5281_v29 = vmul.f32 %v11841_v61, %v12719_v10  ;;  %v12721_v10 = vld [vmem:[#allocation11_spill] sm:$0xff] }
 0x5be   :  { %9974 = vmatmul.mubr.msk.f32.vlgmr.msra.gmra.mrb[2].mxu0 %vm144_vm2, %v9973_v56 }
 0x5bf   :  { %v5595_v0 = vpop.permute.xlu0 %5594  ;;  %5378 = vmatprep.subr.mxu1 %v5301_v4  ;;  %v5272_v32 = vpop.permute.xlu1 %5271  ;;  %5516 = vmatprep.mubr.f32.mxu0 %v12655_v59  ;;  %v12720_v4 = vld [vmem:[#allocation9_spill] sm:$0xff] }
 0x5c0   :  { %v11846_v50 = vsel %vm70_vm1, %v5270_v37, %v5272_v32  ;;  %5379 = vmatpush1.msra.mxu1 %v5300_v9  ;;  %v5266_v37 = vld [vmem:[%s12498_s7] sm:$0xff] }
 0x5c1   :  { %v5282_v46 = vmul.f32 %v11846_v50, %v12718_v5  ;;  %8083 = vrot.lane.b32.xlu0 %v11675_v54, %s12717_s17  ;;  %9975 = vmatmul.mubr.msk.f32.vlgmr.msra.gmra.mrb[2].mxu1 %vm144_vm2, %v9973_v56  ;;  %v5285_v9 = vld [vmem:[%s12497_s6] sm:$0xff] }
 0x5c2   :  { %7922 = vrot.lane.b32.xlu1 %v11677_v58, %s12713_s14  ;;  %5587 = vmatprep.mubr.f32.mxu1 %v12655_v59 }
 0x5c3   :  { %v5601_v21 = vpop.permute.xlu0 %5600  ;;  %5452 = vmatprep.subr.mxu0 %v5282_v46  ;;  %v5274_v40 = vpop.permute.xlu1 %5273 }
 0x5c4   :  { %v11866_v56 = vsel %vm70_vm1, %v5274_v40, %v5276_v13  ;;  %v11870_v49 = vsel %vm70_vm1, %v5272_v32, %v5274_v40  ;;  %5453 = vmatpush1.msra.mxu0 %v5281_v29  ;;  %v11881_v13 = vsel %vm443_vm3, %v5601_v21, %v5595_v0  ;;  %vm12778_vm1 = vmmov %vm12777_vm0 }
 0x5c5   :  { %v5283_v5 = vmul.f32 %v11870_v49, %v12720_v4  ;;  %v5284_v46 = vmul.f32 %v11866_v56, %v12721_v10  ;;  %9647 = vperm.xlu0 %10330, %v5266_v37   ;;  %v12722_v37 = vld [vmem:[#allocation12_spill] sm:$0xff]  ;;  %v12723_v4 = vld [vmem:[#allocation14_spill] sm:$0xff] }
 0x5c6   :  { %8087 = vrot.lane.b32.xlu1 %v11689_v14, %s12717_s17  ;;  %9976 = vmatmul.mubr.msk.f32.vlgmr.msra.gmra.mrb[2].mxu0 %vm144_vm2, %v5285_v9  ;;  %v5606_v10 = vmul.f32 %v11881_v13, %v12723_v4 }
 0x5c7   :  { %v5762_v24 = vpop.permute.xlu0 %5761  ;;  %5523 = vmatprep.subr.mxu1 %v5284_v46  ;;  %v5597_v32 = vpop.permute.xlu1 %5596  ;;  %5679 = vmatprep.mubr.f32.mxu0 %v12655_v59 }
 0x5c8   :  { %v11886_v29 = vsel %vm443_vm3, %v5595_v0, %v5597_v32  ;;  %5524 = vmatpush1.msra.mxu1 %v5283_v5  ;;  %v9978_v0 = vld [vmem:[%s12497_s6 + $0x10] sm:$0xff] }
 0x5c9   :  { %v5607_v40 = vmul.f32 %v11886_v29, %v12722_v37  ;;  %9977 = vmatmul.mubr.msk.f32.vlgmr.msra.gmra.mrb[2].mxu1 %vm144_vm2, %v5285_v9  ;;  %v12724_v37 = vld [vmem:[#allocation13_spill] sm:$0xff] }
 0x5ca   :  { %8089 = vrot.lane.b32.xlu1 %v11677_v58, %s12717_s17  ;;  %5750 = vmatprep.mubr.f32.mxu1 %v12655_v59 }
 0x5cb   :  { %v5768_v46 = vpop.permute.xlu0 %5767  ;;  %5615 = vmatprep.subr.mxu0 %v5607_v40  ;;  %v5599_v6 = vpop.permute.xlu1 %5598 }
 0x5cc   :  { %v11901_v5 = vsel %vm443_vm3, %v5599_v6, %v5601_v21  ;;  %v11905_v9 = vsel %vm443_vm3, %v5597_v32, %v5599_v6  ;;  %5616 = vmatpush1.msra.mxu0 %v5606_v10  ;;  %v11914_v27 = vsel %vm634_vm4, %v5768_v46, %v5762_v24  ;;  %v12726_v32 = vld [vmem:[#allocation16_spill] sm:$0xff]  ;;  %vm12780_vm3 = vmmov %vm12777_vm0 }
 0x5cd   :  { %v5608_v4 = vmul.f32 %v11905_v9, %v12724_v37  ;;  %v5609_v40 = vmul.f32 %v11901_v5, %v12725_v47  ;;  %v12727_v47 = vld [vmem:[#allocation18_spill] sm:$0xff] }
 0x5ce   :  { %9979 = vmatmul.mubr.msk.f32.vlgmr.msra.gmra.mrb[2].mxu0 %vm144_vm2, %v9978_v0  ;;  %v5773_v37 = vmul.f32 %v11914_v27, %v12727_v47  ;;  %v12729_v47 = vld [vmem:[#allocation19_spill] sm:$0xff] }
 0x5cf   :  { %v5929_v22 = vpop.permute.xlu0 %5928  ;;  %5686 = vmatprep.subr.mxu1 %v5609_v40  ;;  %v5764_v21 = vpop.permute.xlu1 %5763  ;;  %5846 = vmatprep.mubr.f32.mxu0 %v12655_v59 }
 0x5d0   :  { %v11919_v6 = vsel %vm634_vm4, %v5762_v24, %v5764_v21  ;;  %5687 = vmatpush1.msra.mxu1 %v5608_v4 }
 0x5d1   :  { %v5774_v10 = vmul.f32 %v11919_v6, %v12726_v32  ;;  %9980 = vmatmul.mubr.msk.f32.vlgmr.msra.gmra.mrb[2].mxu1 %vm144_vm2, %v9978_v0  ;;  %v12728_v0 = vld [vmem:[#allocation17_spill] sm:$0xff] }
 0x5d2   :  { %5917 = vmatprep.mubr.f32.mxu1 %v12655_v59 }
 0x5d3   :  { %v5935_v63 = vpop.permute.xlu0 %5934  ;;  %5782 = vmatprep.subr.mxu0 %v5774_v10  ;;  %v5766_v40 = vpop.permute.xlu1 %5765 }
 0x5d4   :  { %v11932_v24 = vsel %vm634_vm4, %v5766_v40, %v5768_v46  ;;  %v11936_v4 = vsel %vm634_vm4, %v5764_v21, %v5766_v40  ;;  %5783 = vmatpush1.msra.mxu0 %v5773_v37  ;;  %v11945_v31 = vsel %vm825_vm5, %v5935_v63, %v5929_v22  ;;  %v12732_v37 = vld [vmem:[#allocation20_spill] sm:$0xff]  ;;  %vm12781_vm4 = vmmov %vm12777_vm0 }
 0x5d5   :  { %v5775_v32 = vmul.f32 %v11936_v4, %v12728_v0  ;;  %v5776_v10 = vmul.f32 %v11932_v24, %v12729_v47  ;;  %12730 = vst [vmem:[#allocation6_spill] sm:$0xff] %v11945_v31  ;;  %v12733_v0 = vld [vmem:[#allocation22_spill] sm:$0xff] }
 0x5d6   :  { %9982 = vmatmul.mubr.msk.f32.vlgmr.msra.gmra.mrb[2].mxu0 %vm144_vm2, %v9981_v51  ;;  %v5940_v47 = vmul.f32 %v11945_v31, %v12733_v0  ;;  %v12736_v0 = vld [vmem:[#allocation23_spill] sm:$0xff] }
 0x5d7   :  { %v6096_v11 = vpop.permute.xlu0 %6095  ;;  %5853 = vmatprep.subr.mxu1 %v5776_v10  ;;  %v5931_v46 = vpop.permute.xlu1 %5930  ;;  %6013 = vmatprep.mubr.f32.mxu0 %v12655_v59 }
 0x5d8   :  { %v11950_v21 = vsel %vm825_vm5, %v5929_v22, %v5931_v46  ;;  %5854 = vmatpush1.msra.mxu1 %v5775_v32 }
 0x5d9   :  { %12731 = vst [vmem:[#allocation7_spill] sm:$0xff] %v11950_v21  ;;  %v5941_v40 = vmul.f32 %v11950_v21, %v12732_v37  ;;  %9983 = vmatmul.mubr.msk.f32.vlgmr.msra.gmra.mrb[2].mxu1 %vm144_vm2, %v9981_v51  ;;  %v12735_v51 = vld [vmem:[#allocation21_spill] sm:$0xff] }
 0x5da   :  { %6084 = vmatprep.mubr.f32.mxu1 %v12655_v59 }
 0x5db   :  { %v6102_v19 = vpop.permute.xlu0 %6101  ;;  %5949 = vmatprep.subr.mxu0 %v5941_v40  ;;  %v5933_v10 = vpop.permute.xlu1 %5932 }
 0x5dc   :  { %v11963_v22 = vsel %vm825_vm5, %v5933_v10, %v5935_v63  ;;  %v11967_v32 = vsel %vm825_vm5, %v5931_v46, %v5933_v10  ;;  %5950 = vmatpush1.msra.mxu0 %v5940_v47  ;;  %v11976_v12 = vsel %vm1016_vm6, %v6102_v19, %v6096_v11  ;;  %v12739_v47 = vld [vmem:[#allocation24_spill] sm:$0xff]  ;;  %vm12784_vm5 = vcmp.lt.s32.totalorder %v10584_v7, 1 }
 0x5dd   :  { %12734 = vst [vmem:[#allocation5_spill] sm:$0xff] %v11963_v22  ;;  %v5942_v37 = vmul.f32 %v11967_v32, %v12735_v51  ;;  %v5943_v40 = vmul.f32 %v11963_v22, %v12736_v0  ;;  %12737 = vst [vmem:[#allocation8_spill] sm:$0xff] %v11976_v12  ;;  %v12740_v51 = vld [vmem:[#allocation26_spill] sm:$0xff] }
 0x5de   :  { %9985 = vmatmul.mubr.msk.f32.vlgmr.msra.gmra.mrb[2].mxu0 %vm144_vm2, %v9984_v20  ;;  %v6107_v0 = vmul.f32 %v11976_v12, %v12740_v51  ;;  %v12744_v51 = vld [vmem:[#allocation27_spill] sm:$0xff] }
 0x5df   :  { %v6263_v21 = vpop.permute.xlu0 %6262  ;;  %6020 = vmatprep.subr.mxu1 %v5943_v40  ;;  %v6098_v63 = vpop.permute.xlu1 %6097  ;;  %6180 = vmatprep.mubr.f32.mxu0 %v12655_v59 }
 0x5e0   :  { %v11981_v46 = vsel %vm1016_vm6, %v6096_v11, %v6098_v63  ;;  %6021 = vmatpush1.msra.mxu1 %v5942_v37 }
 0x5e1   :  { %12738 = vst [vmem:[#allocation10_spill] sm:$0xff] %v11981_v46  ;;  %v6108_v10 = vmul.f32 %v11981_v46, %v12739_v47  ;;  %9986 = vmatmul.mubr.msk.f32.vlgmr.msra.gmra.mrb[2].mxu1 %vm144_vm2, %v9984_v20  ;;  %v12743_v20 = vld [vmem:[#allocation25_spill] sm:$0xff] }
 0x5e2   :  { %6251 = vmatprep.mubr.f32.mxu1 %v12655_v59 }
 0x5e3   :  { %v6269_v22 = vpop.permute.xlu0 %6268  ;;  %6116 = vmatprep.subr.mxu0 %v6108_v10  ;;  %v6100_v40 = vpop.permute.xlu1 %6099 }
 0x5e4   :  { %v11994_v11 = vsel %vm1016_vm6, %v6100_v40, %v6102_v19  ;;  %v11998_v37 = vsel %vm1016_vm6, %v6098_v63, %v6100_v40  ;;  %6117 = vmatpush1.msra.mxu0 %v6107_v0  ;;  %v12007_v46 = vsel %vm1207_vm7, %v6269_v22, %v6263_v21  ;;  %v12747_v0 = vld [vmem:[#allocation28_spill] sm:$0xff]  ;;  %vm12785_vm6 = vmmov %vm12784_vm5 }
 0x5e5   :  { %12741 = vst [vmem:[#allocation9_spill] sm:$0xff] %v11994_v11  ;;  %12742 = vst [vmem:[#allocation11_spill] sm:$0xff] %v11998_v37  ;;  %v6109_v47 = vmul.f32 %v11998_v37, %v12743_v20  ;;  %v6110_v10 = vmul.f32 %v11994_v11, %v12744_v51  ;;  %v12748_v20 = vld [vmem:[#allocation30_spill] sm:$0xff]  ;;  %v9990_v37 = vld [vmem:[%s12497_s6 + $0x30] sm:$0xff] }
 0x5e6   :  { %9988 = vmatmul.mubr.msk.f32.vlgmr.msra.gmra.mrb[2].mxu0 %vm144_vm2, %v9987_v41  ;;  %12745 = vst [vmem:[#allocation12_spill] sm:$0xff] %v12007_v46  ;;  %v6274_v51 = vmul.f32 %v12007_v46, %v12748_v20  ;;  %v12752_v20 = vld [vmem:[#allocation31_spill] sm:$0xff] }
 0x5e7   :  { %v6430_v12 = vpop.permute.xlu0 %6429  ;;  %6187 = vmatprep.subr.mxu1 %v6110_v10  ;;  %v6265_v19 = vpop.permute.xlu1 %6264  ;;  %6347 = vmatprep.mubr.f32.mxu0 %v12655_v59 }
 0x5e8   :  { %v12012_v63 = vsel %vm1207_vm7, %v6263_v21, %v6265_v19  ;;  %6188 = vmatpush1.msra.mxu1 %v6109_v47 }
 0x5e9   :  { %12746 = vst [vmem:[#allocation14_spill] sm:$0xff] %v12012_v63  ;;  %v6275_v40 = vmul.f32 %v12012_v63, %v12747_v0  ;;  %9989 = vmatmul.mubr.msk.f32.vlgmr.msra.gmra.mrb[2].mxu1 %vm144_vm2, %v9987_v41  ;;  %v12751_v41 = vld [vmem:[#allocation29_spill] sm:$0xff] }
 0x5ea   :  { %6418 = vmatprep.mubr.f32.mxu1 %v12655_v59 }
 0x5eb   :  { %v6436_v11 = vpop.permute.xlu0 %6435  ;;  %6283 = vmatprep.subr.mxu0 %v6275_v40  ;;  %v6267_v10 = vpop.permute.xlu1 %6266 }
 0x5ec   :  { %v12025_v21 = vsel %vm1207_vm7, %v6267_v10, %v6269_v22  ;;  %v12029_v47 = vsel %vm1207_vm7, %v6265_v19, %v6267_v10  ;;  %6284 = vmatpush1.msra.mxu0 %v6274_v51  ;;  %v12038_v63 = vsel %vm1398_vm8, %v6436_v11, %v6430_v12  ;;  %v12755_v51 = vld [vmem:[#allocation32_spill] sm:$0xff]  ;;  %vm12787_vm7 = vmmov %vm12784_vm5 }
 0x5ed   :  { %12749 = vst [vmem:[#allocation13_spill] sm:$0xff] %v12025_v21  ;;  %12750 = vst [vmem:[#allocation15_spill] sm:$0xff] %v12029_v47  ;;  %v6276_v0 = vmul.f32 %v12029_v47, %v12751_v41  ;;  %v6277_v40 = vmul.f32 %v12025_v21, %v12752_v20  ;;  %v12756_v41 = vld [vmem:[#allocation34_spill] sm:$0xff]  ;;  %v9993_v47 = vld [vmem:[%s12497_s6 + $0x38] sm:$0xff] }
 0x5ee   :  { %9991 = vmatmul.mubr.msk.f32.vlgmr.msra.gmra.mrb[2].mxu0 %vm144_vm2, %v9990_v37  ;;  %12753 = vst [vmem:[#allocation16_spill] sm:$0xff] %v12038_v63  ;;  %v6441_v20 = vmul.f32 %v12038_v63, %v12756_v41  ;;  %v12760_v41 = vld [vmem:[#allocation35_spill] sm:$0xff] }
 0x5ef   :  { %v6597_v46 = vpop.permute.xlu0 %6596  ;;  %6354 = vmatprep.subr.mxu1 %v6277_v40  ;;  %v6432_v22 = vpop.permute.xlu1 %6431  ;;  %6514 = vmatprep.mubr.f32.mxu0 %v12655_v59 }
 0x5f0   :  { %v12043_v19 = vsel %vm1398_vm8, %v6430_v12, %v6432_v22  ;;  %6355 = vmatpush1.msra.mxu1 %v6276_v0 }
 0x5f1   :  { %12754 = vst [vmem:[#allocation18_spill] sm:$0xff] %v12043_v19  ;;  %v6442_v10 = vmul.f32 %v12043_v19, %v12755_v51  ;;  %9992 = vmatmul.mubr.msk.f32.vlgmr.msra.gmra.mrb[2].mxu1 %vm144_vm2, %v9990_v37  ;;  %v12759_v37 = vld [vmem:[#allocation33_spill] sm:$0xff] }
 0x5f2   :  { %6585 = vmatprep.mubr.f32.mxu1 %v12655_v59 }
 0x5f3   :  { %v6603_v21 = vpop.permute.xlu0 %6602  ;;  %6450 = vmatprep.subr.mxu0 %v6442_v10  ;;  %v6434_v40 = vpop.permute.xlu1 %6433 }
 0x5f4   :  { %v12056_v12 = vsel %vm1398_vm8, %v6434_v40, %v6436_v11  ;;  %v12060_v0 = vsel %vm1398_vm8, %v6432_v22, %v6434_v40  ;;  %6451 = vmatpush1.msra.mxu0 %v6441_v20  ;;  %v12069_v19 = vsel %vm1589_vm9, %v6603_v21, %v6597_v46  ;;  %v12763_v20 = vld [vmem:[#allocation36_spill] sm:$0xff]  ;;  %vm12788_vm8 = vmmov %vm12784_vm5 }
 0x5f5   :  { %12757 = vst [vmem:[#allocation17_spill] sm:$0xff] %v12056_v12  ;;  %12758 = vst [vmem:[#allocation19_spill] sm:$0xff] %v12060_v0  ;;  %v6443_v51 = vmul.f32 %v12060_v0, %v12759_v37  ;;  %v6444_v10 = vmul.f32 %v12056_v12, %v12760_v41  ;;  %v12764_v37 = vld [vmem:[#allocation38_spill] sm:$0xff]  ;;  %v9996_v0 = vld [vmem:[%s12497_s6 + $0x40] sm:$0xff] }
 0x5f6   :  { %9994 = vmatmul.mubr.msk.f32.vlgmr.msra.gmra.mrb[2].mxu0 %vm144_vm2, %v9993_v47  ;;  %12761 = vst [vmem:[#allocation20_spill] sm:$0xff] %v12069_v19  ;;  %v6608_v41 = vmul.f32 %v12069_v19, %v12764_v37  ;;  %v12768_v37 = vld [vmem:[#allocation39_spill] sm:$0xff] }
 0x5f7   :  { %v6764_v63 = vpop.permute.xlu0 %6763  ;;  %6521 = vmatprep.subr.mxu1 %v6444_v10  ;;  %v6599_v11 = vpop.permute.xlu1 %6598  ;;  %6681 = vmatprep.mubr.f32.mxu0 %v12655_v59 }
 0x5f8   :  { %v12074_v22 = vsel %vm1589_vm9, %v6597_v46, %v6599_v11  ;;  %6522 = vmatpush1.msra.mxu1 %v6443_v51 }
 0x5f9   :  { %12762 = vst [vmem:[#allocation22_spill] sm:$0xff] %v12074_v22  ;;  %v6609_v40 = vmul.f32 %v12074_v22, %v12763_v20  ;;  %9995 = vmatmul.mubr.msk.f32.vlgmr.msra.gmra.mrb[2].mxu1 %vm144_vm2, %v9993_v47  ;;  %v12767_v47 = vld [vmem:[#allocation37_spill] sm:$0xff] }
 0x5fa   :  { %6752 = vmatprep.mubr.f32.mxu1 %v12655_v59 }
 0x5fb   :  { %v6770_v12 = vpop.permute.xlu0 %6769  ;;  %6617 = vmatprep.subr.mxu0 %v6609_v40  ;;  %v6601_v10 = vpop.permute.xlu1 %6600 }
 0x5fc   :  { %v12087_v46 = vsel %vm1589_vm9, %v6601_v10, %v6603_v21  ;;  %v12091_v51 = vsel %vm1589_vm9, %v6599_v11, %v6601_v10  ;;  %6618 = vmatpush1.msra.mxu0 %v6608_v41  ;;  %v6774_v22 = vsel %vm1780_vm10, %v6770_v12, %v6764_v63  ;;  %v12769_v41 = vld [vmem:[#allocation40_spill] sm:$0xff]  ;;  %vm12789_vm9 = vcmp.lt.s32.totalorder %v10584_v7, 127 }
 0x5fd   :  { %12765 = vst [vmem:[#allocation21_spill] sm:$0xff] %v12087_v46  ;;  %12766 = vst [vmem:[#allocation23_spill] sm:$0xff] %v12091_v51  ;;  %v6610_v20 = vmul.f32 %v12091_v51, %v12767_v47  ;;  %v6611_v40 = vmul.f32 %v12087_v46, %v12768_v37  ;;  %v12770_v47 = vld [vmem:[#allocation42_spill] sm:$0xff] }
 0x5fe   :  { %9997 = vmatmul.mubr.msk.f32.vlgmr.msra.gmra.mrb[2].mxu0 %vm144_vm2, %v9996_v0  ;;  %v6775_v37 = vmul.f32 %v6774_v22, %v12770_v47  ;;  %vm12794_vm12 = vmmov %vm12789_vm9 }
 0x5ff   :  { %v6931_v19 = vpop.permute.xlu0 %6930  ;;  %6688 = vmatprep.subr.mxu1 %v6611_v40  ;;  %v6766_v21 = vpop.permute.xlu1 %6765  ;;  %6848 = vmatprep.mubr.f32.mxu0 %v12655_v59  ;;  %v9999_v40 = vld [vmem:[%s12497_s6 + $0x48] sm:$0xff] }
 0x600   :  { %v6773_v11 = vsel %vm1780_vm10, %v6764_v63, %v6766_v21  ;;  %6689 = vmatpush1.msra.mxu1 %v6610_v20  ;;  %v12771_v20 = vld [vmem:[#allocation41_spill] sm:$0xff] }
 0x601   :  { %v6776_v10 = vmul.f32 %v6773_v11, %v12769_v41  ;;  %9998 = vmatmul.mubr.msk.f32.vlgmr.msra.gmra.mrb[2].mxu1 %vm144_vm2, %v9996_v0  ;;  %v12772_v11 = vld [vmem:[#allocation43_spill] sm:$0xff] }
 0x602   :  { %6919 = vmatprep.mubr.f32.mxu1 %v12655_v59 }
 0x603   :  { %v6937_v46 = vpop.permute.xlu0 %6936  ;;  %6784 = vmatprep.subr.mxu0 %v6776_v10  ;;  %v6768_v51 = vpop.permute.xlu1 %6767 }
 0x604   :  { %v6771_v31 = vsel %vm1780_vm10, %v6768_v51, %v6770_v12  ;;  %v6772_v63 = vsel %vm1780_vm10, %v6766_v21, %v6768_v51  ;;  %6785 = vmatpush1.msra.mxu0 %v6775_v37  ;;  %v6941_v41 = vsel %vm1971_vm11, %v6937_v46, %v6931_v19  ;;  %v12773_v51 = vld [vmem:[#allocation44_spill] sm:$0xff]  ;;  %v12774_v37 = vld [vmem:[#allocation46_spill] sm:$0xff]  ;;  %vm12791_vm10 = vmmov %vm12789_vm9 }
 0x605   :  { %v6777_v0 = vmul.f32 %v6772_v63, %v12771_v20  ;;  %v6778_v22 = vmul.f32 %v6771_v31, %v12772_v11  ;;  %v6942_v31 = vmul.f32 %v6941_v41, %v12774_v37  ;;  %v10002_v11 = vld [vmem:[%s12497_s6 + $0x50] sm:$0xff] }
 0x606   :  { %10000 = vmatmul.mubr.msk.f32.vlgmr.msra.gmra.mrb[2].mxu0 %vm144_vm2, %v9999_v40 }
 0x607   :  { %v7098_v10 = vpop.permute.xlu0 %7097  ;;  %6855 = vmatprep.subr.mxu1 %v6778_v22  ;;  %v6933_v47 = vpop.permute.xlu1 %6932  ;;  %7015 = vmatprep.mubr.f32.mxu0 %v12655_v59 }
 0x608   :  { %v6940_v12 = vsel %vm1971_vm11, %v6931_v19, %v6933_v47  ;;  %6856 = vmatpush1.msra.mxu1 %v6777_v0  ;;  %v12775_v0 = vld [vmem:[#allocation45_spill] sm:$0xff] }
 0x609   :  { %v6943_v21 = vmul.f32 %v6940_v12, %v12773_v51  ;;  %10001 = vmatmul.mubr.msk.f32.vlgmr.msra.gmra.mrb[2].mxu1 %vm144_vm2, %v9999_v40  ;;  %v12776_v12 = vld [vmem:[#allocation47_spill] sm:$0xff] }
 0x60a   :  { %7086 = vmatprep.mubr.f32.mxu1 %v12655_v59 }
 0x60b   :  { %v7104_v63 = vpop.permute.xlu0 %7103  ;;  %6951 = vmatprep.subr.mxu0 %v6943_v21  ;;  %v6935_v20 = vpop.permute.xlu1 %6934 }
 0x60c   :  { %v6938_v22 = vsel %vm1971_vm11, %v6935_v20, %v6937_v46  ;;  %v6939_v19 = vsel %vm1971_vm11, %v6933_v47, %v6935_v20  ;;  %6952 = vmatpush1.msra.mxu0 %v6942_v31  ;;  %v7108_v51 = vsel %vm12777_vm0, %v7104_v63, %v7098_v10  ;;  %v12779_v47 = vld [vmem:[#allocation48_spill] sm:$0xff]  ;;  %vm12792_vm11 = vmmov %vm12789_vm9 }
 0x60d   :  { %v6944_v40 = vmul.f32 %v6939_v19, %v12775_v0  ;;  %v6945_v41 = vmul.f32 %v6938_v22, %v12776_v12  ;;  %v7109_v20 = vmul.f32 %v7108_v51, %v11122_v35  ;;  %v10005_v0 = vld [vmem:[%s12497_s6 + $0x58] sm:$0xff]  ;;  %vm12802_vm0 = vmmov %vm12797_vm13 }
 0x60e   :  { %10003 = vmatmul.mubr.msk.f32.vlgmr.msra.gmra.mrb[2].mxu0 %vm144_vm2, %v10002_v11 }
 0x60f   :  { %v7265_v21 = vpop.permute.xlu0 %7264  ;;  %7022 = vmatprep.subr.mxu1 %v6945_v41  ;;  %v7100_v37 = vpop.permute.xlu1 %7099  ;;  %7182 = vmatprep.mubr.f32.mxu0 %v12655_v59  ;;  %v12783_v41 = vld [vmem:[#allocation50_spill] sm:$0xff] }
 0x610   :  { %v7107_v46 = vsel %vm12778_vm1, %v7098_v10, %v7100_v37  ;;  %7023 = vmatpush1.msra.mxu1 %v6944_v40  ;;  %v12782_v40 = vld [vmem:[#allocation49_spill] sm:$0xff]  ;;  %vm12805_vm1 = vcmp.lt.s32.totalorder %v10584_v7, 120 }
 0x611   :  { %v7110_v31 = vmul.f32 %v7107_v46, %v12779_v47  ;;  %10004 = vmatmul.mubr.msk.f32.vlgmr.msra.gmra.mrb[2].mxu1 %vm144_vm2, %v10002_v11 }
 0x612   :  { %7253 = vmatprep.mubr.f32.mxu1 %v12655_v59 }
 0x613   :  { %v7271_v22 = vpop.permute.xlu0 %7270  ;;  %7118 = vmatprep.subr.mxu0 %v7110_v31  ;;  %v7102_v19 = vpop.permute.xlu1 %7101 }
 0x614   :  { %v7105_v12 = vsel %vm12780_vm3, %v7102_v19, %v7104_v63  ;;  %v7106_v10 = vsel %vm12781_vm4, %v7100_v37, %v7102_v19  ;;  %7119 = vmatpush1.msra.mxu0 %v7109_v20  ;;  %v7275_v51 = vsel %vm12784_vm5, %v7271_v22, %v7265_v21  ;;  %v12786_v37 = vld [vmem:[#allocation51_spill] sm:$0xff]  ;;  %vm12806_vm3 = vmmov %vm12805_vm1 }
 0x615   :  { %v7111_v11 = vmul.f32 %v7106_v10, %v12782_v40  ;;  %v7112_v35 = vmul.f32 %v7105_v12, %v12783_v41  ;;  %v7276_v20 = vmul.f32 %v7275_v51, %v11160_v57  ;;  %v10008_v10 = vld [vmem:[%s12497_s6 + $0x60] sm:$0xff]  ;;  %vm12809_vm4 = vmmov %vm12805_vm1 }
 0x616   :  { %10006 = vmatmul.mubr.msk.f32.vlgmr.msra.gmra.mrb[2].mxu0 %vm144_vm2, %v10005_v0  ;;  %vm12810_vm5 = vmmov %vm12805_vm1 }
 0x617   :  { %v7585_v46 = vpop.permute.xlu0 %7584  ;;  %7189 = vmatprep.subr.mxu1 %v7112_v35  ;;  %v7267_v47 = vpop.permute.xlu1 %7266  ;;  %7349 = vmatprep.mubr.f32.mxu0 %v12655_v59  ;;  %v12790_v35 = vld [vmem:[#allocation52_spill] sm:$0xff] }
 0x618   :  { %v7274_v63 = vsel %vm12785_vm6, %v7265_v21, %v7267_v47  ;;  %7190 = vmatpush1.msra.mxu1 %v7111_v11  ;;  %vm12813_vm6 = vcmp.lt.s32.totalorder %v10584_v7, 119  ;;  %v10023_v7 = vld [vmem:[%s12497_s6 + $0x88] sm:$0xff] }
 0x619   :  { %v7277_v31 = vmul.f32 %v7274_v63, %v12786_v37  ;;  %10007 = vmatmul.mubr.msk.f32.vlgmr.msra.gmra.mrb[2].mxu1 %vm144_vm2, %v10005_v0  ;;  %v12793_v63 = vld [vmem:[#allocation55_spill] sm:$0xff] }
 0x61a   :  { %7420 = vmatprep.mubr.f32.mxu1 %v12655_v59 }
 0x61b   :  { %v7583_v19 = vpop.permute.xlu0 %7582  ;;  %7285 = vmatprep.subr.mxu0 %v7277_v31  ;;  %v7269_v12 = vpop.permute.xlu1 %7268 }
 0x61c   :  { %v7272_v40 = vsel %vm12787_vm7, %v7269_v12, %v7271_v22  ;;  %v7273_v21 = vsel %vm12788_vm8, %v7267_v47, %v7269_v12  ;;  %7286 = vmatpush1.msra.mxu0 %v7276_v20  ;;  %v12796_v12 = vld [vmem:[#allocation54_spill] sm:$0xff]  ;;  %vm12814_vm7 = vmmov %vm12813_vm6 }
 0x61d   :  { %v7278_v0 = vmul.f32 %v7273_v21, %v11155_v45  ;;  %v7279_v57 = vmul.f32 %v7272_v40, %v11164_v53  ;;  %7436 = vmatprep.subr.mxu0 %v11683_v3  ;;  %v7592_v45 = vsel %vm12791_vm10, %v7583_v19, %v7585_v46  ;;  %v10011_v3 = vld [vmem:[%s12497_s6 + $0x68] sm:$0xff]  ;;  %vm12816_vm8 = vmmov %vm12813_vm6 }
 0x61e   :  { %10009 = vmatmul.mubr.msk.f32.vlgmr.msra.gmra.mrb[2].mxu0 %vm144_vm2, %v10008_v10  ;;  %v7594_v37 = vmul.f32 %v7592_v45, %v12793_v63 }
 0x61f   :  { %7437 = vmatpush1.msra.mxu0 %v11675_v54  ;;  %v7752_v11 = vpop.permute.xlu0 %7751  ;;  %7356 = vmatprep.subr.mxu1 %v7279_v57  ;;  %v7587_v41 = vpop.permute.xlu1 %7586 }
 0x620   :  { %v7591_v22 = vsel %vm12789_vm9, %v7585_v46, %v7587_v41  ;;  %7357 = vmatpush1.msra.mxu1 %v7278_v0  ;;  %7500 = vmatprep.mubr.f32.mxu0 %v12655_v59  ;;  %v12795_v46 = vld [vmem:[#allocation53_spill] sm:$0xff]  ;;  %vm12817_vm9 = vmmov %vm12813_vm6 }
 0x621   :  { %v7595_v51 = vmul.f32 %v7591_v22, %v12790_v35  ;;  %10010 = vmatmul.mubr.msk.f32.vlgmr.msra.gmra.mrb[2].mxu1 %vm144_vm2, %v10008_v10  ;;  %7507 = vmatprep.subr.mxu1 %v11677_v58  ;;  %v10014_v22 = vld [vmem:[%s12497_s6 + $0x70] sm:$0xff] }
 0x622   :  { %7508 = vmatpush1.msra.mxu1 %v11689_v14  ;;  %7571 = vmatprep.mubr.f32.mxu1 %v12655_v59 }
 0x623   :  { %v7750_v53 = vpop.permute.xlu0 %7749  ;;  %7603 = vmatprep.subr.mxu0 %v7595_v51  ;;  %v7589_v54 = vpop.permute.xlu1 %7588  ;;  %v12801_v51 = vld [vmem:[#allocation59_spill] sm:$0xff] }
 0x624   :  { %v7593_v47 = vsel %vm12792_vm11, %v7589_v54, %v7583_v19  ;;  %v7590_v58 = vsel %vm12794_vm12, %v7587_v41, %v7589_v54  ;;  %v12798_v19 = vld [vmem:[#allocation56_spill] sm:$0xff]  ;;  %v7759_v0 = vsel %vm12799_vm14, %v7750_v53, %v7752_v11 }
 0x625   :  { %v7597_v31 = vmul.f32 %v7593_v47, %v12795_v46  ;;  %v7596_v10 = vmul.f32 %v7590_v58, %v12796_v12  ;;  %v7761_v45 = vmul.f32 %v7759_v0, %v12801_v51  ;;  %v12804_v47 = vld [vmem:[#allocation58_spill] sm:$0xff]  ;;  %v10017_v12 = vld [vmem:[%s12497_s6 + $0x78] sm:$0xff] }
 0x626   :  { %10012 = vmatmul.mubr.msk.f32.vlgmr.msra.gmra.mrb[2].mxu0 %vm144_vm2, %v10011_v3 }
 0x627   :  { %7604 = vmatpush1.msra.mxu0 %v7594_v37  ;;  %v7919_v14 = vpop.permute.xlu0 %7918  ;;  %7674 = vmatprep.subr.mxu1 %v7597_v31  ;;  %v7754_v20 = vpop.permute.xlu1 %7753  ;;  %v12807_v31 = vld [vmem:[#allocation60_spill] sm:$0xff] }
 0x628   :  { %v7758_v40 = vsel %vm12797_vm13, %v7752_v11, %v7754_v20  ;;  %7667 = vmatprep.mubr.f32.mxu0 %v12655_v59 }
 0x629   :  { %v7762_v21 = vmul.f32 %v7758_v40, %v12798_v19  ;;  %10013 = vmatmul.mubr.msk.f32.vlgmr.msra.gmra.mrb[2].mxu1 %vm144_vm2, %v10011_v3  ;;  %v12803_v3 = vld [vmem:[#allocation57_spill] sm:$0xff]  ;;  %v12808_v40 = vld [vmem:[#allocation62_spill] sm:$0xff] }
 0x62a   :  { %7675 = vmatpush1.msra.mxu1 %v7596_v10  ;;  %7738 = vmatprep.mubr.f32.mxu1 %v12655_v59 }
 0x62b   :  { %v7917_v57 = vpop.permute.xlu0 %7916  ;;  %7770 = vmatprep.subr.mxu0 %v7762_v21  ;;  %v7756_v41 = vpop.permute.xlu1 %7755 }
 0x62c   :  { %v7760_v35 = vsel %vm12800_vm15, %v7756_v41, %v7750_v53  ;;  %v7757_v54 = vsel %vm12802_vm0, %v7754_v20, %v7756_v41  ;;  %v7926_v46 = vsel %vm12806_vm3, %v7917_v57, %v7919_v14 }
 0x62d   :  { %v7764_v11 = vmul.f32 %v7760_v35, %v12803_v3  ;;  %v7763_v63 = vmul.f32 %v7757_v54, %v12804_v47  ;;  %v7928_v19 = vmul.f32 %v7926_v46, %v12808_v40  ;;  %v12812_v35 = vld [vmem:[#allocation61_spill] sm:$0xff]  ;;  %v12815_v3 = vld [vmem:[#allocation64_spill] sm:$0xff] }
 0x62e   :  { %10015 = vmatmul.mubr.msk.f32.vlgmr.msra.gmra.mrb[2].mxu0 %vm144_vm2, %v10014_v22  ;;  %v10020_v47 = vld [vmem:[%s12497_s6 + $0x80] sm:$0xff] }
 0x62f   :  { %7771 = vmatpush1.msra.mxu0 %v7761_v45  ;;  %7841 = vmatprep.subr.mxu1 %v7764_v11  ;;  %v7921_v37 = vpop.permute.xlu1 %7920  ;;  %v8086_v58 = vpop.permute.xlu0 %8085 }
 0x630   :  { %7834 = vmatprep.mubr.f32.mxu0 %v12655_v59  ;;  %v7925_v53 = vsel %vm12805_vm1, %v7919_v14, %v7921_v37  ;;  %v12811_v14 = vld [vmem:[#allocation63_spill] sm:$0xff]  ;;  %vm12863_vm1 = vcmask 1041408  }
 0x631   :  { %10016 = vmatmul.mubr.msk.f32.vlgmr.msra.gmra.mrb[2].mxu1 %vm144_vm2, %v10014_v22  ;;  %v7929_v20 = vmul.f32 %v7925_v53, %v12807_v31  ;;  %vm12864_vm3 = vmmov %vm12863_vm1 }
 0x632   :  { %7842 = vmatpush1.msra.mxu1 %v7763_v63  ;;  %7905 = vmatprep.mubr.f32.mxu1 %v12655_v59 }
 0x633   :  { %7937 = vmatprep.subr.mxu0 %v7929_v20  ;;  %v8084_v22 = vpop.permute.xlu0 %8083 }
 0x634   :  { %v7923_v10 = vpop.permute.xlu1 %7922 }
 0x635   :  { %v7924_v21 = vsel %vm12809_vm4, %v7921_v37, %v7923_v10  ;;  %v7927_v0 = vsel %vm12810_vm5, %v7923_v10, %v7917_v57  ;;  %v8093_v57 = vsel %vm12814_vm7, %v8084_v22, %v8086_v58  ;;  %v12830_v10 = vld [vmem:[#allocation15_spill] sm:$0xff]  ;;  %vm12865_vm4 = vcmask 1043456  }
 0x636   :  { %v7931_v41 = vmul.f32 %v7927_v0, %v12811_v14  ;;  %10018 = vmatmul.mubr.msk.f32.vlgmr.msra.gmra.mrb[2].mxu0 %vm144_vm2, %v10017_v12  ;;  %v7930_v51 = vmul.f32 %v7924_v21, %v12812_v35  ;;  %v8095_v37 = vmul.f32 %v8093_v57, %v11305_v48  ;;  %v8253_v48 = vmul.f32 %v11841_v61, %v11325_v30  ;;  %v12832_v21 = vld [vmem:[#allocation9_spill] sm:$0xff]  ;;  %v12833_v14 = vld [vmem:[#allocation72_spill] sm:$0xff]  ;;  %v12837_v57 = vld [vmem:[#allocation75_spill] sm:$0xff] }
 0x637   :  { %7938 = vmatpush1.msra.mxu0 %v7928_v19  ;;  %8001 = vmatprep.mubr.f32.mxu0 %v12655_v59  ;;  %v8252_v30 = vmul.f32 %v11866_v56, %v11346_v2  ;;  %v8561_v2 = vmul.f32 %v11905_v9, %v11381_v25  ;;  %v8560_v25 = vmul.f32 %v11886_v29, %v11400_v15  ;;  %v10032_v15 = vld [vmem:[%s12497_s6 + $0xa0] sm:$0xff]  ;;  %v12822_v56 = vld [vmem:[#allocation11_spill] sm:$0xff]  ;;  %v12825_v29 = vld [vmem:[#allocation68_spill] sm:$0xff] }
 0x638   :  { %8008 = vmatprep.subr.mxu1 %v7931_v41  ;;  %v8088_v45 = vpop.permute.xlu1 %8087  ;;  %v12831_v19 = vld [vmem:[#allocation70_spill] sm:$0xff]  ;;  %v12834_v41 = vld [vmem:[#allocation12_spill] sm:$0xff]  ;;  %vm12866_vm5 = vmmov %vm12865_vm4 }
 0x639   :  { %v8092_v54 = vsel %vm12813_vm6, %v8086_v58, %v8088_v45  ;;  %10019 = vmatmul.mubr.msk.f32.vlgmr.msra.gmra.mrb[2].mxu1 %vm144_vm2, %v10017_v12  ;;  %v8251_v58 = vmul.f32 %v11870_v49, %v11316_v26  ;;  %v8408_v26 = vmul.f32 %v11805_v8, %v11351_v42  ;;  %v8407_v42 = vmul.f32 %v11824_v55, %v11370_v36  ;;  %v12824_v49 = vld [vmem:[#allocation5_spill] sm:$0xff]  ;;  %v12829_v12 = vld [vmem:[#allocation71_spill] sm:$0xff]  ;;  %v10041_v35 = vld [vmem:[%s12497_s6 + $0xb8] sm:$0xff] }
 0x63a   :  { %v8096_v11 = vmul.f32 %v8092_v54, %v12815_v3  ;;  %8009 = vmatpush1.msra.mxu1 %v7930_v51  ;;  %8072 = vmatprep.mubr.f32.mxu1 %v12655_v59  ;;  %v8563_v8 = vmul.f32 %v11881_v13, %v11384_v43  ;;  %v8716_v36 = vmul.f32 %v11936_v4, %v11411_v60  ;;  %v12828_v4 = vld [vmem:[#allocation10_spill] sm:$0xff]  ;;  %v12835_v51 = vld [vmem:[#allocation73_spill] sm:$0xff]  ;;  %v12838_v3 = vld [vmem:[#allocation19_spill] sm:$0xff]  ;;  %vm12867_vm6 = vcmask 1045504  }
 0x63b   :  { %v8562_v43 = vmul.f32 %v11901_v5, %v11403_v23  ;;  %v8715_v60 = vmul.f32 %v11919_v6, %v11430_v28  ;;  %v8871_v23 = vmul.f32 %v11967_v32, %v11441_v33  ;;  %v10035_v28 = vld [vmem:[%s12497_s6 + $0xa8] sm:$0xff]  ;;  %v12819_v33 = vld [vmem:[#allocation65_spill] sm:$0xff]  ;;  %v12826_v5 = vld [vmem:[#allocation8_spill] sm:$0xff]  ;;  %v9181_v40 = vmul.f32 %v12830_v10, %v12829_v12 }
 0x63c   :  { %8104 = vmatprep.subr.mxu0 %v8096_v11  ;;  %v8090_v63 = vpop.permute.xlu1 %8089  ;;  %v9028_v9 = vmul.f32 %v12826_v5, %v12825_v29  ;;  %v10038_v6 = vld [vmem:[%s12497_s6 + $0xb0] sm:$0xff]  ;;  %v9027_v0 = vmul.f32 %v12832_v21, %v12831_v19  ;;  %v9336_v11 = vmul.f32 %v12838_v3, %v12837_v57  ;;  %vm12868_vm7 = vmmov %vm12867_vm6 }
 0x63d   :  { %v8091_v53 = vsel %vm12816_vm8, %v8088_v45, %v8090_v63  ;;  %v8094_v46 = vsel %vm12817_vm9, %v8090_v63, %v8084_v22  ;;  %v9183_v22 = vmul.f32 %v12834_v41, %v12833_v14  ;;  %v12836_v45 = vld [vmem:[#allocation14_spill] sm:$0xff]  ;;  %v12840_v63 = vld [vmem:[#allocation13_spill] sm:$0xff] }
 0x63e   :  { %v8098_v31 = vmul.f32 %v8094_v46, %v11308_v1  ;;  %10021 = vmatmul.mubr.msk.f32.vlgmr.msra.gmra.mrb[2].mxu0 %vm144_vm2, %v10020_v47  ;;  %v8097_v20 = vmul.f32 %v8091_v53, %v11301_v38  ;;  %v8250_v1 = vmul.f32 %v11846_v50, %v11343_v17  ;;  %v8406_v38 = vmul.f32 %v11828_v16, %v11354_v44  ;;  %v10026_v17 = vld [vmem:[%s12497_s6 + $0x90] sm:$0xff]  ;;  %v12841_v53 = vld [vmem:[#allocation76_spill] sm:$0xff] }
 0x63f   :  { %8105 = vmatpush1.msra.mxu0 %v8095_v37  ;;  %8168 = vmatprep.mubr.f32.mxu0 %v12655_v59  ;;  %v8405_v44 = vmul.f32 %v11809_v18, %v11373_v34  ;;  %v10029_v34 = vld [vmem:[%s12497_s6 + $0x98] sm:$0xff]  ;;  %v8718_v18 = vmul.f32 %v11914_v27, %v11414_v62  ;;  %v8717_v62 = vmul.f32 %v11932_v24, %v11433_v52  ;;  %v12818_v27 = vld [vmem:[#allocation6_spill] sm:$0xff]  ;;  %v12820_v16 = vld [vmem:[#allocation7_spill] sm:$0xff] }
 0x640   :  { %8259 = vmatprep.subr.mxu0 %v8251_v58  ;;  %8175 = vmatprep.subr.mxu1 %v8098_v31  ;;  %v8873_v55 = vmul.f32 %v12818_v27, %v11444_v39  ;;  %v8870_v61 = vmul.f32 %v12820_v16, %v12819_v33  ;;  %v12821_v50 = vld [vmem:[#allocation67_spill] sm:$0xff]  ;;  %v12823_v39 = vld [vmem:[#allocation66_spill] sm:$0xff]  ;;  %v12827_v24 = vld [vmem:[#allocation69_spill] sm:$0xff]  ;;  %v9180_v54 = vmul.f32 %v12836_v45, %v12835_v51 }
 0x641   :  { %10022 = vmatmul.mubr.msk.f32.vlgmr.msra.gmra.mrb[2].mxu1 %vm144_vm2, %v10020_v47  ;;  %v9026_v52 = vmul.f32 %v12822_v56, %v12821_v50  ;;  %v8872_v13 = vmul.f32 %v12824_v49, %v12823_v39  ;;  %v9025_v32 = vmul.f32 %v12828_v4, %v12827_v24  ;;  %v12839_v47 = vld [vmem:[#allocation74_spill] sm:$0xff]  ;;  %v12842_v46 = vld [vmem:[#allocation16_spill] sm:$0xff]  ;;  %v10044_v31 = vld [vmem:[%s12497_s6 + $0xc0] sm:$0xff] }
 0x642   :  { %8176 = vmatpush1.msra.mxu1 %v8097_v20  ;;  %8239 = vmatprep.mubr.f32.mxu1 %v12655_v59  ;;  %v9182_v37 = vmul.f32 %v12840_v63, %v12839_v47  ;;  %v9338_v58 = vmul.f32 %v12842_v46, %v12841_v53  ;;  %v12843_v20 = vld [vmem:[#allocation77_spill] sm:$0xff] }
 0x643   :  { %8330 = vmatprep.subr.mxu1 %v8253_v48  ;;  %v12844_v48 = vld [vmem:[#allocation18_spill] sm:$0xff] }
 0x646   :  { %10024 = vmatmul.mubr.msk.f32.vlgmr.msra.gmra.mrb[2].mxu0 %vm144_vm2, %v10023_v7 }
 0x647   :  { %8260 = vmatpush1.msra.mxu0 %v8250_v1  ;;  %8323 = vmatprep.mubr.f32.mxu0 %v12655_v59  ;;  %v12845_v1 = vld [vmem:[#allocation79_spill] sm:$0xff] }
 0x648   :  { %8414 = vmatprep.subr.mxu0 %v8406_v38  ;;  %v12846_v38 = vld [vmem:[#allocation23_spill] sm:$0xff] }
 0x649   :  { %10025 = vmatmul.mubr.msk.f32.vlgmr.msra.gmra.mrb[2].mxu1 %vm144_vm2, %v10023_v7  ;;  %v9335_v7 = vmul.f32 %v12844_v48, %v12843_v20 }
 0x64a   :  { %8331 = vmatpush1.msra.mxu1 %v8252_v30  ;;  %8394 = vmatprep.mubr.f32.mxu1 %v12655_v59  ;;  %v9491_v30 = vmul.f32 %v12846_v38, %v12845_v1 }
 0x64b   :  { %8485 = vmatprep.subr.mxu1 %v8408_v26  ;;  %v12847_v26 = vld [vmem:[#allocation78_spill] sm:$0xff] }
 0x64e   :  { %10027 = vmatmul.mubr.msk.f32.vlgmr.msra.gmra.mrb[2].mxu0 %vm144_vm2, %v10026_v17 }
 0x64f   :  { %8415 = vmatpush1.msra.mxu0 %v8405_v44  ;;  %8478 = vmatprep.mubr.f32.mxu0 %v12655_v59 }
 0x650   :  { %8569 = vmatprep.subr.mxu0 %v8561_v2  ;;  %v12849_v2 = vld [vmem:[#allocation80_spill] sm:$0xff] }
 0x651   :  { %10028 = vmatmul.mubr.msk.f32.vlgmr.msra.gmra.mrb[2].mxu1 %vm144_vm2, %v10026_v17  ;;  %v12848_v17 = vld [vmem:[#allocation17_spill] sm:$0xff] }
 0x652   :  { %8486 = vmatpush1.msra.mxu1 %v8407_v42  ;;  %8549 = vmatprep.mubr.f32.mxu1 %v12655_v59  ;;  %v9337_v44 = vmul.f32 %v12848_v17, %v12847_v26  ;;  %v12850_v42 = vld [vmem:[#allocation20_spill] sm:$0xff] }
 0x653   :  { %8640 = vmatprep.subr.mxu1 %v8563_v8  ;;  %v9493_v8 = vmul.f32 %v12850_v42, %v12849_v2 }
 0x656   :  { %10030 = vmatmul.mubr.msk.f32.vlgmr.msra.gmra.mrb[2].mxu0 %vm144_vm2, %v10029_v34 }
 0x657   :  { %8570 = vmatpush1.msra.mxu0 %v8560_v25  ;;  %8633 = vmatprep.mubr.f32.mxu0 %v12655_v59  ;;  %v12851_v25 = vld [vmem:[#allocation81_spill] sm:$0xff] }
 0x658   :  { %8724 = vmatprep.subr.mxu0 %v8716_v36  ;;  %v12852_v36 = vld [vmem:[#allocation22_spill] sm:$0xff] }
 0x659   :  { %10031 = vmatmul.mubr.msk.f32.vlgmr.msra.gmra.mrb[2].mxu1 %vm144_vm2, %v10029_v34  ;;  %v10047_v34 = vld [vmem:[%s12497_s6 + $0xc8] sm:$0xff] }
 0x65a   :  { %8641 = vmatpush1.msra.mxu1 %v8562_v43  ;;  %8704 = vmatprep.mubr.f32.mxu1 %v12655_v59  ;;  %v9490_v43 = vmul.f32 %v12852_v36, %v12851_v25 }
 0x65b   :  { %8795 = vmatprep.subr.mxu1 %v8718_v18  ;;  %v12853_v18 = vld [vmem:[#allocation82_spill] sm:$0xff] }
 0x65e   :  { %10033 = vmatmul.mubr.msk.f32.vlgmr.msra.gmra.mrb[2].mxu0 %vm144_vm2, %v10032_v15 }
 0x65f   :  { %8725 = vmatpush1.msra.mxu0 %v8715_v60  ;;  %8788 = vmatprep.mubr.f32.mxu0 %v12655_v59 }
 0x660   :  { %8879 = vmatprep.subr.mxu0 %v8871_v23  ;;  %v10050_v23 = vld [vmem:[%s12497_s6 + $0xd0] sm:$0xff] }
 0x661   :  { %10034 = vmatmul.mubr.msk.f32.vlgmr.msra.gmra.mrb[2].mxu1 %vm144_vm2, %v10032_v15  ;;  %v12854_v15 = vld [vmem:[#allocation21_spill] sm:$0xff] }
 0x662   :  { %8796 = vmatpush1.msra.mxu1 %v8717_v62  ;;  %8859 = vmatprep.mubr.f32.mxu1 %v12655_v59  ;;  %v9492_v60 = vmul.f32 %v12854_v15, %v12853_v18  ;;  %v9648_v62 = vpop.permute.xlu0 %9647 }
 0x663   :  { %8950 = vmatprep.subr.mxu1 %v8873_v55 }
 0x666   :  { %10036 = vmatmul.mubr.msk.f32.vlgmr.msra.gmra.mrb[2].mxu0 %vm144_vm2, %v10035_v28 }
 0x667   :  { %8880 = vmatpush1.msra.mxu0 %v8870_v61  ;;  %8943 = vmatprep.mubr.f32.mxu0 %v12655_v59 }
 0x668   :  { %9034 = vmatprep.subr.mxu0 %v9026_v52 }
 0x669   :  { %10037 = vmatmul.mubr.msk.f32.vlgmr.msra.gmra.mrb[2].mxu1 %vm144_vm2, %v10035_v28 }
 0x66a   :  { %8951 = vmatpush1.msra.mxu1 %v8872_v13  ;;  %9014 = vmatprep.mubr.f32.mxu1 %v12655_v59 }
 0x66b   :  { %9105 = vmatprep.subr.mxu1 %v9028_v9 }
 0x66e   :  { %10039 = vmatmul.mubr.msk.f32.vlgmr.msra.gmra.mrb[2].mxu0 %vm144_vm2, %v10038_v6 }
 0x66f   :  { %9035 = vmatpush1.msra.mxu0 %v9025_v32  ;;  %9098 = vmatprep.mubr.f32.mxu0 %v12655_v59 }
 0x670   :  { %9189 = vmatprep.subr.mxu0 %v9181_v40 }
 0x671   :  { %10040 = vmatmul.mubr.msk.f32.vlgmr.msra.gmra.mrb[2].mxu1 %vm144_vm2, %v10038_v6 }
 0x672   :  { %9106 = vmatpush1.msra.mxu1 %v9027_v0  ;;  %9169 = vmatprep.mubr.f32.mxu1 %v12655_v59 }
 0x673   :  { %9260 = vmatprep.subr.mxu1 %v9183_v22 }
 0x676   :  { %10042 = vmatmul.mubr.msk.f32.vlgmr.msra.gmra.mrb[2].mxu0 %vm144_vm2, %v10041_v35 }
 0x677   :  { %9190 = vmatpush1.msra.mxu0 %v9180_v54  ;;  %9253 = vmatprep.mubr.f32.mxu0 %v12655_v59 }
 0x678   :  { %9344 = vmatprep.subr.mxu0 %v9336_v11 }
 0x679   :  { %10043 = vmatmul.mubr.msk.f32.vlgmr.msra.gmra.mrb[2].mxu1 %vm144_vm2, %v10041_v35 }
 0x67a   :  { %9261 = vmatpush1.msra.mxu1 %v9182_v37  ;;  %9324 = vmatprep.mubr.f32.mxu1 %v12655_v59 }
 0x67b   :  { %9415 = vmatprep.subr.mxu1 %v9338_v58 }
 0x67e   :  { %10045 = vmatmul.mubr.msk.f32.vlgmr.msra.gmra.mrb[2].mxu0 %vm144_vm2, %v10044_v31 }
 0x67f   :  { %9345 = vmatpush1.msra.mxu0 %v9335_v7  ;;  %9408 = vmatprep.mubr.f32.mxu0 %v12655_v59 }
 0x680   :  { %9499 = vmatprep.subr.mxu0 %v9491_v30 }
 0x681   :  { %10046 = vmatmul.mubr.msk.f32.vlgmr.msra.gmra.mrb[2].mxu1 %vm144_vm2, %v10044_v31 }
 0x682   :  { %9416 = vmatpush1.msra.mxu1 %v9337_v44  ;;  %9479 = vmatprep.mubr.f32.mxu1 %v12655_v59 }
 0x683   :  { %9570 = vmatprep.subr.mxu1 %v9493_v8 }
 0x686   :  { %10048 = vmatmul.mubr.msk.f32.vlgmr.msra.gmra.mrb[2].mxu0 %vm144_vm2, %v10047_v34 }
 0x687   :  { %9500 = vmatpush1.msra.mxu0 %v9490_v43  ;;  %9563 = vmatprep.mubr.f32.mxu0 %v12655_v59 }
 0x689   :  { %10049 = vmatmul.mubr.msk.f32.vlgmr.msra.gmra.mrb[2].mxu1 %vm144_vm2, %v10047_v34 }
 0x68a   :  { %9571 = vmatpush1.msra.mxu1 %v9492_v60  ;;  %9634 = vmatprep.mubr.f32.mxu1 %v12655_v59 }
 0x68e   :  { %10051 = vmatmul.mubr.msk.f32.vlgmr.msra.gmra.mrb[2].mxu0 %vm144_vm2, %v10050_v23 }
 0x691   :  { %10052 = vmatmul.mubr.msk.f32.vlgmr.msra.gmra.mrb[2].mxu1 %vm144_vm2, %v10050_v23  ;;  %vm12855_vm2 = vcmask 1024  }
 0x692   :  { %vm12856_vm10 = vmmov %vm12855_vm2 }
 0x693   :  { %vm12857_vm11 = vmmov %vm12855_vm2 }
 0x694   :  { %vm12858_vm12 = vmmov %vm12855_vm2 }
 0x695   :  { %vm12859_vm13 = vmmov %vm12855_vm2 }
 0x696   :  { %vm12860_vm14 = vmmov %vm12855_vm2 }
 0x697   :  { %vm12861_vm15 = vmmov %vm12855_vm2 }
 0x698   :  { %vm12862_vm0 = vmmov %vm12855_vm2 }
 0x761   :  { %v9565_v27 = vpop.f32.mrb[2].mxu0 }
 0x762   :  { %v12397_v55 = vadd.f32 %v9648_v62, %v9565_v27  ;;  %v9567_v28 = vpop.f32.mrb[3].mxu0 }
 0x763   :  { %v12399_v33 = vadd.f32 %v9648_v62, %v9567_v28 }
 0x764   :  { %v9659_v16 = vmul.f32 %v12397_v55, %v12397_v55  ;;  %v9636_v61 = vpop.f32.mrb[2].mxu1 }
 0x765   :  { %v9654_v59 = vadd.f32 %v12399_v33, %v12397_v55  ;;  %v9660_v50 = vmul.f32 %v12399_v33, %v12399_v33  ;;  %v12407_v56 = vadd.f32 %v9648_v62, %v9636_v61  ;;  %v9638_v52 = vpop.f32.mrb[3].mxu1 }
 0x766   :  { %v12409_v39 = vadd.f32 %v9648_v62, %v9638_v52 }
 0x767   :  { %v9663_v49 = vadd.f32 %v9660_v50, %v9659_v16  ;;  %v9655_v13 = vadd.f32 %v9654_v59, %v12407_v56  ;;  %v9661_v29 = vmul.f32 %v12407_v56, %v12407_v56 }
 0x768   :  { %v9662_v5 = vmul.f32 %v12409_v39, %v12409_v39 }
 0x769   :  { %v9656_v9 = vadd.f32 %v9655_v13, %v12409_v39  ;;  %v9664_v6 = vadd.f32 %v9663_v49, %v9661_v29 }
 0x76b   :  { %9657 = vadd.xlane.f32.xlu1 %v9656_v9  ;;  %v9665_v24 = vadd.f32 %v9664_v6, %v9662_v5 }
 0x76d   :  { %9666 = vadd.xlane.f32.xlu0 %v9665_v24 }
 0x7f8   :  { %v9658_v4 = vpop.xlane.xlu1 %9657 }
 0x7f9   :  { %v9668_v32 = vsel %vm12855_vm2, %v9658_v4, 0.0  ;;  %v9702_v12 = vrot.slane %v9658_v4, 2  ;;  %v9740_v0 = vrot.slane %v9658_v4, 4  ;;  %v9777_v35 = vrot.slane %v9658_v4, 6 }
 0x7fa   :  { %v9667_v10 = vpop.xlane.xlu0 %9666  ;;  %9669 = vadd.xlane.f32.xlu0 %v9668_v32 }
 0x7fb   :  { %v9678_v40 = vsel %vm12856_vm10, %v9667_v10, 0.0  ;;  %v9715_v19 = vrot.slane %v9667_v10, 2  ;;  %v9704_v21 = vsel %vm12857_vm11, %v9702_v12, 0.0  ;;  %v9752_v41 = vrot.slane %v9667_v10, 4 }
 0x7fc   :  { %9679 = vadd.xlane.f32.xlu1 %v9678_v40  ;;  %v9742_v22 = vsel %vm12859_vm13, %v9740_v0, 0.0  ;;  %v9789_v45 = vrot.slane %v9667_v10, 6  ;;  %v9779_v54 = vsel %vm12861_vm15, %v9777_v35, 0.0 }
 0x7fd   :  { %v9717_v14 = vsel %vm12858_vm12, %v9715_v19, 0.0  ;;  %v9754_v51 = vsel %vm12860_vm14, %v9752_v41, 0.0 }
 0x7fe   :  { %9705 = vadd.xlane.f32.xlu0 %v9704_v21  ;;  %v9791_v57 = vsel %vm12862_vm0, %v9789_v45, 0.0 }
 0x800   :  { %9718 = vadd.xlane.f32.xlu1 %v9717_v14 }
 0x802   :  { %9743 = vadd.xlane.f32.xlu0 %v9742_v22 }
 0x804   :  { %9755 = vadd.xlane.f32.xlu1 %v9754_v51 }
 0x806   :  { %9780 = vadd.xlane.f32.xlu0 %v9779_v54 }
 0x808   :  { %9792 = vadd.xlane.f32.xlu1 %v9791_v57 }
 0x887   :  { %v9670_v3 = vpop.xlane.xlu0 %9669 }
 0x888   :  { %v9671_v11 = vrot.slane %v9670_v3, 4 }
 0x889   :  { %v9680_v47 = vpop.xlane.xlu1 %9679 }
 0x88a   :  { %v9672_v63 = vadd.f32 %v9671_v11, %v9670_v3  ;;  %v9681_v37 = vrot.slane %v9680_v47, 4 }
 0x88b   :  { %v9706_v30 = vpop.xlane.xlu0 %9705 }
 0x88c   :  { %v9673_v53 = vrot.slane %v9672_v63, 2  ;;  %v9682_v46 = vadd.f32 %v9681_v37, %v9680_v47  ;;  %v9707_v17 = vrot.slane %v9706_v30, 4 }
 0x88d   :  { %v9719_v26 = vpop.xlane.xlu1 %9718 }
 0x88e   :  { %v9683_v58 = vrot.slane %v9682_v46, 2  ;;  %v9674_v31 = vadd.f32 %v9673_v53, %v9672_v63  ;;  %v9720_v44 = vrot.slane %v9719_v26, 4  ;;  %v9708_v2 = vadd.f32 %v9707_v17, %v9706_v30  ;;  %v5267_v30 = vld [vmem:[%s12499_s8] sm:$0xff] }
 0x88f   :  { %v9744_v27 = vpop.xlane.xlu0 %9743 }
 0x890   :  { %v9675_v20 = vrot.slane %v9674_v31, 1  ;;  %v9684_v48 = vadd.f32 %v9683_v58, %v9682_v46  ;;  %v9721_v42 = vadd.f32 %v9720_v44, %v9719_v26  ;;  %v9709_v8 = vrot.slane %v9708_v2, 2 }
 0x891   :  { %v9756_v28 = vpop.xlane.xlu1 %9755  ;;  %v9745_v16 = vrot.slane %v9744_v27, 4 }
 0x892   :  { %v9676_v7 = vadd.f32 %v9675_v20, %v9674_v31  ;;  %v9685_v1 = vrot.slane %v9684_v48, 1  ;;  %v9722_v34 = vrot.slane %v9721_v42, 2  ;;  %v9710_v36 = vadd.f32 %v9709_v8, %v9708_v2 }
 0x893   :  { %v9757_v61 = vrot.slane %v9756_v28, 4  ;;  %v9746_v59 = vadd.f32 %v9745_v16, %v9744_v27  ;;  %v9781_v12 = vpop.xlane.xlu0 %9780 }
 0x894   :  { %10285 = vpush %v9676_v7  ;;  %v9686_v38 = vadd.f32 %v9685_v1, %v9684_v48  ;;  %v9723_v43 = vadd.f32 %v9722_v34, %v9721_v42  ;;  %v9711_v18 = vrot.slane %v9710_v36, 1  ;;  %v9782_v21 = vrot.slane %v9781_v12, 4  ;;  %v5268_v42 = vld [vmem:[%s12500_s9] sm:$0xff] }
 0x895   :  { %v9758_v50 = vadd.f32 %v9757_v61, %v9756_v28  ;;  %v9747_v52 = vrot.slane %v9746_v59, 2  ;;  %v9793_v10 = vpop.xlane.xlu1 %9792 }
 0x896   :  { %10287 = vpush %v9686_v38  ;;  %v9724_v15 = vrot.slane %v9723_v43, 1  ;;  %v9712_v23 = vadd.f32 %v9711_v18, %v9710_v36  ;;  %v9794_v14 = vrot.slane %v9793_v10, 4  ;;  %v9783_v51 = vadd.f32 %v9782_v21, %v9781_v12 }
 0x897   :  { %v9759_v49 = vrot.slane %v9758_v50, 2  ;;  %v9748_v29 = vadd.f32 %v9747_v52, %v9746_v59 }
 0x898   :  { %v9725_v62 = vadd.f32 %v9724_v15, %v9723_v43  ;;  %v9795_v45 = vadd.f32 %v9794_v14, %v9793_v10  ;;  %v9784_v54 = vrot.slane %v9783_v51, 2 }
 0x899   :  { %v9760_v5 = vadd.f32 %v9759_v49, %v9758_v50  ;;  %v9749_v9 = vrot.slane %v9748_v29, 1 }
 0x89a   :  { %v9796_v57 = vrot.slane %v9795_v45, 2  ;;  %v9785_v11 = vadd.f32 %v9784_v54, %v9783_v51 }
 0x89b   :  { %v9761_v6 = vrot.slane %v9760_v5, 1  ;;  %v9750_v4 = vadd.f32 %v9749_v9, %v9748_v29 }
 0x89c   :  { %v9797_v47 = vadd.f32 %v9796_v57, %v9795_v45  ;;  %v9786_v63 = vrot.slane %v9785_v11, 1 }
 0x89d   :  { %v9762_v32 = vadd.f32 %v9761_v6, %v9760_v5  ;;  %v10349_v5 = vld [vmem:[%s12491_s0 + $0x8] sm:$0xff]  ;;  %v10350_v6 = vld [vmem:[%s12491_s0 + $0x10] sm:$0xff] }
 0x89e   :  { %v9798_v37 = vrot.slane %v9797_v47, 1  ;;  %v9787_v46 = vadd.f32 %v9786_v63, %v9785_v11 }
 0x8a0   :  { %v9799_v58 = vadd.f32 %v9798_v37, %v9797_v47 }
 0x8c5   :  { %s10286_s6 = spop %10285 }
 0x8c6   :  { %s12425_s7 = smul.f32 0.0009765625, %s10286_s6 }
 0x8c7   :  { %s10288_s28 = spop %10287 }
 0x8c8   :  { %s9690_s26 = smul.f32 %s12425_s7, %s12425_s7  ;;  %s9698_s21 = ssub.f32 0.0, %s12425_s7 }
 0x8c9   :  { %s9689_s22 = smul.f32 0.0009765625, %s10288_s28 }
 0x8cb   :  { %s9691_s24 = ssub.f32 %s9689_s22, %s9690_s26 }
 0x8cd   :  { %s9692_s29 = smax.f32 %s10386_s10, %s9691_s24 }
 0x8ce   :  { %s9693_s23 = sadd.f32 1e-05, %s9692_s29 }
 0x8d0   :  { %v9694_v25 = vstv %s9693_s23 }
 0x8d1   :  { %10340 = vrsqrt.f32 %v9694_v25 }
 0x8db   :  { %v10341_v60 = vpop.eup %10340 }
 0x8dc   :  { %10289 = vpush %v10341_v60 }
 0x8dd   :  { %10291 = vpush %v9712_v23 }
 0x8de   :  { %10293 = vpush %v9725_v62 }
 0x90d   :  { %s12431_s2 = spop %10289 }
 0x90e   :  { %s12434_s20 = smul.f32 %s12431_s2, %s9698_s21  ;;  %s10292_s27 = spop %10291  ;;  %v9697_v40 = vstv %s12431_s2 }
 0x90f   :  { %s12436_s4 = smul.f32 0.0009765625, %s10292_s27  ;;  %s10294_s5 = spop %10293 }
 0x910   :  { %s9728_s25 = smul.f32 0.0009765625, %s10294_s5  ;;  %v9700_v41 = vstv %s12434_s20 }
 0x911   :  { %s9729_s30 = smul.f32 %s12436_s4, %s12436_s4  ;;  %s9737_s15 = ssub.f32 0.0, %s12436_s4 }
 0x913   :  { %s9730_s12 = ssub.f32 %s9728_s25, %s9729_s30 }
 0x915   :  { %s9731_s13 = smax.f32 %s10386_s10, %s9730_s12 }
 0x916   :  { %s9732_s14 = sadd.f32 1e-05, %s9731_s13 }
 0x918   :  { %v9733_v13 = vstv %s9732_s14 }
 0x919   :  { %10342 = vrsqrt.f32 %v9733_v13 }
 0x923   :  { %v10343_v24 = vpop.eup %10342 }
 0x924   :  { %10295 = vpush %v10343_v24 }
 0x925   :  { %10297 = vpush %v9750_v4  ;;  %v10351_v4 = vld [vmem:[%s12491_s0 + $0x18] sm:$0xff] }
 0x926   :  { %10299 = vpush %v9762_v32 }
 0x955   :  { %s10296_s16 = spop %10295 }
 0x956   :  { %v9736_v19 = vstv %s10296_s16  ;;  %s9738_s17 = smul.f32 %s10296_s16, %s9737_s15  ;;  %s10298_s18 = spop %10297 }
 0x957   :  { %v9814_v0 = vsel %vm12863_vm1, %v9697_v40, %v9736_v19  ;;  %s12444_s19 = smul.f32 0.0009765625, %s10298_s18  ;;  %s10300_s3 = spop %10299 }
 0x958   :  { %v9739_v22 = vstv %s9738_s17  ;;  %s9765_s1 = smul.f32 0.0009765625, %s10300_s3 }
 0x959   :  { %v9818_v35 = vsel %vm12864_vm3, %v9700_v41, %v9739_v22  ;;  %s9766_s6 = smul.f32 %s12444_s19, %s12444_s19  ;;  %s9774_s22 = ssub.f32 0.0, %s12444_s19 }
 0x95b   :  { %s9767_s7 = ssub.f32 %s9765_s1, %s9766_s6 }
 0x95d   :  { %s9768_s26 = smax.f32 %s10386_s10, %s9767_s7 }
 0x95e   :  { %s9769_s28 = sadd.f32 1e-05, %s9768_s26 }
 0x960   :  { %v9770_v3 = vstv %s9769_s28 }
 0x961   :  { %10344 = vrsqrt.f32 %v9770_v3 }
 0x96b   :  { %v10345_v53 = vpop.eup %10344 }
 0x96c   :  { %10301 = vpush %v10345_v53 }
 0x96d   :  { %10303 = vpush %v9787_v46 }
 0x96e   :  { %10305 = vpush %v9799_v58 }
 0x99d   :  { %s10302_s24 = spop %10301 }
 0x99e   :  { %v9773_v31 = vstv %s10302_s24  ;;  %s9775_s29 = smul.f32 %s10302_s24, %s9774_s22  ;;  %s10304_s23 = spop %10303 }
 0x99f   :  { %v9815_v20 = vsel %vm12865_vm4, %v9814_v0, %v9773_v31  ;;  %s9801_s21 = smul.f32 0.0009765625, %s10304_s23  ;;  %s10306_s2 = spop %10305 }
 0x9a0   :  { %v9776_v48 = vstv %s9775_s29  ;;  %s9802_s20 = smul.f32 0.0009765625, %s10306_s2 }
 0x9a1   :  { %v9819_v7 = vsel %vm12866_vm5, %v9818_v35, %v9776_v48  ;;  %s9803_s27 = smul.f32 %s9801_s21, %s9801_s21  ;;  %s9811_s30 = ssub.f32 0.0, %s9801_s21 }
 0x9a3   :  { %s9804_s4 = ssub.f32 %s9802_s20, %s9803_s27 }
 0x9a5   :  { %s9805_s5 = smax.f32 %s10386_s10, %s9804_s4  ;;  %s9867_s10 = sld [smem:[#allocation2 + $0x1]] }
 0x9a6   :  { %s9806_s25 = sadd.f32 1e-05, %s9805_s5 }
 0x9a8   :  { %v9807_v1 = vstv %s9806_s25 }
 0x9a9   :  { %10346 = vrsqrt.f32 %v9807_v1 }
 0x9ab   :  { %v9845_v23 = vstv %s9867_s10 }
 0x9b3   :  { %v10347_v38 = vpop.eup %10346 }
 0x9b4   :  { %10307 = vpush %v10347_v38 }
 0x9e5   :  { %s10308_s14 = spop %10307 }
 0x9e6   :  { %v9810_v26 = vstv %s10308_s14  ;;  %s9812_s15 = smul.f32 %s10308_s14, %s9811_s30 }
 0x9e7   :  { %v9816_v17 = vsel %vm12867_vm6, %v9815_v20, %v9810_v26 }
 0x9e8   :  { %v9813_v44 = vstv %s9812_s15  ;;  %v9817_v2 = vmul.f32 %v9816_v17, %v5267_v30 }
 0x9e9   :  { %v9820_v8 = vsel %vm12868_vm7, %v9819_v7, %v9813_v44 }
 0x9ea   :  { %v9821_v34 = vmul.f32 %v9820_v8, %v5267_v30  ;;  %9825 = vperm.xlu0 %10330, %v9817_v2  }
 0x9ec   :  { %v9822_v25 = vadd.f32 %v9821_v34, %v5268_v42 }
 0x9ee   :  { %9834 = vperm.xlu1 %10331, %v9822_v25  }
 0xa69   :  { %v9826_v36 = vpop.permute.xlu0 %9825 }
 0xa6a   :  { %v9828_v43 = vmul.f32 %v9826_v36, %v12397_v55  ;;  %v9829_v18 = vmul.f32 %v9826_v36, %v12399_v33  ;;  %v9830_v15 = vmul.f32 %v9826_v36, %v12407_v56  ;;  %v9831_v60 = vmul.f32 %v9826_v36, %v12409_v39  ;;  %v10348_v39 = vld [vmem:[%s12491_s0] sm:$0xff] }
 0xa6d   :  { %v9835_v62 = vpop.permute.xlu1 %9834 }
 0xa6e   :  { %v9837_v27 = vadd.f32 %v9835_v62, %v9828_v43  ;;  %v9838_v28 = vadd.f32 %v9835_v62, %v9829_v18  ;;  %v9839_v16 = vadd.f32 %v9835_v62, %v9830_v15  ;;  %v9840_v61 = vadd.f32 %v9835_v62, %v9831_v60 }
 0xa70   :  { %vm9841_vm8 = vcmp.gt.f32.partialorder %v9837_v27, 0.0  ;;  %vm9842_vm9 = vcmp.gt.f32.partialorder %v9838_v28, 0.0  ;;  %vm9843_vm2 = vcmp.gt.f32.partialorder %v9839_v16, 0.0  ;;  %vm9844_vm10 = vcmp.gt.f32.partialorder %v9840_v61, 0.0 }
 0xa71   :  { %v9846_v59 = vmul.f32 %v9845_v23, %v9837_v27  ;;  %v9847_v50 = vmul.f32 %v9845_v23, %v9838_v28  ;;  %v9848_v52 = vmul.f32 %v9845_v23, %v9839_v16  ;;  %v9849_v55 = vmul.f32 %v9845_v23, %v9840_v61 }
 0xa73   :  { %v9850_v49 = vsel %vm9841_vm8, %v9837_v27, %v9846_v59  ;;  %v9851_v33 = vsel %vm9842_vm9, %v9838_v28, %v9847_v50  ;;  %v9852_v13 = vsel %vm9843_vm2, %v9839_v16, %v9848_v52  ;;  %v9853_v56 = vsel %vm9844_vm10, %v9840_v61, %v9849_v55 }
 0xa74   :  { %v9854_v29 = vadd.f32 %v10348_v39, %v9850_v49  ;;  %v9855_v9 = vadd.f32 %v10349_v5, %v9851_v33  ;;  %v9856_v24 = vadd.f32 %v10350_v6, %v9852_v13  ;;  %v9857_v32 = vadd.f32 %v10351_v4, %v9853_v56 }
 0xa76   :  { %9858 = vst [vmem:[%s12502_s11] sm:$0xff] %v9854_v29  ;;  %9859 = vst [vmem:[%s12502_s11 + $0x8] sm:$0xff] %v9855_v9 }
 0xa77   :  { %9860 = vst [vmem:[%s12502_s11 + $0x10] sm:$0xff] %v9856_v24  ;;  %9861 = vst [vmem:[%s12502_s11 + $0x18] sm:$0xff] %v9857_v32 }
 0xa78   :  { %9866 = vsyncpa [#allocation3], 1 }

</bundles_post_ra>
